<compile_context>
chip_gen: v6e
topology: v6e:2x2x1
jax: 0.10.0
libtpu: 0.0.40
codegen_flags: <defaults>
</compile_context>

<pallas_src>
import jax
import jax.numpy as jnp
from jax.experimental import pallas as pl
from jax.experimental.pallas import tpu as pltpu

# ----------------------------- hyperparameters ------------------------------
N_MEL    = 16   # orig 80
DIM_EMB  = 16   # orig 256
DIM_NECK = 8    # orig 32
FREQ     = 4    # orig 32
DIM_ENC  = 32   # orig 512  (encoder conv channels)
DIM_PRE  = 32   # orig 512  (decoder conv channels / lstm1 hidden)
DIM_DEC  = 32   # orig 1024 (decoder lstm2 hidden)
DIM_POST = 32   # orig 512  (postnet conv channels)
KSIZE    = 5
PAD      = (KSIZE - 1) // 2

N_ENC_W = 3 * 2 + 2 * 2 * 3        # 3 convs * (w,b) + 2 bi-LSTM layers * 2 dirs * (wih,whh,b)
N_DEC_W = 3 + 3 * 2 + 2 * 3 + 2 + 5 * 2   # lstm1 + 3 convs + 2 lstm2 + proj + 5 postnet convs


# --------------------------- in-kernel building blocks -----------------------
def _lstm_cell(gx_t, h, c, whh_ref, H):
    """One LSTM step on (B, ...) state. gx_t = x_t @ W_ih + b (precomputed)."""
    gates = gx_t + jnp.dot(h, whh_ref[...], preferred_element_type=jnp.float32)
    sg = jax.nn.sigmoid(gates)           # full-width EUP pass
    tg = jnp.tanh(gates)                 # full-width EUP pass
    i_g = sg[:, 0:H]
    f_g = sg[:, H:2 * H]
    g_g = tg[:, 2 * H:3 * H]
    o_g = sg[:, 3 * H:4 * H]
    c_new = f_g * c + i_g * g_g
    h_new = o_g * jnp.tanh(c_new)
    return h_new, c_new


def _stack_time(h_list, Bb):
    """List of T values (Bb, H) -> (Bb*T, H) lane-dense slab."""
    T = len(h_list)
    return jnp.concatenate([h[:, None, :] for h in h_list], axis=1).reshape(Bb * T, -1)


def _lstm_uni(xf, Bb, T, wih_ref, whh_ref, b_ref, H):
    """Unidirectional LSTM. xf: (Bb*T, In) -> (Bb*T, H). Input proj hoisted."""
    gx = (jnp.dot(xf, wih_ref[...], preferred_element_type=jnp.float32)
          + b_ref[...]).reshape(Bb, T, 4 * H)
    h = jnp.zeros((Bb, H), jnp.float32)
    c = jnp.zeros((Bb, H), jnp.float32)
    hs = []
    for t in range(T):                   # static unroll (T is compile-time tiny)
        h, c = _lstm_cell(gx[:, t, :], h, c, whh_ref, H)
        hs.append(h)
    return _stack_time(hs, Bb)


def _lstm_bi(xf, Bb, T, wih_f, whh_f, b_f, wih_b, whh_b, b_b, H):
    """Bidirectional LSTM; returns per-timestep forward / backward h lists."""
    gx_f = (jnp.dot(xf, wih_f[...], preferred_element_type=jnp.float32)
            + b_f[...]).reshape(Bb, T, 4 * H)
    gx_b = (jnp.dot(xf, wih_b[...], preferred_element_type=jnp.float32)
            + b_b[...]).reshape(Bb, T, 4 * H)
    h_f = jnp.zeros((Bb, H), jnp.float32)
    c_f = jnp.zeros((Bb, H), jnp.float32)
    h_b = jnp.zeros((Bb, H), jnp.float32)
    c_b = jnp.zeros((Bb, H), jnp.float32)
    hf = [None] * T
    hb = [None] * T
    for t in range(T):                   # fwd/bwd interleaved, static unroll
        h_f, c_f = _lstm_cell(gx_f[:, t, :], h_f, c_f, whh_f, H)
        hf[t] = h_f
        tb = T - 1 - t
        h_b, c_b = _lstm_cell(gx_b[:, tb, :], h_b, c_b, whh_b, H)
        hb[tb] = h_b
    return hf, hb


def _conv_bn_act(xf, Bb, T, w_ref, b_ref, pad_ref, activation):
    """Conv1d(k, pad) + folded eval-BN + activation, split-tap formulation.

    xf: (Bb*T, Cin); w_ref: (K, Cin, Cout) with BN scale pre-folded;
    b_ref: (1, Cout); pad_ref: VMEM scratch (Bb, T+K-1, Cmax), boundary rows
    already zeroed once per kernel.
    """
    cin = xf.shape[-1]
    k, _, cout = w_ref.shape
    pad = (k - 1) // 2
    pad_ref[:, pad:pad + T, :cin] = xf.reshape(Bb, T, cin)
    y = jnp.dot(pad_ref[:, 0:T, :cin].reshape(Bb * T, cin), w_ref[0],
                preferred_element_type=jnp.float32)
    for i in range(1, k):
        y = y + jnp.dot(pad_ref[:, i:i + T, :cin].reshape(Bb * T, cin), w_ref[i],
                        preferred_element_type=jnp.float32)
    y = y + b_ref[...]
    if activation == "relu":
        y = jnp.maximum(y, 0.0)
    elif activation == "tanh":
        y = jnp.tanh(y)
    return y


def _zero_pad_rows(pad_ref, Bb, T):
    """Zero only the conv-padding boundary rows, once per kernel."""
    cmax = pad_ref.shape[-1]
    z = jnp.zeros((Bb, PAD, cmax), jnp.float32)
    pad_ref[:, 0:PAD, :] = z
    pad_ref[:, PAD + T:PAD + T + PAD, :] = z


# ------------------------------- fused bodies --------------------------------
def _encoder_body(spc, emb1, w, Bb, T, pad_ref):
    """spc: (Bb,T,N_MEL), emb1: (Bb,1,DIM_EMB). Returns list of n (Bb, 2*NECK) codes."""
    e1 = jnp.broadcast_to(emb1, (Bb, T, DIM_EMB))          # in-kernel splat
    x = jnp.concatenate([spc, e1], axis=-1).reshape(Bb * T, N_MEL + DIM_EMB)
    for li in range(3):
        x = _conv_bn_act(x, Bb, T, w[2 * li], w[2 * li + 1], pad_ref, "relu")
    # bi-LSTM layer 0: full sequence output feeds layer 1
    hf, hb = _lstm_bi(x, Bb, T, *w[6:12], H=DIM_NECK)
    x = jnp.concatenate([_stack_time(hf, Bb), _stack_time(hb, Bb)], axis=-1)
    # bi-LSTM layer 1: only the code timesteps are consumed downstream
    hf, hb = _lstm_bi(x, Bb, T, *w[12:18], H=DIM_NECK)
    n = T // FREQ
    codes = [jnp.concatenate([hf[j * FREQ + FREQ - 1], hb[j * FREQ]], axis=-1)
             for j in range(n)]
    return codes


def _decoder_postnet_body(codes, emb2, w, Bb, T, pad_ref):
    """codes: list of n (Bb, 2*NECK); emb2: (Bb,1,DIM_EMB). Returns (mel, mel_post)."""
    cdim = codes[0].shape[-1]
    # in-kernel code expansion over time (each code repeated FREQ steps)
    code_exp = jnp.concatenate(
        [jnp.broadcast_to(c[:, None, :], (Bb, FREQ, cdim)) for c in codes], axis=1)
    e2 = jnp.broadcast_to(emb2, (Bb, T, DIM_EMB))
    x = jnp.concatenate([code_exp, e2], axis=-1).reshape(Bb * T, cdim + DIM_EMB)

    x = _lstm_uni(x, Bb, T, w[0], w[1], w[2], DIM_PRE)
    for li in range(3):
        x = _conv_bn_act(x, Bb, T, w[3 + 2 * li], w[4 + 2 * li], pad_ref, "relu")
    x = _lstm_uni(x, Bb, T, w[9], w[10], w[11], DIM_DEC)
    x = _lstm_uni(x, Bb, T, w[12], w[13], w[14], DIM_DEC)
    mel = jnp.dot(x, w[15][...], preferred_element_type=jnp.float32) + w[16][...]

    # postnet (channels-last conv == torch's transposed conv stack) + residual
    y = mel
    for li in range(5):
        y = _conv_bn_act(y, Bb, T, w[17 + 2 * li], w[18 + 2 * li], pad_ref,
                         "tanh" if li < 4 else None)
    return mel, mel + y


# ------------------------------- kernel bodies --------------------------------
def _encoder_kernel(spc_ref, emb1_ref, *refs):
    w = refs[:N_ENC_W]
    codes_ref, pad_ref = refs[N_ENC_W:]
    Bb, T, _ = spc_ref.shape
    _zero_pad_rows(pad_ref, Bb, T)
    codes = _encoder_body(spc_ref[...], emb1_ref[...], w, Bb, T, pad_ref)
    for j, c in enumerate(codes):
        codes_ref[:, j:j + 1, :] = c[:, None, :]


def _generator_kernel(spc_ref, emb1_ref, emb2_ref, *refs):
    w_enc = refs[:N_ENC_W]
    w_dec = refs[N_ENC_W:N_ENC_W + N_DEC_W]
    codes_ref, mel_ref, post_ref, pad_ref = refs[N_ENC_W + N_DEC_W:]
    Bb, T, _ = spc_ref.shape
    _zero_pad_rows(pad_ref, Bb, T)
    codes = _encoder_body(spc_ref[...], emb1_ref[...], w_enc, Bb, T, pad_ref)
    for j, c in enumerate(codes):
        codes_ref[:, j:j + 1, :] = c[:, None, :]
    mel, post = _decoder_postnet_body(codes, emb2_ref[...], w_dec, Bb, T, pad_ref)
    mel_ref[...] = mel.reshape(Bb, T, N_MEL)
    post_ref[...] = post.reshape(Bb, T, N_MEL)


# ------------------------------ Pallas wrappers ------------------------------
def _call_fused(kernel, batched, weights, out_shapes, scratch_shapes, batch_blocks):
    """grid=(batch_blocks,); batched inputs blocked over batch, weights replicated."""
    B = batched[0].shape[0]
    assert B % batch_blocks == 0, "batch must divide evenly into batch blocks"
    bblk = B // batch_blocks

    def _batch_spec(a):
        nd = a.ndim
        return pl.BlockSpec((bblk,) + a.shape[1:],
                            lambda b, _nd=nd: (b,) + (0,) * (_nd - 1))

    def _rep_spec(a):
        nd = a.ndim
        return pl.BlockSpec(a.shape, lambda b, _nd=nd: (0,) * _nd)

    def _out_spec(s):
        nd = len(s.shape)
        return pl.BlockSpec((bblk,) + tuple(s.shape[1:]),
                            lambda b, _nd=nd: (b,) + (0,) * (_nd - 1))

    return pl.pallas_call(
        kernel,
        grid=(batch_blocks,),
        in_specs=[_batch_spec(a) for a in batched] + [_rep_spec(a) for a in weights],
        out_specs=[_out_spec(s) for s in out_shapes],
        out_shape=out_shapes,
        scratch_shapes=scratch_shapes,
        compiler_params=pltpu.CompilerParams(
            dimension_semantics=("parallel",),     # batch blocks -> 2nd TC on v7x
            vmem_limit_bytes=32 * 1024 * 1024),    # raise further at original config
    )(*batched, *weights)


def _flat_encoder_weights(p):
    flat = []
    for (w, b) in p["enc_convs"]:
        flat += [w, b]
    for (pf, pb) in p["enc_lstm"]:
        flat += [*pf, *pb]
    return flat


def _flat_decoder_weights(p):
    flat = list(p["dec_lstm1"])
    for (w, b) in p["dec_convs"]:
        flat += [w, b]
    for lp in p["dec_lstm2"]:
        flat += list(lp)
    flat += [p["dec_proj_w"], p["dec_proj_b"]]
    for (w, b) in p["post_convs"]:
        flat += [w, b]
    return flat


def run_encoder(params, spc, emb_1, batch_blocks=1):
    B, T, _ = spc.shape
    n = T // FREQ
    bblk = B // batch_blocks
    cmax = max(N_MEL + DIM_EMB, DIM_ENC)
    scratch = [pltpu.VMEM((bblk, T + KSIZE - 1, cmax), jnp.float32)]
    (codes,) = _call_fused(
        _encoder_kernel,
        [spc, emb_1[:, None, :]],
        _flat_encoder_weights(params),
        [jax.ShapeDtypeStruct((B, n, 2 * DIM_NECK), jnp.float32)],
        scratch, batch_blocks)
    return codes


def run_generator(params, spc, emb_1, emb_2, batch_blocks=1):
    B, T, _ = spc.shape
    n = T // FREQ
    bblk = B // batch_blocks
    cmax = max(N_MEL + DIM_EMB, DIM_ENC, DIM_PRE, DIM_POST, N_MEL)
    scratch = [pltpu.VMEM((bblk, T + KSIZE - 1, cmax), jnp.float32)]
    codes, mel, post = _call_fused(
        _generator_kernel,
        [spc, emb_1[:, None, :], emb_2[:, None, :]],
        _flat_encoder_weights(params) + _flat_decoder_weights(params),
        [jax.ShapeDtypeStruct((B, n, 2 * DIM_NECK), jnp.float32),
         jax.ShapeDtypeStruct((B, T, N_MEL), jnp.float32),
         jax.ShapeDtypeStruct((B, T, N_MEL), jnp.float32)],
        scratch, batch_blocks)
    return codes, mel, post


# ------------------------- deterministic parameters --------------------------
class _ParamGen:
    def __init__(self, seed=0):
        self.key = jax.random.PRNGKey(seed)

    def __call__(self, shape, scale=0.1):
        self.key, sub = jax.random.split(self.key)
        return (scale * jax.random.normal(sub, shape)).astype(jnp.float32)


def make_conv_bn_params(pg, cin, cout, k=KSIZE, eps=1e-5):
    # NOTE: real PyTorch Conv1d weight is (Cout, Cin, K); permute to (K, Cin, Cout)
    # before use when porting an actual checkpoint.
    w = pg((k, cin, cout))
    conv_b = pg((cout,))
    gamma = 1.0 + pg((cout,))
    beta = pg((cout,))
    r_mean = pg((cout,))
    r_var = jnp.abs(pg((cout,))) + 1.0
    # eval-mode BatchNorm1d folded: scale into the conv weight, bias kept separate
    scale = gamma / jnp.sqrt(r_var + eps)
    bias = beta + (conv_b - r_mean) * scale
    return (w * scale[None, None, :], bias.reshape(1, cout))


def make_lstm_params(pg, in_dim, h):
    wih = pg((in_dim, 4 * h))
    whh = pg((h, 4 * h))
    b = (pg((4 * h,)) + pg((4 * h,))).reshape(1, 4 * h)   # b_ih + b_hh
    return (wih, whh, b)


def make_generator_params(seed=0):
    pg = _ParamGen(seed)
    p = {}
    # Encoder: 3x (Conv1d k5 p2 + BN + ReLU), 2-layer bidirectional LSTM(H=DIM_NECK)
    p["enc_convs"] = [make_conv_bn_params(pg, N_MEL + DIM_EMB if i == 0 else DIM_ENC,
                                          DIM_ENC) for i in range(3)]
    p["enc_lstm"] = []
    for layer in range(2):
        in_dim = DIM_ENC if layer == 0 else 2 * DIM_NECK
        p["enc_lstm"].append((make_lstm_params(pg, in_dim, DIM_NECK),
                              make_lstm_params(pg, in_dim, DIM_NECK)))
    # Decoder: LSTM1 -> 3x conv+BN+ReLU -> 2-layer LSTM2 -> Linear(-> N_MEL)
    p["dec_lstm1"] = make_lstm_params(pg, 2 * DIM_NECK + DIM_EMB, DIM_PRE)
    p["dec_convs"] = [make_conv_bn_params(pg, DIM_PRE, DIM_PRE) for _ in range(3)]
    p["dec_lstm2"] = [make_lstm_params(pg, DIM_PRE if l == 0 else DIM_DEC, DIM_DEC)
                      for l in range(2)]
    p["dec_proj_w"] = pg((DIM_DEC, N_MEL))
    p["dec_proj_b"] = pg((N_MEL,)).reshape(1, N_MEL)
    # Postnet: 5x conv+BN; tanh on all but the last layer
    post = [make_conv_bn_params(pg, N_MEL, DIM_POST)]
    for _ in range(3):
        post.append(make_conv_bn_params(pg, DIM_POST, DIM_POST))
    post.append(make_conv_bn_params(pg, DIM_POST, N_MEL))
    p["post_convs"] = post
    return p


# ------------------------------- forward pass --------------------------------
def generator_forward(params, spc, emb_1, emb_2, batch_blocks=1):
    """spc: (B, T, N_MEL), emb_1/emb_2: (B, DIM_EMB). Mirrors Generator.forward."""
    B, T, _ = spc.shape
    assert T % FREQ == 0, "T must be a multiple of FREQ for code extraction"
    if emb_2 is None:
        codes = run_encoder(params, spc, emb_1, batch_blocks)
        return codes.reshape(B, -1)                       # == torch.cat(codes, -1)
    codes, mel, mel_post = run_generator(params, spc, emb_1, emb_2, batch_blocks)
    return mel[:, None], mel_post[:, None], codes.reshape(B, -1)


# ------------------------------------ main ------------------------------------
if __name__ == "__main__":
    B, T = 2, 8                                   # T must be a multiple of FREQ
    key = jax.random.PRNGKey(0)
    k1, k2, k3 = jax.random.split(key, 3)
    spc = jax.random.normal(k1, (B, T, N_MEL), jnp.float32)
    emb_1 = jax.random.normal(k2, (B, DIM_EMB), jnp.float32)
    emb_2 = jax.random.normal(k3, (B, DIM_EMB), jnp.float32)

    params = make_generator_params(seed=0)

    codes_only = generator_forward(params, spc, emb_1, None)          # encoder path
    mel, mel_post, codes = generator_forward(params, spc, emb_1, emb_2)  # full path
    jax.block_until_ready((codes_only, mel, mel_post, codes))

    assert codes_only.shape == (B, (T // FREQ) * 2 * DIM_NECK)
    assert mel.shape == (B, 1, T, N_MEL)
    assert mel_post.shape == (B, 1, T, N_MEL)
    assert codes.shape == (B, (T // FREQ) * 2 * DIM_NECK)
    # the fused kernel's encoder section must agree with the standalone encoder
    assert bool(jnp.allclose(codes_only, codes, atol=1e-5, rtol=1e-5))
    assert all(bool(jnp.all(jnp.isfinite(a))) for a in (mel, mel_post, codes))
    print("KERNEL_OK")
</pallas_src>

<mosaic_0001>
module attributes {stable_mosaic.version = 11 : i64} {
  func.func @_encoder_kernel(%arg0: i32, %arg1: memref<2x8x16xf32, #tpu.memory_space<vmem>>, %arg2: memref<2x1x16xf32, #tpu.memory_space<vmem>>, %arg3: memref<5x32x32xf32, #tpu.memory_space<vmem>>, %arg4: memref<1x32xf32, #tpu.memory_space<vmem>>, %arg5: memref<5x32x32xf32, #tpu.memory_space<vmem>>, %arg6: memref<1x32xf32, #tpu.memory_space<vmem>>, %arg7: memref<5x32x32xf32, #tpu.memory_space<vmem>>, %arg8: memref<1x32xf32, #tpu.memory_space<vmem>>, %arg9: memref<32x32xf32, #tpu.memory_space<vmem>>, %arg10: memref<8x32xf32, #tpu.memory_space<vmem>>, %arg11: memref<1x32xf32, #tpu.memory_space<vmem>>, %arg12: memref<32x32xf32, #tpu.memory_space<vmem>>, %arg13: memref<8x32xf32, #tpu.memory_space<vmem>>, %arg14: memref<1x32xf32, #tpu.memory_space<vmem>>, %arg15: memref<16x32xf32, #tpu.memory_space<vmem>>, %arg16: memref<8x32xf32, #tpu.memory_space<vmem>>, %arg17: memref<1x32xf32, #tpu.memory_space<vmem>>, %arg18: memref<16x32xf32, #tpu.memory_space<vmem>>, %arg19: memref<8x32xf32, #tpu.memory_space<vmem>>, %arg20: memref<1x32xf32, #tpu.memory_space<vmem>>, %arg21: memref<2x2x16xf32, #tpu.memory_space<vmem>>, %arg22: memref<2x12x32xf32, #tpu.memory_space<vmem>>) attributes {dimension_semantics = [#tpu.dimension_semantics<parallel>], iteration_bounds = array<i64: 1>, scalar_prefetch = 0 : i64, scratch_operands = 1 : i64, tpu.core_type = #tpu.core_type<tc>, window_params = [{transform_indices = @transform_0, window_bounds = array<i64: 2, 8, 16>}, {transform_indices = @transform_1, window_bounds = array<i64: 2, 1, 16>}, {pipeline_mode = #tpu.pipeline_mode<synchronous>, transform_indices = @transform_2, window_bounds = array<i64: 5, 32, 32>}, {pipeline_mode = #tpu.pipeline_mode<synchronous>, transform_indices = @transform_3, window_bounds = array<i64: 1, 32>}, {pipeline_mode = #tpu.pipeline_mode<synchronous>, transform_indices = @transform_4, window_bounds = array<i64: 5, 32, 32>}, {pipeline_mode = #tpu.pipeline_mode<synchronous>, transform_indices = @transform_5, window_bounds = array<i64: 1, 32>}, {pipeline_mode = #tpu.pipeline_mode<synchronous>, transform_indices = @transform_6, window_bounds = array<i64: 5, 32, 32>}, {pipeline_mode = #tpu.pipeline_mode<synchronous>, transform_indices = @transform_7, window_bounds = array<i64: 1, 32>}, {pipeline_mode = #tpu.pipeline_mode<synchronous>, transform_indices = @transform_8, window_bounds = array<i64: 32, 32>}, {pipeline_mode = #tpu.pipeline_mode<synchronous>, transform_indices = @transform_9, window_bounds = array<i64: 8, 32>}, {pipeline_mode = #tpu.pipeline_mode<synchronous>, transform_indices = @transform_10, window_bounds = array<i64: 1, 32>}, {pipeline_mode = #tpu.pipeline_mode<synchronous>, transform_indices = @transform_11, window_bounds = array<i64: 32, 32>}, {pipeline_mode = #tpu.pipeline_mode<synchronous>, transform_indices = @transform_12, window_bounds = array<i64: 8, 32>}, {pipeline_mode = #tpu.pipeline_mode<synchronous>, transform_indices = @transform_13, window_bounds = array<i64: 1, 32>}, {pipeline_mode = #tpu.pipeline_mode<synchronous>, transform_indices = @transform_14, window_bounds = array<i64: 16, 32>}, {pipeline_mode = #tpu.pipeline_mode<synchronous>, transform_indices = @transform_15, window_bounds = array<i64: 8, 32>}, {pipeline_mode = #tpu.pipeline_mode<synchronous>, transform_indices = @transform_16, window_bounds = array<i64: 1, 32>}, {pipeline_mode = #tpu.pipeline_mode<synchronous>, transform_indices = @transform_17, window_bounds = array<i64: 16, 32>}, {pipeline_mode = #tpu.pipeline_mode<synchronous>, transform_indices = @transform_18, window_bounds = array<i64: 8, 32>}, {pipeline_mode = #tpu.pipeline_mode<synchronous>, transform_indices = @transform_19, window_bounds = array<i64: 1, 32>}, {transform_indices = @transform_20, window_bounds = array<i64: 2, 2, 16>}]} {
    %cst = arith.constant 0.000000e+00 : f32
    %0 = vector.broadcast %cst : f32 to vector<2x2x32xf32>
    %c0 = arith.constant 0 : index
    %c0_0 = arith.constant 0 : index
    %c0_1 = arith.constant 0 : index
    %1 = vector.load %arg22[%c0, %c0_0, %c0_1] : memref<2x12x32xf32, #tpu.memory_space<vmem>>, vector<2x2x32xf32>
    tpu.vector_store %arg22[%c0, %c0_0, %c0_1], %0 {strides = array<i32>} : memref<2x12x32xf32, #tpu.memory_space<vmem>>, vector<2x2x32xf32>,
    %c0_2 = arith.constant 0 : index
    %c10 = arith.constant 10 : index
    %c0_3 = arith.constant 0 : index
    %2 = vector.load %arg22[%c0_2, %c10, %c0_3] : memref<2x12x32xf32, #tpu.memory_space<vmem>>, vector<2x2x32xf32>
    tpu.vector_store %arg22[%c0_2, %c10, %c0_3], %0 {strides = array<i32>} : memref<2x12x32xf32, #tpu.memory_space<vmem>>, vector<2x2x32xf32>,
    %c0_4 = arith.constant 0 : index
    %c0_5 = arith.constant 0 : index
    %c0_6 = arith.constant 0 : index
    %3 = vector.load %arg1[%c0_4, %c0_5, %c0_6] : memref<2x8x16xf32, #tpu.memory_space<vmem>>, vector<2x8x16xf32>
    %c0_7 = arith.constant 0 : index
    %c0_8 = arith.constant 0 : index
    %c0_9 = arith.constant 0 : index
    %4 = vector.load %arg2[%c0_7, %c0_8, %c0_9] : memref<2x1x16xf32, #tpu.memory_space<vmem>>, vector<2x1x16xf32>
    %5 = vector.shape_cast %4 : vector<2x1x16xf32> to vector<2x1x16xf32>
    %6 = vector.broadcast %5 : vector<2x1x16xf32> to vector<2x8x16xf32>
    %7 = tpu.concatenate %3, %6 in 2 : vector<2x8x16xf32>, vector<2x8x16xf32> -> vector<2x8x32xf32>
    %8 = vector.shape_cast %7 : vector<2x8x32xf32> to vector<16x32xf32>
    %9 = vector.shape_cast %8 : vector<16x32xf32> to vector<2x8x32xf32>
    %c0_10 = arith.constant 0 : index
    %c2 = arith.constant 2 : index
    %c0_11 = arith.constant 0 : index
    %10 = vector.load %arg22[%c0_10, %c2, %c0_11] : memref<2x12x32xf32, #tpu.memory_space<vmem>>, vector<2x8x32xf32>
    tpu.vector_store %arg22[%c0_10, %c2, %c0_11], %9 {strides = array<i32>} : memref<2x12x32xf32, #tpu.memory_space<vmem>>, vector<2x8x32xf32>,
    %c0_12 = arith.constant 0 : index
    %c0_13 = arith.constant 0 : index
    %c0_14 = arith.constant 0 : index
    %11 = vector.load %arg22[%c0_12, %c0_13, %c0_14] : memref<2x12x32xf32, #tpu.memory_space<vmem>>, vector<2x8x32xf32>
    %12 = vector.shape_cast %11 : vector<2x8x32xf32> to vector<16x32xf32>
    %c0_15 = arith.constant 0 : index
    %c0_16 = arith.constant 0 : index
    %c0_17 = arith.constant 0 : index
    %13 = vector.load %arg3[%c0_15, %c0_16, %c0_17] : memref<5x32x32xf32, #tpu.memory_space<vmem>>, vector<1x32x32xf32>
    %14 = vector.shape_cast %13 : vector<1x32x32xf32> to vector<32x32xf32>
    %cst_18 = arith.constant dense<0.000000e+00> : vector<16x32xf32>
    %15 = tpu.matmul %12, %14, %cst_18 {dimension_numbers = #tpu.dot_dimension_numbers<[1], [0], [0], [1], [0, 0, 1, 1], [], []>} : vector<16x32xf32>, vector<32x32xf32>, vector<16x32xf32> -> vector<16x32xf32>
    %c0_19 = arith.constant 0 : index
    %c1 = arith.constant 1 : index
    %c0_20 = arith.constant 0 : index
    %16 = vector.load %arg22[%c0_19, %c1, %c0_20] : memref<2x12x32xf32, #tpu.memory_space<vmem>>, vector<2x8x32xf32>
    %17 = vector.shape_cast %16 : vector<2x8x32xf32> to vector<16x32xf32>
    %c1_21 = arith.constant 1 : index
    %c0_22 = arith.constant 0 : index
    %c0_23 = arith.constant 0 : index
    %18 = vector.load %arg3[%c1_21, %c0_22, %c0_23] : memref<5x32x32xf32, #tpu.memory_space<vmem>>, vector<1x32x32xf32>
    %19 = vector.shape_cast %18 : vector<1x32x32xf32> to vector<32x32xf32>
    %cst_24 = arith.constant dense<0.000000e+00> : vector<16x32xf32>
    %20 = tpu.matmul %17, %19, %cst_24 {dimension_numbers = #tpu.dot_dimension_numbers<[1], [0], [0], [1], [0, 0, 1, 1], [], []>} : vector<16x32xf32>, vector<32x32xf32>, vector<16x32xf32> -> vector<16x32xf32>
    %21 = arith.addf %15, %20 : vector<16x32xf32>
    %c0_25 = arith.constant 0 : index
    %c2_26 = arith.constant 2 : index
    %c0_27 = arith.constant 0 : index
    %22 = vector.load %arg22[%c0_25, %c2_26, %c0_27] : memref<2x12x32xf32, #tpu.memory_space<vmem>>, vector<2x8x32xf32>
    %23 = vector.shape_cast %22 : vector<2x8x32xf32> to vector<16x32xf32>
    %c2_28 = arith.constant 2 : index
    %c0_29 = arith.constant 0 : index
    %c0_30 = arith.constant 0 : index
    %24 = vector.load %arg3[%c2_28, %c0_29, %c0_30] : memref<5x32x32xf32, #tpu.memory_space<vmem>>, vector<1x32x32xf32>
    %25 = vector.shape_cast %24 : vector<1x32x32xf32> to vector<32x32xf32>
    %cst_31 = arith.constant dense<0.000000e+00> : vector<16x32xf32>
    %26 = tpu.matmul %23, %25, %cst_31 {dimension_numbers = #tpu.dot_dimension_numbers<[1], [0], [0], [1], [0, 0, 1, 1], [], []>} : vector<16x32xf32>, vector<32x32xf32>, vector<16x32xf32> -> vector<16x32xf32>
    %27 = arith.addf %21, %26 : vector<16x32xf32>
    %c0_32 = arith.constant 0 : index
    %c3 = arith.constant 3 : index
    %c0_33 = arith.constant 0 : index
    %28 = vector.load %arg22[%c0_32, %c3, %c0_33] : memref<2x12x32xf32, #tpu.memory_space<vmem>>, vector<2x8x32xf32>
    %29 = vector.shape_cast %28 : vector<2x8x32xf32> to vector<16x32xf32>
    %c3_34 = arith.constant 3 : index
    %c0_35 = arith.constant 0 : index
    %c0_36 = arith.constant 0 : index
    %30 = vector.load %arg3[%c3_34, %c0_35, %c0_36] : memref<5x32x32xf32, #tpu.memory_space<vmem>>, vector<1x32x32xf32>
    %31 = vector.shape_cast %30 : vector<1x32x32xf32> to vector<32x32xf32>
    %cst_37 = arith.constant dense<0.000000e+00> : vector<16x32xf32>
    %32 = tpu.matmul %29, %31, %cst_37 {dimension_numbers = #tpu.dot_dimension_numbers<[1], [0], [0], [1], [0, 0, 1, 1], [], []>} : vector<16x32xf32>, vector<32x32xf32>, vector<16x32xf32> -> vector<16x32xf32>
    %33 = arith.addf %27, %32 : vector<16x32xf32>
    %c0_38 = arith.constant 0 : index
    %c4 = arith.constant 4 : index
    %c0_39 = arith.constant 0 : index
    %34 = vector.load %arg22[%c0_38, %c4, %c0_39] : memref<2x12x32xf32, #tpu.memory_space<vmem>>, vector<2x8x32xf32>
    %35 = vector.shape_cast %34 : vector<2x8x32xf32> to vector<16x32xf32>
    %c4_40 = arith.constant 4 : index
    %c0_41 = arith.constant 0 : index
    %c0_42 = arith.constant 0 : index
    %36 = vector.load %arg3[%c4_40, %c0_41, %c0_42] : memref<5x32x32xf32, #tpu.memory_space<vmem>>, vector<1x32x32xf32>
    %37 = vector.shape_cast %36 : vector<1x32x32xf32> to vector<32x32xf32>
    %cst_43 = arith.constant dense<0.000000e+00> : vector<16x32xf32>
    %38 = tpu.matmul %35, %37, %cst_43 {dimension_numbers = #tpu.dot_dimension_numbers<[1], [0], [0], [1], [0, 0, 1, 1], [], []>} : vector<16x32xf32>, vector<32x32xf32>, vector<16x32xf32> -> vector<16x32xf32>
    %39 = arith.addf %33, %38 : vector<16x32xf32>
    %c0_44 = arith.constant 0 : index
    %c0_45 = arith.constant 0 : index
    %40 = vector.load %arg4[%c0_44, %c0_45] : memref<1x32xf32, #tpu.memory_space<vmem>>, vector<1x32xf32>
    %41 = vector.broadcast %40 : vector<1x32xf32> to vector<16x32xf32>
    %42 = arith.addf %39, %41 : vector<16x32xf32>
    %cst_46 = arith.constant 0.000000e+00 : f32
    %43 = vector.broadcast %cst_46 : f32 to vector<16x32xf32>
    %44 = arith.maximumf %42, %43 : vector<16x32xf32>
    %45 = vector.shape_cast %44 : vector<16x32xf32> to vector<2x8x32xf32>
    %c0_47 = arith.constant 0 : index
    %c2_48 = arith.constant 2 : index
    %c0_49 = arith.constant 0 : index
    %46 = vector.load %arg22[%c0_47, %c2_48, %c0_49] : memref<2x12x32xf32, #tpu.memory_space<vmem>>, vector<2x8x32xf32>
    tpu.vector_store %arg22[%c0_47, %c2_48, %c0_49], %45 {strides = array<i32>} : memref<2x12x32xf32, #tpu.memory_space<vmem>>, vector<2x8x32xf32>,
    %c0_50 = arith.constant 0 : index
    %c0_51 = arith.constant 0 : index
    %c0_52 = arith.constant 0 : index
    %47 = vector.load %arg22[%c0_50, %c0_51, %c0_52] : memref<2x12x32xf32, #tpu.memory_space<vmem>>, vector<2x8x32xf32>
    %48 = vector.shape_cast %47 : vector<2x8x32xf32> to vector<16x32xf32>
    %c0_53 = arith.constant 0 : index
    %c0_54 = arith.constant 0 : index
    %c0_55 = arith.constant 0 : index
    %49 = vector.load %arg5[%c0_53, %c0_54, %c0_55] : memref<5x32x32xf32, #tpu.memory_space<vmem>>, vector<1x32x32xf32>
    %50 = vector.shape_cast %49 : vector<1x32x32xf32> to vector<32x32xf32>
    %cst_56 = arith.constant dense<0.000000e+00> : vector<16x32xf32>
    %51 = tpu.matmul %48, %50, %cst_56 {dimension_numbers = #tpu.dot_dimension_numbers<[1], [0], [0], [1], [0, 0, 1, 1], [], []>} : vector<16x32xf32>, vector<32x32xf32>, vector<16x32xf32> -> vector<16x32xf32>
    %c0_57 = arith.constant 0 : index
    %c1_58 = arith.constant 1 : index
    %c0_59 = arith.constant 0 : index
    %52 = vector.load %arg22[%c0_57, %c1_58, %c0_59] : memref<2x12x32xf32, #tpu.memory_space<vmem>>, vector<2x8x32xf32>
    %53 = vector.shape_cast %52 : vector<2x8x32xf32> to vector<16x32xf32>
    %c1_60 = arith.constant 1 : index
    %c0_61 = arith.constant 0 : index
    %c0_62 = arith.constant 0 : index
    %54 = vector.load %arg5[%c1_60, %c0_61, %c0_62] : memref<5x32x32xf32, #tpu.memory_space<vmem>>, vector<1x32x32xf32>
    %55 = vector.shape_cast %54 : vector<1x32x32xf32> to vector<32x32xf32>
    %cst_63 = arith.constant dense<0.000000e+00> : vector<16x32xf32>
    %56 = tpu.matmul %53, %55, %cst_63 {dimension_numbers = #tpu.dot_dimension_numbers<[1], [0], [0], [1], [0, 0, 1, 1], [], []>} : vector<16x32xf32>, vector<32x32xf32>, vector<16x32xf32> -> vector<16x32xf32>
    %57 = arith.addf %51, %56 : vector<16x32xf32>
    %c0_64 = arith.constant 0 : index
    %c2_65 = arith.constant 2 : index
    %c0_66 = arith.constant 0 : index
    %58 = vector.load %arg22[%c0_64, %c2_65, %c0_66] : memref<2x12x32xf32, #tpu.memory_space<vmem>>, vector<2x8x32xf32>
    %59 = vector.shape_cast %58 : vector<2x8x32xf32> to vector<16x32xf32>
    %c2_67 = arith.constant 2 : index
    %c0_68 = arith.constant 0 : index
    %c0_69 = arith.constant 0 : index
    %60 = vector.load %arg5[%c2_67, %c0_68, %c0_69] : memref<5x32x32xf32, #tpu.memory_space<vmem>>, vector<1x32x32xf32>
    %61 = vector.shape_cast %60 : vector<1x32x32xf32> to vector<32x32xf32>
    %cst_70 = arith.constant dense<0.000000e+00> : vector<16x32xf32>
    %62 = tpu.matmul %59, %61, %cst_70 {dimension_numbers = #tpu.dot_dimension_numbers<[1], [0], [0], [1], [0, 0, 1, 1], [], []>} : vector<16x32xf32>, vector<32x32xf32>, vector<16x32xf32> -> vector<16x32xf32>
    %63 = arith.addf %57, %62 : vector<16x32xf32>
    %c0_71 = arith.constant 0 : index
    %c3_72 = arith.constant 3 : index
    %c0_73 = arith.constant 0 : index
    %64 = vector.load %arg22[%c0_71, %c3_72, %c0_73] : memref<2x12x32xf32, #tpu.memory_space<vmem>>, vector<2x8x32xf32>
    %65 = vector.shape_cast %64 : vector<2x8x32xf32> to vector<16x32xf32>
    %c3_74 = arith.constant 3 : index
    %c0_75 = arith.constant 0 : index
    %c0_76 = arith.constant 0 : index
    %66 = vector.load %arg5[%c3_74, %c0_75, %c0_76] : memref<5x32x32xf32, #tpu.memory_space<vmem>>, vector<1x32x32xf32>
    %67 = vector.shape_cast %66 : vector<1x32x32xf32> to vector<32x32xf32>
    %cst_77 = arith.constant dense<0.000000e+00> : vector<16x32xf32>
    %68 = tpu.matmul %65, %67, %cst_77 {dimension_numbers = #tpu.dot_dimension_numbers<[1], [0], [0], [1], [0, 0, 1, 1], [], []>} : vector<16x32xf32>, vector<32x32xf32>, vector<16x32xf32> -> vector<16x32xf32>
    %69 = arith.addf %63, %68 : vector<16x32xf32>
    %c0_78 = arith.constant 0 : index
    %c4_79 = arith.constant 4 : index
    %c0_80 = arith.constant 0 : index
    %70 = vector.load %arg22[%c0_78, %c4_79, %c0_80] : memref<2x12x32xf32, #tpu.memory_space<vmem>>, vector<2x8x32xf32>
    %71 = vector.shape_cast %70 : vector<2x8x32xf32> to vector<16x32xf32>
    %c4_81 = arith.constant 4 : index
    %c0_82 = arith.constant 0 : index
    %c0_83 = arith.constant 0 : index
    %72 = vector.load %arg5[%c4_81, %c0_82, %c0_83] : memref<5x32x32xf32, #tpu.memory_space<vmem>>, vector<1x32x32xf32>
    %73 = vector.shape_cast %72 : vector<1x32x32xf32> to vector<32x32xf32>
    %cst_84 = arith.constant dense<0.000000e+00> : vector<16x32xf32>
    %74 = tpu.matmul %71, %73, %cst_84 {dimension_numbers = #tpu.dot_dimension_numbers<[1], [0], [0], [1], [0, 0, 1, 1], [], []>} : vector<16x32xf32>, vector<32x32xf32>, vector<16x32xf32> -> vector<16x32xf32>
    %75 = arith.addf %69, %74 : vector<16x32xf32>
    %c0_85 = arith.constant 0 : index
    %c0_86 = arith.constant 0 : index
    %76 = vector.load %arg6[%c0_85, %c0_86] : memref<1x32xf32, #tpu.memory_space<vmem>>, vector<1x32xf32>
    %77 = vector.broadcast %76 : vector<1x32xf32> to vector<16x32xf32>
    %78 = arith.addf %75, %77 : vector<16x32xf32>
    %cst_87 = arith.constant 0.000000e+00 : f32
    %79 = vector.broadcast %cst_87 : f32 to vector<16x32xf32>
    %80 = arith.maximumf %78, %79 : vector<16x32xf32>
    %81 = vector.shape_cast %80 : vector<16x32xf32> to vector<2x8x32xf32>
    %c0_88 = arith.constant 0 : index
    %c2_89 = arith.constant 2 : index
    %c0_90 = arith.constant 0 : index
    %82 = vector.load %arg22[%c0_88, %c2_89, %c0_90] : memref<2x12x32xf32, #tpu.memory_space<vmem>>, vector<2x8x32xf32>
    tpu.vector_store %arg22[%c0_88, %c2_89, %c0_90], %81 {strides = array<i32>} : memref<2x12x32xf32, #tpu.memory_space<vmem>>, vector<2x8x32xf32>,
    %c0_91 = arith.constant 0 : index
    %c0_92 = arith.constant 0 : index
    %c0_93 = arith.constant 0 : index
    %83 = vector.load %arg22[%c0_91, %c0_92, %c0_93] : memref<2x12x32xf32, #tpu.memory_space<vmem>>, vector<2x8x32xf32>
    %84 = vector.shape_cast %83 : vector<2x8x32xf32> to vector<16x32xf32>
    %c0_94 = arith.constant 0 : index
    %c0_95 = arith.constant 0 : index
    %c0_96 = arith.constant 0 : index
    %85 = vector.load %arg7[%c0_94, %c0_95, %c0_96] : memref<5x32x32xf32, #tpu.memory_space<vmem>>, vector<1x32x32xf32>
    %86 = vector.shape_cast %85 : vector<1x32x32xf32> to vector<32x32xf32>
    %cst_97 = arith.constant dense<0.000000e+00> : vector<16x32xf32>
    %87 = tpu.matmul %84, %86, %cst_97 {dimension_numbers = #tpu.dot_dimension_numbers<[1], [0], [0], [1], [0, 0, 1, 1], [], []>} : vector<16x32xf32>, vector<32x32xf32>, vector<16x32xf32> -> vector<16x32xf32>
    %c0_98 = arith.constant 0 : index
    %c1_99 = arith.constant 1 : index
    %c0_100 = arith.constant 0 : index
    %88 = vector.load %arg22[%c0_98, %c1_99, %c0_100] : memref<2x12x32xf32, #tpu.memory_space<vmem>>, vector<2x8x32xf32>
    %89 = vector.shape_cast %88 : vector<2x8x32xf32> to vector<16x32xf32>
    %c1_101 = arith.constant 1 : index
    %c0_102 = arith.constant 0 : index
    %c0_103 = arith.constant 0 : index
    %90 = vector.load %arg7[%c1_101, %c0_102, %c0_103] : memref<5x32x32xf32, #tpu.memory_space<vmem>>, vector<1x32x32xf32>
    %91 = vector.shape_cast %90 : vector<1x32x32xf32> to vector<32x32xf32>
    %cst_104 = arith.constant dense<0.000000e+00> : vector<16x32xf32>
    %92 = tpu.matmul %89, %91, %cst_104 {dimension_numbers = #tpu.dot_dimension_numbers<[1], [0], [0], [1], [0, 0, 1, 1], [], []>} : vector<16x32xf32>, vector<32x32xf32>, vector<16x32xf32> -> vector<16x32xf32>
    %93 = arith.addf %87, %92 : vector<16x32xf32>
    %c0_105 = arith.constant 0 : index
    %c2_106 = arith.constant 2 : index
    %c0_107 = arith.constant 0 : index
    %94 = vector.load %arg22[%c0_105, %c2_106, %c0_107] : memref<2x12x32xf32, #tpu.memory_space<vmem>>, vector<2x8x32xf32>
    %95 = vector.shape_cast %94 : vector<2x8x32xf32> to vector<16x32xf32>
    %c2_108 = arith.constant 2 : index
    %c0_109 = arith.constant 0 : index
    %c0_110 = arith.constant 0 : index
    %96 = vector.load %arg7[%c2_108, %c0_109, %c0_110] : memref<5x32x32xf32, #tpu.memory_space<vmem>>, vector<1x32x32xf32>
    %97 = vector.shape_cast %96 : vector<1x32x32xf32> to vector<32x32xf32>
    %cst_111 = arith.constant dense<0.000000e+00> : vector<16x32xf32>
    %98 = tpu.matmul %95, %97, %cst_111 {dimension_numbers = #tpu.dot_dimension_numbers<[1], [0], [0], [1], [0, 0, 1, 1], [], []>} : vector<16x32xf32>, vector<32x32xf32>, vector<16x32xf32> -> vector<16x32xf32>
    %99 = arith.addf %93, %98 : vector<16x32xf32>
    %c0_112 = arith.constant 0 : index
    %c3_113 = arith.constant 3 : index
    %c0_114 = arith.constant 0 : index
    %100 = vector.load %arg22[%c0_112, %c3_113, %c0_114] : memref<2x12x32xf32, #tpu.memory_space<vmem>>, vector<2x8x32xf32>
    %101 = vector.shape_cast %100 : vector<2x8x32xf32> to vector<16x32xf32>
    %c3_115 = arith.constant 3 : index
    %c0_116 = arith.constant 0 : index
    %c0_117 = arith.constant 0 : index
    %102 = vector.load %arg7[%c3_115, %c0_116, %c0_117] : memref<5x32x32xf32, #tpu.memory_space<vmem>>, vector<1x32x32xf32>
    %103 = vector.shape_cast %102 : vector<1x32x32xf32> to vector<32x32xf32>
    %cst_118 = arith.constant dense<0.000000e+00> : vector<16x32xf32>
    %104 = tpu.matmul %101, %103, %cst_118 {dimension_numbers = #tpu.dot_dimension_numbers<[1], [0], [0], [1], [0, 0, 1, 1], [], []>} : vector<16x32xf32>, vector<32x32xf32>, vector<16x32xf32> -> vector<16x32xf32>
    %105 = arith.addf %99, %104 : vector<16x32xf32>
    %c0_119 = arith.constant 0 : index
    %c4_120 = arith.constant 4 : index
    %c0_121 = arith.constant 0 : index
    %106 = vector.load %arg22[%c0_119, %c4_120, %c0_121] : memref<2x12x32xf32, #tpu.memory_space<vmem>>, vector<2x8x32xf32>
    %107 = vector.shape_cast %106 : vector<2x8x32xf32> to vector<16x32xf32>
    %c4_122 = arith.constant 4 : index
    %c0_123 = arith.constant 0 : index
    %c0_124 = arith.constant 0 : index
    %108 = vector.load %arg7[%c4_122, %c0_123, %c0_124] : memref<5x32x32xf32, #tpu.memory_space<vmem>>, vector<1x32x32xf32>
    %109 = vector.shape_cast %108 : vector<1x32x32xf32> to vector<32x32xf32>
    %cst_125 = arith.constant dense<0.000000e+00> : vector<16x32xf32>
    %110 = tpu.matmul %107, %109, %cst_125 {dimension_numbers = #tpu.dot_dimension_numbers<[1], [0], [0], [1], [0, 0, 1, 1], [], []>} : vector<16x32xf32>, vector<32x32xf32>, vector<16x32xf32> -> vector<16x32xf32>
    %111 = arith.addf %105, %110 : vector<16x32xf32>
    %c0_126 = arith.constant 0 : index
    %c0_127 = arith.constant 0 : index
    %112 = vector.load %arg8[%c0_126, %c0_127] : memref<1x32xf32, #tpu.memory_space<vmem>>, vector<1x32xf32>
    %113 = vector.broadcast %112 : vector<1x32xf32> to vector<16x32xf32>
    %114 = arith.addf %111, %113 : vector<16x32xf32>
    %cst_128 = arith.constant 0.000000e+00 : f32
    %115 = vector.broadcast %cst_128 : f32 to vector<16x32xf32>
    %116 = arith.maximumf %114, %115 : vector<16x32xf32>
    %c0_129 = arith.constant 0 : index
    %c0_130 = arith.constant 0 : index
    %117 = vector.load %arg9[%c0_129, %c0_130] : memref<32x32xf32, #tpu.memory_space<vmem>>, vector<32x32xf32>
    %cst_131 = arith.constant dense<0.000000e+00> : vector<16x32xf32>
    %118 = tpu.matmul %116, %117, %cst_131 {dimension_numbers = #tpu.dot_dimension_numbers<[1], [0], [0], [1], [0, 0, 1, 1], [], []>} : vector<16x32xf32>, vector<32x32xf32>, vector<16x32xf32> -> vector<16x32xf32>
    %c0_132 = arith.constant 0 : index
    %c0_133 = arith.constant 0 : index
    %119 = vector.load %arg11[%c0_132, %c0_133] : memref<1x32xf32, #tpu.memory_space<vmem>>, vector<1x32xf32>
    %120 = vector.broadcast %119 : vector<1x32xf32> to vector<16x32xf32>
    %121 = arith.addf %118, %120 : vector<16x32xf32>
    %122 = vector.shape_cast %121 : vector<16x32xf32> to vector<2x8x32xf32>
    %c0_134 = arith.constant 0 : index
    %c0_135 = arith.constant 0 : index
    %123 = vector.load %arg12[%c0_134, %c0_135] : memref<32x32xf32, #tpu.memory_space<vmem>>, vector<32x32xf32>
    %cst_136 = arith.constant dense<0.000000e+00> : vector<16x32xf32>
    %124 = tpu.matmul %116, %123, %cst_136 {dimension_numbers = #tpu.dot_dimension_numbers<[1], [0], [0], [1], [0, 0, 1, 1], [], []>} : vector<16x32xf32>, vector<32x32xf32>, vector<16x32xf32> -> vector<16x32xf32>
    %c0_137 = arith.constant 0 : index
    %c0_138 = arith.constant 0 : index
    %125 = vector.load %arg14[%c0_137, %c0_138] : memref<1x32xf32, #tpu.memory_space<vmem>>, vector<1x32xf32>
    %126 = vector.broadcast %125 : vector<1x32xf32> to vector<16x32xf32>
    %127 = arith.addf %124, %126 : vector<16x32xf32>
    %128 = vector.shape_cast %127 : vector<16x32xf32> to vector<2x8x32xf32>
    %cst_139 = arith.constant 0.000000e+00 : f32
    %129 = vector.broadcast %cst_139 : f32 to vector<2x8xf32>
    %cst_140 = arith.constant 0.000000e+00 : f32
    %130 = vector.broadcast %cst_140 : f32 to vector<2x8xf32>
    %cst_141 = arith.constant 0.000000e+00 : f32
    %131 = vector.broadcast %cst_141 : f32 to vector<2x8xf32>
    %cst_142 = arith.constant 0.000000e+00 : f32
    %132 = vector.broadcast %cst_142 : f32 to vector<2x8xf32>
    %133 = vector.extract_strided_slice %122 {offsets = [0, 0, 0], sizes = [2, 1, 32], strides = [1, 1, 1]} : vector<2x8x32xf32> to vector<2x1x32xf32>
    %134 = vector.shape_cast %133 : vector<2x1x32xf32> to vector<2x32xf32>
    %c0_143 = arith.constant 0 : index
    %c0_144 = arith.constant 0 : index
    %135 = vector.load %arg10[%c0_143, %c0_144] : memref<8x32xf32, #tpu.memory_space<vmem>>, vector<8x32xf32>
    %cst_145 = arith.constant dense<0.000000e+00> : vector<2x32xf32>
    %136 = tpu.matmul %129, %135, %cst_145 {dimension_numbers = #tpu.dot_dimension_numbers<[1], [0], [0], [1], [0, 0, 1, 1], [], []>} : vector<2x8xf32>, vector<8x32xf32>, vector<2x32xf32> -> vector<2x32xf32>
    %137 = arith.addf %134, %136 : vector<2x32xf32>
    %138 = arith.negf %137 : vector<2x32xf32>
    %139 = math.exp %138 : vector<2x32xf32>
    %cst_146 = arith.constant 1.000000e+00 : f32
    %140 = vector.broadcast %cst_146 : f32 to vector<2x32xf32>
    %141 = arith.addf %140, %139 : vector<2x32xf32>
    %142 = arith.divf %140, %141 : vector<2x32xf32>
    %143 = math.tanh %137 : vector<2x32xf32>
    %144 = vector.extract_strided_slice %142 {offsets = [0, 0], sizes = [2, 8], strides = [1, 1]} : vector<2x32xf32> to vector<2x8xf32>
    %145 = vector.extract_strided_slice %142 {offsets = [0, 8], sizes = [2, 8], strides = [1, 1]} : vector<2x32xf32> to vector<2x8xf32>
    %146 = vector.extract_strided_slice %143 {offsets = [0, 16], sizes = [2, 8], strides = [1, 1]} : vector<2x32xf32> to vector<2x8xf32>
    %147 = vector.extract_strided_slice %142 {offsets = [0, 24], sizes = [2, 8], strides = [1, 1]} : vector<2x32xf32> to vector<2x8xf32>
    %148 = arith.mulf %145, %130 : vector<2x8xf32>
    %149 = arith.mulf %144, %146 : vector<2x8xf32>
    %150 = arith.addf %148, %149 : vector<2x8xf32>
    %151 = math.tanh %150 : vector<2x8xf32>
    %152 = arith.mulf %147, %151 : vector<2x8xf32>
    %153 = vector.extract_strided_slice %128 {offsets = [0, 7, 0], sizes = [2, 1, 32], strides = [1, 1, 1]} : vector<2x8x32xf32> to vector<2x1x32xf32>
    %154 = vector.shape_cast %153 : vector<2x1x32xf32> to vector<2x32xf32>
    %c0_147 = arith.constant 0 : index
    %c0_148 = arith.constant 0 : index
    %155 = vector.load %arg13[%c0_147, %c0_148] : memref<8x32xf32, #tpu.memory_space<vmem>>, vector<8x32xf32>
    %cst_149 = arith.constant dense<0.000000e+00> : vector<2x32xf32>
    %156 = tpu.matmul %131, %155, %cst_149 {dimension_numbers = #tpu.dot_dimension_numbers<[1], [0], [0], [1], [0, 0, 1, 1], [], []>} : vector<2x8xf32>, vector<8x32xf32>, vector<2x32xf32> -> vector<2x32xf32>
    %157 = arith.addf %154, %156 : vector<2x32xf32>
    %158 = arith.negf %157 : vector<2x32xf32>
    %159 = math.exp %158 : vector<2x32xf32>
    %cst_150 = arith.constant 1.000000e+00 : f32
    %160 = vector.broadcast %cst_150 : f32 to vector<2x32xf32>
    %161 = arith.addf %160, %159 : vector<2x32xf32>
    %162 = arith.divf %160, %161 : vector<2x32xf32>
    %163 = math.tanh %157 : vector<2x32xf32>
    %164 = vector.extract_strided_slice %162 {offsets = [0, 0], sizes = [2, 8], strides = [1, 1]} : vector<2x32xf32> to vector<2x8xf32>
    %165 = vector.extract_strided_slice %162 {offsets = [0, 8], sizes = [2, 8], strides = [1, 1]} : vector<2x32xf32> to vector<2x8xf32>
    %166 = vector.extract_strided_slice %163 {offsets = [0, 16], sizes = [2, 8], strides = [1, 1]} : vector<2x32xf32> to vector<2x8xf32>
    %167 = vector.extract_strided_slice %162 {offsets = [0, 24], sizes = [2, 8], strides = [1, 1]} : vector<2x32xf32> to vector<2x8xf32>
    %168 = arith.mulf %165, %132 : vector<2x8xf32>
    %169 = arith.mulf %164, %166 : vector<2x8xf32>
    %170 = arith.addf %168, %169 : vector<2x8xf32>
    %171 = math.tanh %170 : vector<2x8xf32>
    %172 = arith.mulf %167, %171 : vector<2x8xf32>
    %173 = vector.extract_strided_slice %122 {offsets = [0, 1, 0], sizes = [2, 1, 32], strides = [1, 1, 1]} : vector<2x8x32xf32> to vector<2x1x32xf32>
    %174 = vector.shape_cast %173 : vector<2x1x32xf32> to vector<2x32xf32>
    %c0_151 = arith.constant 0 : index
    %c0_152 = arith.constant 0 : index
    %175 = vector.load %arg10[%c0_151, %c0_152] : memref<8x32xf32, #tpu.memory_space<vmem>>, vector<8x32xf32>
    %cst_153 = arith.constant dense<0.000000e+00> : vector<2x32xf32>
    %176 = tpu.matmul %152, %175, %cst_153 {dimension_numbers = #tpu.dot_dimension_numbers<[1], [0], [0], [1], [0, 0, 1, 1], [], []>} : vector<2x8xf32>, vector<8x32xf32>, vector<2x32xf32> -> vector<2x32xf32>
    %177 = arith.addf %174, %176 : vector<2x32xf32>
    %178 = arith.negf %177 : vector<2x32xf32>
    %179 = math.exp %178 : vector<2x32xf32>
    %cst_154 = arith.constant 1.000000e+00 : f32
    %180 = vector.broadcast %cst_154 : f32 to vector<2x32xf32>
    %181 = arith.addf %180, %179 : vector<2x32xf32>
    %182 = arith.divf %180, %181 : vector<2x32xf32>
    %183 = math.tanh %177 : vector<2x32xf32>
    %184 = vector.extract_strided_slice %182 {offsets = [0, 0], sizes = [2, 8], strides = [1, 1]} : vector<2x32xf32> to vector<2x8xf32>
    %185 = vector.extract_strided_slice %182 {offsets = [0, 8], sizes = [2, 8], strides = [1, 1]} : vector<2x32xf32> to vector<2x8xf32>
    %186 = vector.extract_strided_slice %183 {offsets = [0, 16], sizes = [2, 8], strides = [1, 1]} : vector<2x32xf32> to vector<2x8xf32>
    %187 = vector.extract_strided_slice %182 {offsets = [0, 24], sizes = [2, 8], strides = [1, 1]} : vector<2x32xf32> to vector<2x8xf32>
    %188 = arith.mulf %185, %150 : vector<2x8xf32>
    %189 = arith.mulf %184, %186 : vector<2x8xf32>
    %190 = arith.addf %188, %189 : vector<2x8xf32>
    %191 = math.tanh %190 : vector<2x8xf32>
    %192 = arith.mulf %187, %191 : vector<2x8xf32>
    %193 = vector.extract_strided_slice %128 {offsets = [0, 6, 0], sizes = [2, 1, 32], strides = [1, 1, 1]} : vector<2x8x32xf32> to vector<2x1x32xf32>
    %194 = vector.shape_cast %193 : vector<2x1x32xf32> to vector<2x32xf32>
    %c0_155 = arith.constant 0 : index
    %c0_156 = arith.constant 0 : index
    %195 = vector.load %arg13[%c0_155, %c0_156] : memref<8x32xf32, #tpu.memory_space<vmem>>, vector<8x32xf32>
    %cst_157 = arith.constant dense<0.000000e+00> : vector<2x32xf32>
    %196 = tpu.matmul %172, %195, %cst_157 {dimension_numbers = #tpu.dot_dimension_numbers<[1], [0], [0], [1], [0, 0, 1, 1], [], []>} : vector<2x8xf32>, vector<8x32xf32>, vector<2x32xf32> -> vector<2x32xf32>
    %197 = arith.addf %194, %196 : vector<2x32xf32>
    %198 = arith.negf %197 : vector<2x32xf32>
    %199 = math.exp %198 : vector<2x32xf32>
    %cst_158 = arith.constant 1.000000e+00 : f32
    %200 = vector.broadcast %cst_158 : f32 to vector<2x32xf32>
    %201 = arith.addf %200, %199 : vector<2x32xf32>
    %202 = arith.divf %200, %201 : vector<2x32xf32>
    %203 = math.tanh %197 : vector<2x32xf32>
    %204 = vector.extract_strided_slice %202 {offsets = [0, 0], sizes = [2, 8], strides = [1, 1]} : vector<2x32xf32> to vector<2x8xf32>
    %205 = vector.extract_strided_slice %202 {offsets = [0, 8], sizes = [2, 8], strides = [1, 1]} : vector<2x32xf32> to vector<2x8xf32>
    %206 = vector.extract_strided_slice %203 {offsets = [0, 16], sizes = [2, 8], strides = [1, 1]} : vector<2x32xf32> to vector<2x8xf32>
    %207 = vector.extract_strided_slice %202 {offsets = [0, 24], sizes = [2, 8], strides = [1, 1]} : vector<2x32xf32> to vector<2x8xf32>
    %208 = arith.mulf %205, %170 : vector<2x8xf32>
    %209 = arith.mulf %204, %206 : vector<2x8xf32>
    %210 = arith.addf %208, %209 : vector<2x8xf32>
    %211 = math.tanh %210 : vector<2x8xf32>
    %212 = arith.mulf %207, %211 : vector<2x8xf32>
    %213 = vector.extract_strided_slice %122 {offsets = [0, 2, 0], sizes = [2, 1, 32], strides = [1, 1, 1]} : vector<2x8x32xf32> to vector<2x1x32xf32>
    %214 = vector.shape_cast %213 : vector<2x1x32xf32> to vector<2x32xf32>
    %c0_159 = arith.constant 0 : index
    %c0_160 = arith.constant 0 : index
    %215 = vector.load %arg10[%c0_159, %c0_160] : memref<8x32xf32, #tpu.memory_space<vmem>>, vector<8x32xf32>
    %cst_161 = arith.constant dense<0.000000e+00> : vector<2x32xf32>
    %216 = tpu.matmul %192, %215, %cst_161 {dimension_numbers = #tpu.dot_dimension_numbers<[1], [0], [0], [1], [0, 0, 1, 1], [], []>} : vector<2x8xf32>, vector<8x32xf32>, vector<2x32xf32> -> vector<2x32xf32>
    %217 = arith.addf %214, %216 : vector<2x32xf32>
    %218 = arith.negf %217 : vector<2x32xf32>
    %219 = math.exp %218 : vector<2x32xf32>
    %cst_162 = arith.constant 1.000000e+00 : f32
    %220 = vector.broadcast %cst_162 : f32 to vector<2x32xf32>
    %221 = arith.addf %220, %219 : vector<2x32xf32>
    %222 = arith.divf %220, %221 : vector<2x32xf32>
    %223 = math.tanh %217 : vector<2x32xf32>
    %224 = vector.extract_strided_slice %222 {offsets = [0, 0], sizes = [2, 8], strides = [1, 1]} : vector<2x32xf32> to vector<2x8xf32>
    %225 = vector.extract_strided_slice %222 {offsets = [0, 8], sizes = [2, 8], strides = [1, 1]} : vector<2x32xf32> to vector<2x8xf32>
    %226 = vector.extract_strided_slice %223 {offsets = [0, 16], sizes = [2, 8], strides = [1, 1]} : vector<2x32xf32> to vector<2x8xf32>
    %227 = vector.extract_strided_slice %222 {offsets = [0, 24], sizes = [2, 8], strides = [1, 1]} : vector<2x32xf32> to vector<2x8xf32>
    %228 = arith.mulf %225, %190 : vector<2x8xf32>
    %229 = arith.mulf %224, %226 : vector<2x8xf32>
    %230 = arith.addf %228, %229 : vector<2x8xf32>
    %231 = math.tanh %230 : vector<2x8xf32>
    %232 = arith.mulf %227, %231 : vector<2x8xf32>
    %233 = vector.extract_strided_slice %128 {offsets = [0, 5, 0], sizes = [2, 1, 32], strides = [1, 1, 1]} : vector<2x8x32xf32> to vector<2x1x32xf32>
    %234 = vector.shape_cast %233 : vector<2x1x32xf32> to vector<2x32xf32>
    %c0_163 = arith.constant 0 : index
    %c0_164 = arith.constant 0 : index
    %235 = vector.load %arg13[%c0_163, %c0_164] : memref<8x32xf32, #tpu.memory_space<vmem>>, vector<8x32xf32>
    %cst_165 = arith.constant dense<0.000000e+00> : vector<2x32xf32>
    %236 = tpu.matmul %212, %235, %cst_165 {dimension_numbers = #tpu.dot_dimension_numbers<[1], [0], [0], [1], [0, 0, 1, 1], [], []>} : vector<2x8xf32>, vector<8x32xf32>, vector<2x32xf32> -> vector<2x32xf32>
    %237 = arith.addf %234, %236 : vector<2x32xf32>
    %238 = arith.negf %237 : vector<2x32xf32>
    %239 = math.exp %238 : vector<2x32xf32>
    %cst_166 = arith.constant 1.000000e+00 : f32
    %240 = vector.broadcast %cst_166 : f32 to vector<2x32xf32>
    %241 = arith.addf %240, %239 : vector<2x32xf32>
    %242 = arith.divf %240, %241 : vector<2x32xf32>
    %243 = math.tanh %237 : vector<2x32xf32>
    %244 = vector.extract_strided_slice %242 {offsets = [0, 0], sizes = [2, 8], strides = [1, 1]} : vector<2x32xf32> to vector<2x8xf32>
    %245 = vector.extract_strided_slice %242 {offsets = [0, 8], sizes = [2, 8], strides = [1, 1]} : vector<2x32xf32> to vector<2x8xf32>
    %246 = vector.extract_strided_slice %243 {offsets = [0, 16], sizes = [2, 8], strides = [1, 1]} : vector<2x32xf32> to vector<2x8xf32>
    %247 = vector.extract_strided_slice %242 {offsets = [0, 24], sizes = [2, 8], strides = [1, 1]} : vector<2x32xf32> to vector<2x8xf32>
    %248 = arith.mulf %245, %210 : vector<2x8xf32>
    %249 = arith.mulf %244, %246 : vector<2x8xf32>
    %250 = arith.addf %248, %249 : vector<2x8xf32>
    %251 = math.tanh %250 : vector<2x8xf32>
    %252 = arith.mulf %247, %251 : vector<2x8xf32>
    %253 = vector.extract_strided_slice %122 {offsets = [0, 3, 0], sizes = [2, 1, 32], strides = [1, 1, 1]} : vector<2x8x32xf32> to vector<2x1x32xf32>
    %254 = vector.shape_cast %253 : vector<2x1x32xf32> to vector<2x32xf32>
    %c0_167 = arith.constant 0 : index
    %c0_168 = arith.constant 0 : index
    %255 = vector.load %arg10[%c0_167, %c0_168] : memref<8x32xf32, #tpu.memory_space<vmem>>, vector<8x32xf32>
    %cst_169 = arith.constant dense<0.000000e+00> : vector<2x32xf32>
    %256 = tpu.matmul %232, %255, %cst_169 {dimension_numbers = #tpu.dot_dimension_numbers<[1], [0], [0], [1], [0, 0, 1, 1], [], []>} : vector<2x8xf32>, vector<8x32xf32>, vector<2x32xf32> -> vector<2x32xf32>
    %257 = arith.addf %254, %256 : vector<2x32xf32>
    %258 = arith.negf %257 : vector<2x32xf32>
    %259 = math.exp %258 : vector<2x32xf32>
    %cst_170 = arith.constant 1.000000e+00 : f32
    %260 = vector.broadcast %cst_170 : f32 to vector<2x32xf32>
    %261 = arith.addf %260, %259 : vector<2x32xf32>
    %262 = arith.divf %260, %261 : vector<2x32xf32>
    %263 = math.tanh %257 : vector<2x32xf32>
    %264 = vector.extract_strided_slice %262 {offsets = [0, 0], sizes = [2, 8], strides = [1, 1]} : vector<2x32xf32> to vector<2x8xf32>
    %265 = vector.extract_strided_slice %262 {offsets = [0, 8], sizes = [2, 8], strides = [1, 1]} : vector<2x32xf32> to vector<2x8xf32>
    %266 = vector.extract_strided_slice %263 {offsets = [0, 16], sizes = [2, 8], strides = [1, 1]} : vector<2x32xf32> to vector<2x8xf32>
    %267 = vector.extract_strided_slice %262 {offsets = [0, 24], sizes = [2, 8], strides = [1, 1]} : vector<2x32xf32> to vector<2x8xf32>
    %268 = arith.mulf %265, %230 : vector<2x8xf32>
    %269 = arith.mulf %264, %266 : vector<2x8xf32>
    %270 = arith.addf %268, %269 : vector<2x8xf32>
    %271 = math.tanh %270 : vector<2x8xf32>
    %272 = arith.mulf %267, %271 : vector<2x8xf32>
    %273 = vector.extract_strided_slice %128 {offsets = [0, 4, 0], sizes = [2, 1, 32], strides = [1, 1, 1]} : vector<2x8x32xf32> to vector<2x1x32xf32>
    %274 = vector.shape_cast %273 : vector<2x1x32xf32> to vector<2x32xf32>
    %c0_171 = arith.constant 0 : index
    %c0_172 = arith.constant 0 : index
    %275 = vector.load %arg13[%c0_171, %c0_172] : memref<8x32xf32, #tpu.memory_space<vmem>>, vector<8x32xf32>
    %cst_173 = arith.constant dense<0.000000e+00> : vector<2x32xf32>
    %276 = tpu.matmul %252, %275, %cst_173 {dimension_numbers = #tpu.dot_dimension_numbers<[1], [0], [0], [1], [0, 0, 1, 1], [], []>} : vector<2x8xf32>, vector<8x32xf32>, vector<2x32xf32> -> vector<2x32xf32>
    %277 = arith.addf %274, %276 : vector<2x32xf32>
    %278 = arith.negf %277 : vector<2x32xf32>
    %279 = math.exp %278 : vector<2x32xf32>
    %cst_174 = arith.constant 1.000000e+00 : f32
    %280 = vector.broadcast %cst_174 : f32 to vector<2x32xf32>
    %281 = arith.addf %280, %279 : vector<2x32xf32>
    %282 = arith.divf %280, %281 : vector<2x32xf32>
    %283 = math.tanh %277 : vector<2x32xf32>
    %284 = vector.extract_strided_slice %282 {offsets = [0, 0], sizes = [2, 8], strides = [1, 1]} : vector<2x32xf32> to vector<2x8xf32>
    %285 = vector.extract_strided_slice %282 {offsets = [0, 8], sizes = [2, 8], strides = [1, 1]} : vector<2x32xf32> to vector<2x8xf32>
    %286 = vector.extract_strided_slice %283 {offsets = [0, 16], sizes = [2, 8], strides = [1, 1]} : vector<2x32xf32> to vector<2x8xf32>
    %287 = vector.extract_strided_slice %282 {offsets = [0, 24], sizes = [2, 8], strides = [1, 1]} : vector<2x32xf32> to vector<2x8xf32>
    %288 = arith.mulf %285, %250 : vector<2x8xf32>
    %289 = arith.mulf %284, %286 : vector<2x8xf32>
    %290 = arith.addf %288, %289 : vector<2x8xf32>
    %291 = math.tanh %290 : vector<2x8xf32>
    %292 = arith.mulf %287, %291 : vector<2x8xf32>
    %293 = vector.extract_strided_slice %122 {offsets = [0, 4, 0], sizes = [2, 1, 32], strides = [1, 1, 1]} : vector<2x8x32xf32> to vector<2x1x32xf32>
    %294 = vector.shape_cast %293 : vector<2x1x32xf32> to vector<2x32xf32>
    %c0_175 = arith.constant 0 : index
    %c0_176 = arith.constant 0 : index
    %295 = vector.load %arg10[%c0_175, %c0_176] : memref<8x32xf32, #tpu.memory_space<vmem>>, vector<8x32xf32>
    %cst_177 = arith.constant dense<0.000000e+00> : vector<2x32xf32>
    %296 = tpu.matmul %272, %295, %cst_177 {dimension_numbers = #tpu.dot_dimension_numbers<[1], [0], [0], [1], [0, 0, 1, 1], [], []>} : vector<2x8xf32>, vector<8x32xf32>, vector<2x32xf32> -> vector<2x32xf32>
    %297 = arith.addf %294, %296 : vector<2x32xf32>
    %298 = arith.negf %297 : vector<2x32xf32>
    %299 = math.exp %298 : vector<2x32xf32>
    %cst_178 = arith.constant 1.000000e+00 : f32
    %300 = vector.broadcast %cst_178 : f32 to vector<2x32xf32>
    %301 = arith.addf %300, %299 : vector<2x32xf32>
    %302 = arith.divf %300, %301 : vector<2x32xf32>
    %303 = math.tanh %297 : vector<2x32xf32>
    %304 = vector.extract_strided_slice %302 {offsets = [0, 0], sizes = [2, 8], strides = [1, 1]} : vector<2x32xf32> to vector<2x8xf32>
    %305 = vector.extract_strided_slice %302 {offsets = [0, 8], sizes = [2, 8], strides = [1, 1]} : vector<2x32xf32> to vector<2x8xf32>
    %306 = vector.extract_strided_slice %303 {offsets = [0, 16], sizes = [2, 8], strides = [1, 1]} : vector<2x32xf32> to vector<2x8xf32>
    %307 = vector.extract_strided_slice %302 {offsets = [0, 24], sizes = [2, 8], strides = [1, 1]} : vector<2x32xf32> to vector<2x8xf32>
    %308 = arith.mulf %305, %270 : vector<2x8xf32>
    %309 = arith.mulf %304, %306 : vector<2x8xf32>
    %310 = arith.addf %308, %309 : vector<2x8xf32>
    %311 = math.tanh %310 : vector<2x8xf32>
    %312 = arith.mulf %307, %311 : vector<2x8xf32>
    %313 = vector.extract_strided_slice %128 {offsets = [0, 3, 0], sizes = [2, 1, 32], strides = [1, 1, 1]} : vector<2x8x32xf32> to vector<2x1x32xf32>
    %314 = vector.shape_cast %313 : vector<2x1x32xf32> to vector<2x32xf32>
    %c0_179 = arith.constant 0 : index
    %c0_180 = arith.constant 0 : index
    %315 = vector.load %arg13[%c0_179, %c0_180] : memref<8x32xf32, #tpu.memory_space<vmem>>, vector<8x32xf32>
    %cst_181 = arith.constant dense<0.000000e+00> : vector<2x32xf32>
    %316 = tpu.matmul %292, %315, %cst_181 {dimension_numbers = #tpu.dot_dimension_numbers<[1], [0], [0], [1], [0, 0, 1, 1], [], []>} : vector<2x8xf32>, vector<8x32xf32>, vector<2x32xf32> -> vector<2x32xf32>
    %317 = arith.addf %314, %316 : vector<2x32xf32>
    %318 = arith.negf %317 : vector<2x32xf32>
    %319 = math.exp %318 : vector<2x32xf32>
    %cst_182 = arith.constant 1.000000e+00 : f32
    %320 = vector.broadcast %cst_182 : f32 to vector<2x32xf32>
    %321 = arith.addf %320, %319 : vector<2x32xf32>
    %322 = arith.divf %320, %321 : vector<2x32xf32>
    %323 = math.tanh %317 : vector<2x32xf32>
    %324 = vector.extract_strided_slice %322 {offsets = [0, 0], sizes = [2, 8], strides = [1, 1]} : vector<2x32xf32> to vector<2x8xf32>
    %325 = vector.extract_strided_slice %322 {offsets = [0, 8], sizes = [2, 8], strides = [1, 1]} : vector<2x32xf32> to vector<2x8xf32>
    %326 = vector.extract_strided_slice %323 {offsets = [0, 16], sizes = [2, 8], strides = [1, 1]} : vector<2x32xf32> to vector<2x8xf32>
    %327 = vector.extract_strided_slice %322 {offsets = [0, 24], sizes = [2, 8], strides = [1, 1]} : vector<2x32xf32> to vector<2x8xf32>
    %328 = arith.mulf %325, %290 : vector<2x8xf32>
    %329 = arith.mulf %324, %326 : vector<2x8xf32>
    %330 = arith.addf %328, %329 : vector<2x8xf32>
    %331 = math.tanh %330 : vector<2x8xf32>
    %332 = arith.mulf %327, %331 : vector<2x8xf32>
    %333 = vector.extract_strided_slice %122 {offsets = [0, 5, 0], sizes = [2, 1, 32], strides = [1, 1, 1]} : vector<2x8x32xf32> to vector<2x1x32xf32>
    %334 = vector.shape_cast %333 : vector<2x1x32xf32> to vector<2x32xf32>
    %c0_183 = arith.constant 0 : index
    %c0_184 = arith.constant 0 : index
    %335 = vector.load %arg10[%c0_183, %c0_184] : memref<8x32xf32, #tpu.memory_space<vmem>>, vector<8x32xf32>
    %cst_185 = arith.constant dense<0.000000e+00> : vector<2x32xf32>
    %336 = tpu.matmul %312, %335, %cst_185 {dimension_numbers = #tpu.dot_dimension_numbers<[1], [0], [0], [1], [0, 0, 1, 1], [], []>} : vector<2x8xf32>, vector<8x32xf32>, vector<2x32xf32> -> vector<2x32xf32>
    %337 = arith.addf %334, %336 : vector<2x32xf32>
    %338 = arith.negf %337 : vector<2x32xf32>
    %339 = math.exp %338 : vector<2x32xf32>
    %cst_186 = arith.constant 1.000000e+00 : f32
    %340 = vector.broadcast %cst_186 : f32 to vector<2x32xf32>
    %341 = arith.addf %340, %339 : vector<2x32xf32>
    %342 = arith.divf %340, %341 : vector<2x32xf32>
    %343 = math.tanh %337 : vector<2x32xf32>
    %344 = vector.extract_strided_slice %342 {offsets = [0, 0], sizes = [2, 8], strides = [1, 1]} : vector<2x32xf32> to vector<2x8xf32>
    %345 = vector.extract_strided_slice %342 {offsets = [0, 8], sizes = [2, 8], strides = [1, 1]} : vector<2x32xf32> to vector<2x8xf32>
    %346 = vector.extract_strided_slice %343 {offsets = [0, 16], sizes = [2, 8], strides = [1, 1]} : vector<2x32xf32> to vector<2x8xf32>
    %347 = vector.extract_strided_slice %342 {offsets = [0, 24], sizes = [2, 8], strides = [1, 1]} : vector<2x32xf32> to vector<2x8xf32>
    %348 = arith.mulf %345, %310 : vector<2x8xf32>
    %349 = arith.mulf %344, %346 : vector<2x8xf32>
    %350 = arith.addf %348, %349 : vector<2x8xf32>
    %351 = math.tanh %350 : vector<2x8xf32>
    %352 = arith.mulf %347, %351 : vector<2x8xf32>
    %353 = vector.extract_strided_slice %128 {offsets = [0, 2, 0], sizes = [2, 1, 32], strides = [1, 1, 1]} : vector<2x8x32xf32> to vector<2x1x32xf32>
    %354 = vector.shape_cast %353 : vector<2x1x32xf32> to vector<2x32xf32>
    %c0_187 = arith.constant 0 : index
    %c0_188 = arith.constant 0 : index
    %355 = vector.load %arg13[%c0_187, %c0_188] : memref<8x32xf32, #tpu.memory_space<vmem>>, vector<8x32xf32>
    %cst_189 = arith.constant dense<0.000000e+00> : vector<2x32xf32>
    %356 = tpu.matmul %332, %355, %cst_189 {dimension_numbers = #tpu.dot_dimension_numbers<[1], [0], [0], [1], [0, 0, 1, 1], [], []>} : vector<2x8xf32>, vector<8x32xf32>, vector<2x32xf32> -> vector<2x32xf32>
    %357 = arith.addf %354, %356 : vector<2x32xf32>
    %358 = arith.negf %357 : vector<2x32xf32>
    %359 = math.exp %358 : vector<2x32xf32>
    %cst_190 = arith.constant 1.000000e+00 : f32
    %360 = vector.broadcast %cst_190 : f32 to vector<2x32xf32>
    %361 = arith.addf %360, %359 : vector<2x32xf32>
    %362 = arith.divf %360, %361 : vector<2x32xf32>
    %363 = math.tanh %357 : vector<2x32xf32>
    %364 = vector.extract_strided_slice %362 {offsets = [0, 0], sizes = [2, 8], strides = [1, 1]} : vector<2x32xf32> to vector<2x8xf32>
    %365 = vector.extract_strided_slice %362 {offsets = [0, 8], sizes = [2, 8], strides = [1, 1]} : vector<2x32xf32> to vector<2x8xf32>
    %366 = vector.extract_strided_slice %363 {offsets = [0, 16], sizes = [2, 8], strides = [1, 1]} : vector<2x32xf32> to vector<2x8xf32>
    %367 = vector.extract_strided_slice %362 {offsets = [0, 24], sizes = [2, 8], strides = [1, 1]} : vector<2x32xf32> to vector<2x8xf32>
    %368 = arith.mulf %365, %330 : vector<2x8xf32>
    %369 = arith.mulf %364, %366 : vector<2x8xf32>
    %370 = arith.addf %368, %369 : vector<2x8xf32>
    %371 = math.tanh %370 : vector<2x8xf32>
    %372 = arith.mulf %367, %371 : vector<2x8xf32>
    %373 = vector.extract_strided_slice %122 {offsets = [0, 6, 0], sizes = [2, 1, 32], strides = [1, 1, 1]} : vector<2x8x32xf32> to vector<2x1x32xf32>
    %374 = vector.shape_cast %373 : vector<2x1x32xf32> to vector<2x32xf32>
    %c0_191 = arith.constant 0 : index
    %c0_192 = arith.constant 0 : index
    %375 = vector.load %arg10[%c0_191, %c0_192] : memref<8x32xf32, #tpu.memory_space<vmem>>, vector<8x32xf32>
    %cst_193 = arith.constant dense<0.000000e+00> : vector<2x32xf32>
    %376 = tpu.matmul %352, %375, %cst_193 {dimension_numbers = #tpu.dot_dimension_numbers<[1], [0], [0], [1], [0, 0, 1, 1], [], []>} : vector<2x8xf32>, vector<8x32xf32>, vector<2x32xf32> -> vector<2x32xf32>
    %377 = arith.addf %374, %376 : vector<2x32xf32>
    %378 = arith.negf %377 : vector<2x32xf32>
    %379 = math.exp %378 : vector<2x32xf32>
    %cst_194 = arith.constant 1.000000e+00 : f32
    %380 = vector.broadcast %cst_194 : f32 to vector<2x32xf32>
    %381 = arith.addf %380, %379 : vector<2x32xf32>
    %382 = arith.divf %380, %381 : vector<2x32xf32>
    %383 = math.tanh %377 : vector<2x32xf32>
    %384 = vector.extract_strided_slice %382 {offsets = [0, 0], sizes = [2, 8], strides = [1, 1]} : vector<2x32xf32> to vector<2x8xf32>
    %385 = vector.extract_strided_slice %382 {offsets = [0, 8], sizes = [2, 8], strides = [1, 1]} : vector<2x32xf32> to vector<2x8xf32>
    %386 = vector.extract_strided_slice %383 {offsets = [0, 16], sizes = [2, 8], strides = [1, 1]} : vector<2x32xf32> to vector<2x8xf32>
    %387 = vector.extract_strided_slice %382 {offsets = [0, 24], sizes = [2, 8], strides = [1, 1]} : vector<2x32xf32> to vector<2x8xf32>
    %388 = arith.mulf %385, %350 : vector<2x8xf32>
    %389 = arith.mulf %384, %386 : vector<2x8xf32>
    %390 = arith.addf %388, %389 : vector<2x8xf32>
    %391 = math.tanh %390 : vector<2x8xf32>
    %392 = arith.mulf %387, %391 : vector<2x8xf32>
    %393 = vector.extract_strided_slice %128 {offsets = [0, 1, 0], sizes = [2, 1, 32], strides = [1, 1, 1]} : vector<2x8x32xf32> to vector<2x1x32xf32>
    %394 = vector.shape_cast %393 : vector<2x1x32xf32> to vector<2x32xf32>
    %c0_195 = arith.constant 0 : index
    %c0_196 = arith.constant 0 : index
    %395 = vector.load %arg13[%c0_195, %c0_196] : memref<8x32xf32, #tpu.memory_space<vmem>>, vector<8x32xf32>
    %cst_197 = arith.constant dense<0.000000e+00> : vector<2x32xf32>
    %396 = tpu.matmul %372, %395, %cst_197 {dimension_numbers = #tpu.dot_dimension_numbers<[1], [0], [0], [1], [0, 0, 1, 1], [], []>} : vector<2x8xf32>, vector<8x32xf32>, vector<2x32xf32> -> vector<2x32xf32>
    %397 = arith.addf %394, %396 : vector<2x32xf32>
    %398 = arith.negf %397 : vector<2x32xf32>
    %399 = math.exp %398 : vector<2x32xf32>
    %cst_198 = arith.constant 1.000000e+00 : f32
    %400 = vector.broadcast %cst_198 : f32 to vector<2x32xf32>
    %401 = arith.addf %400, %399 : vector<2x32xf32>
    %402 = arith.divf %400, %401 : vector<2x32xf32>
    %403 = math.tanh %397 : vector<2x32xf32>
    %404 = vector.extract_strided_slice %402 {offsets = [0, 0], sizes = [2, 8], strides = [1, 1]} : vector<2x32xf32> to vector<2x8xf32>
    %405 = vector.extract_strided_slice %402 {offsets = [0, 8], sizes = [2, 8], strides = [1, 1]} : vector<2x32xf32> to vector<2x8xf32>
    %406 = vector.extract_strided_slice %403 {offsets = [0, 16], sizes = [2, 8], strides = [1, 1]} : vector<2x32xf32> to vector<2x8xf32>
    %407 = vector.extract_strided_slice %402 {offsets = [0, 24], sizes = [2, 8], strides = [1, 1]} : vector<2x32xf32> to vector<2x8xf32>
    %408 = arith.mulf %405, %370 : vector<2x8xf32>
    %409 = arith.mulf %404, %406 : vector<2x8xf32>
    %410 = arith.addf %408, %409 : vector<2x8xf32>
    %411 = math.tanh %410 : vector<2x8xf32>
    %412 = arith.mulf %407, %411 : vector<2x8xf32>
    %413 = vector.extract_strided_slice %122 {offsets = [0, 7, 0], sizes = [2, 1, 32], strides = [1, 1, 1]} : vector<2x8x32xf32> to vector<2x1x32xf32>
    %414 = vector.shape_cast %413 : vector<2x1x32xf32> to vector<2x32xf32>
    %c0_199 = arith.constant 0 : index
    %c0_200 = arith.constant 0 : index
    %415 = vector.load %arg10[%c0_199, %c0_200] : memref<8x32xf32, #tpu.memory_space<vmem>>, vector<8x32xf32>
    %cst_201 = arith.constant dense<0.000000e+00> : vector<2x32xf32>
    %416 = tpu.matmul %392, %415, %cst_201 {dimension_numbers = #tpu.dot_dimension_numbers<[1], [0], [0], [1], [0, 0, 1, 1], [], []>} : vector<2x8xf32>, vector<8x32xf32>, vector<2x32xf32> -> vector<2x32xf32>
    %417 = arith.addf %414, %416 : vector<2x32xf32>
    %418 = arith.negf %417 : vector<2x32xf32>
    %419 = math.exp %418 : vector<2x32xf32>
    %cst_202 = arith.constant 1.000000e+00 : f32
    %420 = vector.broadcast %cst_202 : f32 to vector<2x32xf32>
    %421 = arith.addf %420, %419 : vector<2x32xf32>
    %422 = arith.divf %420, %421 : vector<2x32xf32>
    %423 = math.tanh %417 : vector<2x32xf32>
    %424 = vector.extract_strided_slice %422 {offsets = [0, 0], sizes = [2, 8], strides = [1, 1]} : vector<2x32xf32> to vector<2x8xf32>
    %425 = vector.extract_strided_slice %422 {offsets = [0, 8], sizes = [2, 8], strides = [1, 1]} : vector<2x32xf32> to vector<2x8xf32>
    %426 = vector.extract_strided_slice %423 {offsets = [0, 16], sizes = [2, 8], strides = [1, 1]} : vector<2x32xf32> to vector<2x8xf32>
    %427 = vector.extract_strided_slice %422 {offsets = [0, 24], sizes = [2, 8], strides = [1, 1]} : vector<2x32xf32> to vector<2x8xf32>
    %428 = arith.mulf %425, %390 : vector<2x8xf32>
    %429 = arith.mulf %424, %426 : vector<2x8xf32>
    %430 = arith.addf %428, %429 : vector<2x8xf32>
    %431 = math.tanh %430 : vector<2x8xf32>
    %432 = arith.mulf %427, %431 : vector<2x8xf32>
    %433 = vector.extract_strided_slice %128 {offsets = [0, 0, 0], sizes = [2, 1, 32], strides = [1, 1, 1]} : vector<2x8x32xf32> to vector<2x1x32xf32>
    %434 = vector.shape_cast %433 : vector<2x1x32xf32> to vector<2x32xf32>
    %c0_203 = arith.constant 0 : index
    %c0_204 = arith.constant 0 : index
    %435 = vector.load %arg13[%c0_203, %c0_204] : memref<8x32xf32, #tpu.memory_space<vmem>>, vector<8x32xf32>
    %cst_205 = arith.constant dense<0.000000e+00> : vector<2x32xf32>
    %436 = tpu.matmul %412, %435, %cst_205 {dimension_numbers = #tpu.dot_dimension_numbers<[1], [0], [0], [1], [0, 0, 1, 1], [], []>} : vector<2x8xf32>, vector<8x32xf32>, vector<2x32xf32> -> vector<2x32xf32>
    %437 = arith.addf %434, %436 : vector<2x32xf32>
    %438 = arith.negf %437 : vector<2x32xf32>
    %439 = math.exp %438 : vector<2x32xf32>
    %cst_206 = arith.constant 1.000000e+00 : f32
    %440 = vector.broadcast %cst_206 : f32 to vector<2x32xf32>
    %441 = arith.addf %440, %439 : vector<2x32xf32>
    %442 = arith.divf %440, %441 : vector<2x32xf32>
    %443 = math.tanh %437 : vector<2x32xf32>
    %444 = vector.extract_strided_slice %442 {offsets = [0, 0], sizes = [2, 8], strides = [1, 1]} : vector<2x32xf32> to vector<2x8xf32>
    %445 = vector.extract_strided_slice %442 {offsets = [0, 8], sizes = [2, 8], strides = [1, 1]} : vector<2x32xf32> to vector<2x8xf32>
    %446 = vector.extract_strided_slice %443 {offsets = [0, 16], sizes = [2, 8], strides = [1, 1]} : vector<2x32xf32> to vector<2x8xf32>
    %447 = vector.extract_strided_slice %442 {offsets = [0, 24], sizes = [2, 8], strides = [1, 1]} : vector<2x32xf32> to vector<2x8xf32>
    %448 = arith.mulf %445, %410 : vector<2x8xf32>
    %449 = arith.mulf %444, %446 : vector<2x8xf32>
    %450 = arith.addf %448, %449 : vector<2x8xf32>
    %451 = math.tanh %450 : vector<2x8xf32>
    %452 = arith.mulf %447, %451 : vector<2x8xf32>
    %453 = vector.shape_cast %152 : vector<2x8xf32> to vector<2x1x8xf32>
    %454 = vector.shape_cast %192 : vector<2x8xf32> to vector<2x1x8xf32>
    %455 = vector.shape_cast %232 : vector<2x8xf32> to vector<2x1x8xf32>
    %456 = vector.shape_cast %272 : vector<2x8xf32> to vector<2x1x8xf32>
    %457 = vector.shape_cast %312 : vector<2x8xf32> to vector<2x1x8xf32>
    %458 = vector.shape_cast %352 : vector<2x8xf32> to vector<2x1x8xf32>
    %459 = vector.shape_cast %392 : vector<2x8xf32> to vector<2x1x8xf32>
    %460 = vector.shape_cast %432 : vector<2x8xf32> to vector<2x1x8xf32>
    %461 = tpu.concatenate %453, %454, %455, %456, %457, %458, %459, %460 in 1 : vector<2x1x8xf32>, vector<2x1x8xf32>, vector<2x1x8xf32>, vector<2x1x8xf32>, vector<2x1x8xf32>, vector<2x1x8xf32>, vector<2x1x8xf32>, vector<2x1x8xf32> -> vector<2x8x8xf32>
    %462 = vector.shape_cast %461 : vector<2x8x8xf32> to vector<16x8xf32>
    %463 = vector.shape_cast %452 : vector<2x8xf32> to vector<2x1x8xf32>
    %464 = vector.shape_cast %412 : vector<2x8xf32> to vector<2x1x8xf32>
    %465 = vector.shape_cast %372 : vector<2x8xf32> to vector<2x1x8xf32>
    %466 = vector.shape_cast %332 : vector<2x8xf32> to vector<2x1x8xf32>
    %467 = vector.shape_cast %292 : vector<2x8xf32> to vector<2x1x8xf32>
    %468 = vector.shape_cast %252 : vector<2x8xf32> to vector<2x1x8xf32>
    %469 = vector.shape_cast %212 : vector<2x8xf32> to vector<2x1x8xf32>
    %470 = vector.shape_cast %172 : vector<2x8xf32> to vector<2x1x8xf32>
    %471 = tpu.concatenate %463, %464, %465, %466, %467, %468, %469, %470 in 1 : vector<2x1x8xf32>, vector<2x1x8xf32>, vector<2x1x8xf32>, vector<2x1x8xf32>, vector<2x1x8xf32>, vector<2x1x8xf32>, vector<2x1x8xf32>, vector<2x1x8xf32> -> vector<2x8x8xf32>
    %472 = vector.shape_cast %471 : vector<2x8x8xf32> to vector<16x8xf32>
    %473 = tpu.concatenate %462, %472 in 1 : vector<16x8xf32>, vector<16x8xf32> -> vector<16x16xf32>
    %c0_207 = arith.constant 0 : index
    %c0_208 = arith.constant 0 : index
    %474 = vector.load %arg15[%c0_207, %c0_208] : memref<16x32xf32, #tpu.memory_space<vmem>>, vector<16x32xf32>
    %cst_209 = arith.constant dense<0.000000e+00> : vector<16x32xf32>
    %475 = tpu.matmul %473, %474, %cst_209 {dimension_numbers = #tpu.dot_dimension_numbers<[1], [0], [0], [1], [0, 0, 1, 1], [], []>} : vector<16x16xf32>, vector<16x32xf32>, vector<16x32xf32> -> vector<16x32xf32>
    %c0_210 = arith.constant 0 : index
    %c0_211 = arith.constant 0 : index
    %476 = vector.load %arg17[%c0_210, %c0_211] : memref<1x32xf32, #tpu.memory_space<vmem>>, vector<1x32xf32>
    %477 = vector.broadcast %476 : vector<1x32xf32> to vector<16x32xf32>
    %478 = arith.addf %475, %477 : vector<16x32xf32>
    %479 = vector.shape_cast %478 : vector<16x32xf32> to vector<2x8x32xf32>
    %c0_212 = arith.constant 0 : index
    %c0_213 = arith.constant 0 : index
    %480 = vector.load %arg18[%c0_212, %c0_213] : memref<16x32xf32, #tpu.memory_space<vmem>>, vector<16x32xf32>
    %cst_214 = arith.constant dense<0.000000e+00> : vector<16x32xf32>
    %481 = tpu.matmul %473, %480, %cst_214 {dimension_numbers = #tpu.dot_dimension_numbers<[1], [0], [0], [1], [0, 0, 1, 1], [], []>} : vector<16x16xf32>, vector<16x32xf32>, vector<16x32xf32> -> vector<16x32xf32>
    %c0_215 = arith.constant 0 : index
    %c0_216 = arith.constant 0 : index
    %482 = vector.load %arg20[%c0_215, %c0_216] : memref<1x32xf32, #tpu.memory_space<vmem>>, vector<1x32xf32>
    %483 = vector.broadcast %482 : vector<1x32xf32> to vector<16x32xf32>
    %484 = arith.addf %481, %483 : vector<16x32xf32>
    %485 = vector.shape_cast %484 : vector<16x32xf32> to vector<2x8x32xf32>
    %cst_217 = arith.constant 0.000000e+00 : f32
    %486 = vector.broadcast %cst_217 : f32 to vector<2x8xf32>
    %cst_218 = arith.constant 0.000000e+00 : f32
    %487 = vector.broadcast %cst_218 : f32 to vector<2x8xf32>
    %cst_219 = arith.constant 0.000000e+00 : f32
    %488 = vector.broadcast %cst_219 : f32 to vector<2x8xf32>
    %cst_220 = arith.constant 0.000000e+00 : f32
    %489 = vector.broadcast %cst_220 : f32 to vector<2x8xf32>
    %490 = vector.extract_strided_slice %479 {offsets = [0, 0, 0], sizes = [2, 1, 32], strides = [1, 1, 1]} : vector<2x8x32xf32> to vector<2x1x32xf32>
    %491 = vector.shape_cast %490 : vector<2x1x32xf32> to vector<2x32xf32>
    %c0_221 = arith.constant 0 : index
    %c0_222 = arith.constant 0 : index
    %492 = vector.load %arg16[%c0_221, %c0_222] : memref<8x32xf32, #tpu.memory_space<vmem>>, vector<8x32xf32>
    %cst_223 = arith.constant dense<0.000000e+00> : vector<2x32xf32>
    %493 = tpu.matmul %486, %492, %cst_223 {dimension_numbers = #tpu.dot_dimension_numbers<[1], [0], [0], [1], [0, 0, 1, 1], [], []>} : vector<2x8xf32>, vector<8x32xf32>, vector<2x32xf32> -> vector<2x32xf32>
    %494 = arith.addf %491, %493 : vector<2x32xf32>
    %495 = arith.negf %494 : vector<2x32xf32>
    %496 = math.exp %495 : vector<2x32xf32>
    %cst_224 = arith.constant 1.000000e+00 : f32
    %497 = vector.broadcast %cst_224 : f32 to vector<2x32xf32>
    %498 = arith.addf %497, %496 : vector<2x32xf32>
    %499 = arith.divf %497, %498 : vector<2x32xf32>
    %500 = math.tanh %494 : vector<2x32xf32>
    %501 = vector.extract_strided_slice %499 {offsets = [0, 0], sizes = [2, 8], strides = [1, 1]} : vector<2x32xf32> to vector<2x8xf32>
    %502 = vector.extract_strided_slice %499 {offsets = [0, 8], sizes = [2, 8], strides = [1, 1]} : vector<2x32xf32> to vector<2x8xf32>
    %503 = vector.extract_strided_slice %500 {offsets = [0, 16], sizes = [2, 8], strides = [1, 1]} : vector<2x32xf32> to vector<2x8xf32>
    %504 = vector.extract_strided_slice %499 {offsets = [0, 24], sizes = [2, 8], strides = [1, 1]} : vector<2x32xf32> to vector<2x8xf32>
    %505 = arith.mulf %502, %487 : vector<2x8xf32>
    %506 = arith.mulf %501, %503 : vector<2x8xf32>
    %507 = arith.addf %505, %506 : vector<2x8xf32>
    %508 = math.tanh %507 : vector<2x8xf32>
    %509 = arith.mulf %504, %508 : vector<2x8xf32>
    %510 = vector.extract_strided_slice %485 {offsets = [0, 7, 0], sizes = [2, 1, 32], strides = [1, 1, 1]} : vector<2x8x32xf32> to vector<2x1x32xf32>
    %511 = vector.shape_cast %510 : vector<2x1x32xf32> to vector<2x32xf32>
    %c0_225 = arith.constant 0 : index
    %c0_226 = arith.constant 0 : index
    %512 = vector.load %arg19[%c0_225, %c0_226] : memref<8x32xf32, #tpu.memory_space<vmem>>, vector<8x32xf32>
    %cst_227 = arith.constant dense<0.000000e+00> : vector<2x32xf32>
    %513 = tpu.matmul %488, %512, %cst_227 {dimension_numbers = #tpu.dot_dimension_numbers<[1], [0], [0], [1], [0, 0, 1, 1], [], []>} : vector<2x8xf32>, vector<8x32xf32>, vector<2x32xf32> -> vector<2x32xf32>
    %514 = arith.addf %511, %513 : vector<2x32xf32>
    %515 = arith.negf %514 : vector<2x32xf32>
    %516 = math.exp %515 : vector<2x32xf32>
    %cst_228 = arith.constant 1.000000e+00 : f32
    %517 = vector.broadcast %cst_228 : f32 to vector<2x32xf32>
    %518 = arith.addf %517, %516 : vector<2x32xf32>
    %519 = arith.divf %517, %518 : vector<2x32xf32>
    %520 = math.tanh %514 : vector<2x32xf32>
    %521 = vector.extract_strided_slice %519 {offsets = [0, 0], sizes = [2, 8], strides = [1, 1]} : vector<2x32xf32> to vector<2x8xf32>
    %522 = vector.extract_strided_slice %519 {offsets = [0, 8], sizes = [2, 8], strides = [1, 1]} : vector<2x32xf32> to vector<2x8xf32>
    %523 = vector.extract_strided_slice %520 {offsets = [0, 16], sizes = [2, 8], strides = [1, 1]} : vector<2x32xf32> to vector<2x8xf32>
    %524 = vector.extract_strided_slice %519 {offsets = [0, 24], sizes = [2, 8], strides = [1, 1]} : vector<2x32xf32> to vector<2x8xf32>
    %525 = arith.mulf %522, %489 : vector<2x8xf32>
    %526 = arith.mulf %521, %523 : vector<2x8xf32>
    %527 = arith.addf %525, %526 : vector<2x8xf32>
    %528 = math.tanh %527 : vector<2x8xf32>
    %529 = arith.mulf %524, %528 : vector<2x8xf32>
    %530 = vector.extract_strided_slice %479 {offsets = [0, 1, 0], sizes = [2, 1, 32], strides = [1, 1, 1]} : vector<2x8x32xf32> to vector<2x1x32xf32>
    %531 = vector.shape_cast %530 : vector<2x1x32xf32> to vector<2x32xf32>
    %c0_229 = arith.constant 0 : index
    %c0_230 = arith.constant 0 : index
    %532 = vector.load %arg16[%c0_229, %c0_230] : memref<8x32xf32, #tpu.memory_space<vmem>>, vector<8x32xf32>
    %cst_231 = arith.constant dense<0.000000e+00> : vector<2x32xf32>
    %533 = tpu.matmul %509, %532, %cst_231 {dimension_numbers = #tpu.dot_dimension_numbers<[1], [0], [0], [1], [0, 0, 1, 1], [], []>} : vector<2x8xf32>, vector<8x32xf32>, vector<2x32xf32> -> vector<2x32xf32>
    %534 = arith.addf %531, %533 : vector<2x32xf32>
    %535 = arith.negf %534 : vector<2x32xf32>
    %536 = math.exp %535 : vector<2x32xf32>
    %cst_232 = arith.constant 1.000000e+00 : f32
    %537 = vector.broadcast %cst_232 : f32 to vector<2x32xf32>
    %538 = arith.addf %537, %536 : vector<2x32xf32>
    %539 = arith.divf %537, %538 : vector<2x32xf32>
    %540 = math.tanh %534 : vector<2x32xf32>
    %541 = vector.extract_strided_slice %539 {offsets = [0, 0], sizes = [2, 8], strides = [1, 1]} : vector<2x32xf32> to vector<2x8xf32>
    %542 = vector.extract_strided_slice %539 {offsets = [0, 8], sizes = [2, 8], strides = [1, 1]} : vector<2x32xf32> to vector<2x8xf32>
    %543 = vector.extract_strided_slice %540 {offsets = [0, 16], sizes = [2, 8], strides = [1, 1]} : vector<2x32xf32> to vector<2x8xf32>
    %544 = vector.extract_strided_slice %539 {offsets = [0, 24], sizes = [2, 8], strides = [1, 1]} : vector<2x32xf32> to vector<2x8xf32>
    %545 = arith.mulf %542, %507 : vector<2x8xf32>
    %546 = arith.mulf %541, %543 : vector<2x8xf32>
    %547 = arith.addf %545, %546 : vector<2x8xf32>
    %548 = math.tanh %547 : vector<2x8xf32>
    %549 = arith.mulf %544, %548 : vector<2x8xf32>
    %550 = vector.extract_strided_slice %485 {offsets = [0, 6, 0], sizes = [2, 1, 32], strides = [1, 1, 1]} : vector<2x8x32xf32> to vector<2x1x32xf32>
    %551 = vector.shape_cast %550 : vector<2x1x32xf32> to vector<2x32xf32>
    %c0_233 = arith.constant 0 : index
    %c0_234 = arith.constant 0 : index
    %552 = vector.load %arg19[%c0_233, %c0_234] : memref<8x32xf32, #tpu.memory_space<vmem>>, vector<8x32xf32>
    %cst_235 = arith.constant dense<0.000000e+00> : vector<2x32xf32>
    %553 = tpu.matmul %529, %552, %cst_235 {dimension_numbers = #tpu.dot_dimension_numbers<[1], [0], [0], [1], [0, 0, 1, 1], [], []>} : vector<2x8xf32>, vector<8x32xf32>, vector<2x32xf32> -> vector<2x32xf32>
    %554 = arith.addf %551, %553 : vector<2x32xf32>
    %555 = arith.negf %554 : vector<2x32xf32>
    %556 = math.exp %555 : vector<2x32xf32>
    %cst_236 = arith.constant 1.000000e+00 : f32
    %557 = vector.broadcast %cst_236 : f32 to vector<2x32xf32>
    %558 = arith.addf %557, %556 : vector<2x32xf32>
    %559 = arith.divf %557, %558 : vector<2x32xf32>
    %560 = math.tanh %554 : vector<2x32xf32>
    %561 = vector.extract_strided_slice %559 {offsets = [0, 0], sizes = [2, 8], strides = [1, 1]} : vector<2x32xf32> to vector<2x8xf32>
    %562 = vector.extract_strided_slice %559 {offsets = [0, 8], sizes = [2, 8], strides = [1, 1]} : vector<2x32xf32> to vector<2x8xf32>
    %563 = vector.extract_strided_slice %560 {offsets = [0, 16], sizes = [2, 8], strides = [1, 1]} : vector<2x32xf32> to vector<2x8xf32>
    %564 = vector.extract_strided_slice %559 {offsets = [0, 24], sizes = [2, 8], strides = [1, 1]} : vector<2x32xf32> to vector<2x8xf32>
    %565 = arith.mulf %562, %527 : vector<2x8xf32>
    %566 = arith.mulf %561, %563 : vector<2x8xf32>
    %567 = arith.addf %565, %566 : vector<2x8xf32>
    %568 = math.tanh %567 : vector<2x8xf32>
    %569 = arith.mulf %564, %568 : vector<2x8xf32>
    %570 = vector.extract_strided_slice %479 {offsets = [0, 2, 0], sizes = [2, 1, 32], strides = [1, 1, 1]} : vector<2x8x32xf32> to vector<2x1x32xf32>
    %571 = vector.shape_cast %570 : vector<2x1x32xf32> to vector<2x32xf32>
    %c0_237 = arith.constant 0 : index
    %c0_238 = arith.constant 0 : index
    %572 = vector.load %arg16[%c0_237, %c0_238] : memref<8x32xf32, #tpu.memory_space<vmem>>, vector<8x32xf32>
    %cst_239 = arith.constant dense<0.000000e+00> : vector<2x32xf32>
    %573 = tpu.matmul %549, %572, %cst_239 {dimension_numbers = #tpu.dot_dimension_numbers<[1], [0], [0], [1], [0, 0, 1, 1], [], []>} : vector<2x8xf32>, vector<8x32xf32>, vector<2x32xf32> -> vector<2x32xf32>
    %574 = arith.addf %571, %573 : vector<2x32xf32>
    %575 = arith.negf %574 : vector<2x32xf32>
    %576 = math.exp %575 : vector<2x32xf32>
    %cst_240 = arith.constant 1.000000e+00 : f32
    %577 = vector.broadcast %cst_240 : f32 to vector<2x32xf32>
    %578 = arith.addf %577, %576 : vector<2x32xf32>
    %579 = arith.divf %577, %578 : vector<2x32xf32>
    %580 = math.tanh %574 : vector<2x32xf32>
    %581 = vector.extract_strided_slice %579 {offsets = [0, 0], sizes = [2, 8], strides = [1, 1]} : vector<2x32xf32> to vector<2x8xf32>
    %582 = vector.extract_strided_slice %579 {offsets = [0, 8], sizes = [2, 8], strides = [1, 1]} : vector<2x32xf32> to vector<2x8xf32>
    %583 = vector.extract_strided_slice %580 {offsets = [0, 16], sizes = [2, 8], strides = [1, 1]} : vector<2x32xf32> to vector<2x8xf32>
    %584 = vector.extract_strided_slice %579 {offsets = [0, 24], sizes = [2, 8], strides = [1, 1]} : vector<2x32xf32> to vector<2x8xf32>
    %585 = arith.mulf %582, %547 : vector<2x8xf32>
    %586 = arith.mulf %581, %583 : vector<2x8xf32>
    %587 = arith.addf %585, %586 : vector<2x8xf32>
    %588 = math.tanh %587 : vector<2x8xf32>
    %589 = arith.mulf %584, %588 : vector<2x8xf32>
    %590 = vector.extract_strided_slice %485 {offsets = [0, 5, 0], sizes = [2, 1, 32], strides = [1, 1, 1]} : vector<2x8x32xf32> to vector<2x1x32xf32>
    %591 = vector.shape_cast %590 : vector<2x1x32xf32> to vector<2x32xf32>
    %c0_241 = arith.constant 0 : index
    %c0_242 = arith.constant 0 : index
    %592 = vector.load %arg19[%c0_241, %c0_242] : memref<8x32xf32, #tpu.memory_space<vmem>>, vector<8x32xf32>
    %cst_243 = arith.constant dense<0.000000e+00> : vector<2x32xf32>
    %593 = tpu.matmul %569, %592, %cst_243 {dimension_numbers = #tpu.dot_dimension_numbers<[1], [0], [0], [1], [0, 0, 1, 1], [], []>} : vector<2x8xf32>, vector<8x32xf32>, vector<2x32xf32> -> vector<2x32xf32>
    %594 = arith.addf %591, %593 : vector<2x32xf32>
    %595 = arith.negf %594 : vector<2x32xf32>
    %596 = math.exp %595 : vector<2x32xf32>
    %cst_244 = arith.constant 1.000000e+00 : f32
    %597 = vector.broadcast %cst_244 : f32 to vector<2x32xf32>
    %598 = arith.addf %597, %596 : vector<2x32xf32>
    %599 = arith.divf %597, %598 : vector<2x32xf32>
    %600 = math.tanh %594 : vector<2x32xf32>
    %601 = vector.extract_strided_slice %599 {offsets = [0, 0], sizes = [2, 8], strides = [1, 1]} : vector<2x32xf32> to vector<2x8xf32>
    %602 = vector.extract_strided_slice %599 {offsets = [0, 8], sizes = [2, 8], strides = [1, 1]} : vector<2x32xf32> to vector<2x8xf32>
    %603 = vector.extract_strided_slice %600 {offsets = [0, 16], sizes = [2, 8], strides = [1, 1]} : vector<2x32xf32> to vector<2x8xf32>
    %604 = vector.extract_strided_slice %599 {offsets = [0, 24], sizes = [2, 8], strides = [1, 1]} : vector<2x32xf32> to vector<2x8xf32>
    %605 = arith.mulf %602, %567 : vector<2x8xf32>
    %606 = arith.mulf %601, %603 : vector<2x8xf32>
    %607 = arith.addf %605, %606 : vector<2x8xf32>
    %608 = math.tanh %607 : vector<2x8xf32>
    %609 = arith.mulf %604, %608 : vector<2x8xf32>
    %610 = vector.extract_strided_slice %479 {offsets = [0, 3, 0], sizes = [2, 1, 32], strides = [1, 1, 1]} : vector<2x8x32xf32> to vector<2x1x32xf32>
    %611 = vector.shape_cast %610 : vector<2x1x32xf32> to vector<2x32xf32>
    %c0_245 = arith.constant 0 : index
    %c0_246 = arith.constant 0 : index
    %612 = vector.load %arg16[%c0_245, %c0_246] : memref<8x32xf32, #tpu.memory_space<vmem>>, vector<8x32xf32>
    %cst_247 = arith.constant dense<0.000000e+00> : vector<2x32xf32>
    %613 = tpu.matmul %589, %612, %cst_247 {dimension_numbers = #tpu.dot_dimension_numbers<[1], [0], [0], [1], [0, 0, 1, 1], [], []>} : vector<2x8xf32>, vector<8x32xf32>, vector<2x32xf32> -> vector<2x32xf32>
    %614 = arith.addf %611, %613 : vector<2x32xf32>
    %615 = arith.negf %614 : vector<2x32xf32>
    %616 = math.exp %615 : vector<2x32xf32>
    %cst_248 = arith.constant 1.000000e+00 : f32
    %617 = vector.broadcast %cst_248 : f32 to vector<2x32xf32>
    %618 = arith.addf %617, %616 : vector<2x32xf32>
    %619 = arith.divf %617, %618 : vector<2x32xf32>
    %620 = math.tanh %614 : vector<2x32xf32>
    %621 = vector.extract_strided_slice %619 {offsets = [0, 0], sizes = [2, 8], strides = [1, 1]} : vector<2x32xf32> to vector<2x8xf32>
    %622 = vector.extract_strided_slice %619 {offsets = [0, 8], sizes = [2, 8], strides = [1, 1]} : vector<2x32xf32> to vector<2x8xf32>
    %623 = vector.extract_strided_slice %620 {offsets = [0, 16], sizes = [2, 8], strides = [1, 1]} : vector<2x32xf32> to vector<2x8xf32>
    %624 = vector.extract_strided_slice %619 {offsets = [0, 24], sizes = [2, 8], strides = [1, 1]} : vector<2x32xf32> to vector<2x8xf32>
    %625 = arith.mulf %622, %587 : vector<2x8xf32>
    %626 = arith.mulf %621, %623 : vector<2x8xf32>
    %627 = arith.addf %625, %626 : vector<2x8xf32>
    %628 = math.tanh %627 : vector<2x8xf32>
    %629 = arith.mulf %624, %628 : vector<2x8xf32>
    %630 = vector.extract_strided_slice %485 {offsets = [0, 4, 0], sizes = [2, 1, 32], strides = [1, 1, 1]} : vector<2x8x32xf32> to vector<2x1x32xf32>
    %631 = vector.shape_cast %630 : vector<2x1x32xf32> to vector<2x32xf32>
    %c0_249 = arith.constant 0 : index
    %c0_250 = arith.constant 0 : index
    %632 = vector.load %arg19[%c0_249, %c0_250] : memref<8x32xf32, #tpu.memory_space<vmem>>, vector<8x32xf32>
    %cst_251 = arith.constant dense<0.000000e+00> : vector<2x32xf32>
    %633 = tpu.matmul %609, %632, %cst_251 {dimension_numbers = #tpu.dot_dimension_numbers<[1], [0], [0], [1], [0, 0, 1, 1], [], []>} : vector<2x8xf32>, vector<8x32xf32>, vector<2x32xf32> -> vector<2x32xf32>
    %634 = arith.addf %631, %633 : vector<2x32xf32>
    %635 = arith.negf %634 : vector<2x32xf32>
    %636 = math.exp %635 : vector<2x32xf32>
    %cst_252 = arith.constant 1.000000e+00 : f32
    %637 = vector.broadcast %cst_252 : f32 to vector<2x32xf32>
    %638 = arith.addf %637, %636 : vector<2x32xf32>
    %639 = arith.divf %637, %638 : vector<2x32xf32>
    %640 = math.tanh %634 : vector<2x32xf32>
    %641 = vector.extract_strided_slice %639 {offsets = [0, 0], sizes = [2, 8], strides = [1, 1]} : vector<2x32xf32> to vector<2x8xf32>
    %642 = vector.extract_strided_slice %639 {offsets = [0, 8], sizes = [2, 8], strides = [1, 1]} : vector<2x32xf32> to vector<2x8xf32>
    %643 = vector.extract_strided_slice %640 {offsets = [0, 16], sizes = [2, 8], strides = [1, 1]} : vector<2x32xf32> to vector<2x8xf32>
    %644 = vector.extract_strided_slice %639 {offsets = [0, 24], sizes = [2, 8], strides = [1, 1]} : vector<2x32xf32> to vector<2x8xf32>
    %645 = arith.mulf %642, %607 : vector<2x8xf32>
    %646 = arith.mulf %641, %643 : vector<2x8xf32>
    %647 = arith.addf %645, %646 : vector<2x8xf32>
    %648 = math.tanh %647 : vector<2x8xf32>
    %649 = arith.mulf %644, %648 : vector<2x8xf32>
    %650 = vector.extract_strided_slice %479 {offsets = [0, 4, 0], sizes = [2, 1, 32], strides = [1, 1, 1]} : vector<2x8x32xf32> to vector<2x1x32xf32>
    %651 = vector.shape_cast %650 : vector<2x1x32xf32> to vector<2x32xf32>
    %c0_253 = arith.constant 0 : index
    %c0_254 = arith.constant 0 : index
    %652 = vector.load %arg16[%c0_253, %c0_254] : memref<8x32xf32, #tpu.memory_space<vmem>>, vector<8x32xf32>
    %cst_255 = arith.constant dense<0.000000e+00> : vector<2x32xf32>
    %653 = tpu.matmul %629, %652, %cst_255 {dimension_numbers = #tpu.dot_dimension_numbers<[1], [0], [0], [1], [0, 0, 1, 1], [], []>} : vector<2x8xf32>, vector<8x32xf32>, vector<2x32xf32> -> vector<2x32xf32>
    %654 = arith.addf %651, %653 : vector<2x32xf32>
    %655 = arith.negf %654 : vector<2x32xf32>
    %656 = math.exp %655 : vector<2x32xf32>
    %cst_256 = arith.constant 1.000000e+00 : f32
    %657 = vector.broadcast %cst_256 : f32 to vector<2x32xf32>
    %658 = arith.addf %657, %656 : vector<2x32xf32>
    %659 = arith.divf %657, %658 : vector<2x32xf32>
    %660 = math.tanh %654 : vector<2x32xf32>
    %661 = vector.extract_strided_slice %659 {offsets = [0, 0], sizes = [2, 8], strides = [1, 1]} : vector<2x32xf32> to vector<2x8xf32>
    %662 = vector.extract_strided_slice %659 {offsets = [0, 8], sizes = [2, 8], strides = [1, 1]} : vector<2x32xf32> to vector<2x8xf32>
    %663 = vector.extract_strided_slice %660 {offsets = [0, 16], sizes = [2, 8], strides = [1, 1]} : vector<2x32xf32> to vector<2x8xf32>
    %664 = vector.extract_strided_slice %659 {offsets = [0, 24], sizes = [2, 8], strides = [1, 1]} : vector<2x32xf32> to vector<2x8xf32>
    %665 = arith.mulf %662, %627 : vector<2x8xf32>
    %666 = arith.mulf %661, %663 : vector<2x8xf32>
    %667 = arith.addf %665, %666 : vector<2x8xf32>
    %668 = math.tanh %667 : vector<2x8xf32>
    %669 = arith.mulf %664, %668 : vector<2x8xf32>
    %670 = vector.extract_strided_slice %485 {offsets = [0, 3, 0], sizes = [2, 1, 32], strides = [1, 1, 1]} : vector<2x8x32xf32> to vector<2x1x32xf32>
    %671 = vector.shape_cast %670 : vector<2x1x32xf32> to vector<2x32xf32>
    %c0_257 = arith.constant 0 : index
    %c0_258 = arith.constant 0 : index
    %672 = vector.load %arg19[%c0_257, %c0_258] : memref<8x32xf32, #tpu.memory_space<vmem>>, vector<8x32xf32>
    %cst_259 = arith.constant dense<0.000000e+00> : vector<2x32xf32>
    %673 = tpu.matmul %649, %672, %cst_259 {dimension_numbers = #tpu.dot_dimension_numbers<[1], [0], [0], [1], [0, 0, 1, 1], [], []>} : vector<2x8xf32>, vector<8x32xf32>, vector<2x32xf32> -> vector<2x32xf32>
    %674 = arith.addf %671, %673 : vector<2x32xf32>
    %675 = arith.negf %674 : vector<2x32xf32>
    %676 = math.exp %675 : vector<2x32xf32>
    %cst_260 = arith.constant 1.000000e+00 : f32
    %677 = vector.broadcast %cst_260 : f32 to vector<2x32xf32>
    %678 = arith.addf %677, %676 : vector<2x32xf32>
    %679 = arith.divf %677, %678 : vector<2x32xf32>
    %680 = math.tanh %674 : vector<2x32xf32>
    %681 = vector.extract_strided_slice %679 {offsets = [0, 0], sizes = [2, 8], strides = [1, 1]} : vector<2x32xf32> to vector<2x8xf32>
    %682 = vector.extract_strided_slice %679 {offsets = [0, 8], sizes = [2, 8], strides = [1, 1]} : vector<2x32xf32> to vector<2x8xf32>
    %683 = vector.extract_strided_slice %680 {offsets = [0, 16], sizes = [2, 8], strides = [1, 1]} : vector<2x32xf32> to vector<2x8xf32>
    %684 = vector.extract_strided_slice %679 {offsets = [0, 24], sizes = [2, 8], strides = [1, 1]} : vector<2x32xf32> to vector<2x8xf32>
    %685 = arith.mulf %682, %647 : vector<2x8xf32>
    %686 = arith.mulf %681, %683 : vector<2x8xf32>
    %687 = arith.addf %685, %686 : vector<2x8xf32>
    %688 = math.tanh %687 : vector<2x8xf32>
    %689 = arith.mulf %684, %688 : vector<2x8xf32>
    %690 = vector.extract_strided_slice %479 {offsets = [0, 5, 0], sizes = [2, 1, 32], strides = [1, 1, 1]} : vector<2x8x32xf32> to vector<2x1x32xf32>
    %691 = vector.shape_cast %690 : vector<2x1x32xf32> to vector<2x32xf32>
    %c0_261 = arith.constant 0 : index
    %c0_262 = arith.constant 0 : index
    %692 = vector.load %arg16[%c0_261, %c0_262] : memref<8x32xf32, #tpu.memory_space<vmem>>, vector<8x32xf32>
    %cst_263 = arith.constant dense<0.000000e+00> : vector<2x32xf32>
    %693 = tpu.matmul %669, %692, %cst_263 {dimension_numbers = #tpu.dot_dimension_numbers<[1], [0], [0], [1], [0, 0, 1, 1], [], []>} : vector<2x8xf32>, vector<8x32xf32>, vector<2x32xf32> -> vector<2x32xf32>
    %694 = arith.addf %691, %693 : vector<2x32xf32>
    %695 = arith.negf %694 : vector<2x32xf32>
    %696 = math.exp %695 : vector<2x32xf32>
    %cst_264 = arith.constant 1.000000e+00 : f32
    %697 = vector.broadcast %cst_264 : f32 to vector<2x32xf32>
    %698 = arith.addf %697, %696 : vector<2x32xf32>
    %699 = arith.divf %697, %698 : vector<2x32xf32>
    %700 = math.tanh %694 : vector<2x32xf32>
    %701 = vector.extract_strided_slice %699 {offsets = [0, 0], sizes = [2, 8], strides = [1, 1]} : vector<2x32xf32> to vector<2x8xf32>
    %702 = vector.extract_strided_slice %699 {offsets = [0, 8], sizes = [2, 8], strides = [1, 1]} : vector<2x32xf32> to vector<2x8xf32>
    %703 = vector.extract_strided_slice %700 {offsets = [0, 16], sizes = [2, 8], strides = [1, 1]} : vector<2x32xf32> to vector<2x8xf32>
    %704 = vector.extract_strided_slice %699 {offsets = [0, 24], sizes = [2, 8], strides = [1, 1]} : vector<2x32xf32> to vector<2x8xf32>
    %705 = arith.mulf %702, %667 : vector<2x8xf32>
    %706 = arith.mulf %701, %703 : vector<2x8xf32>
    %707 = arith.addf %705, %706 : vector<2x8xf32>
    %708 = math.tanh %707 : vector<2x8xf32>
    %709 = arith.mulf %704, %708 : vector<2x8xf32>
    %710 = vector.extract_strided_slice %485 {offsets = [0, 2, 0], sizes = [2, 1, 32], strides = [1, 1, 1]} : vector<2x8x32xf32> to vector<2x1x32xf32>
    %711 = vector.shape_cast %710 : vector<2x1x32xf32> to vector<2x32xf32>
    %c0_265 = arith.constant 0 : index
    %c0_266 = arith.constant 0 : index
    %712 = vector.load %arg19[%c0_265, %c0_266] : memref<8x32xf32, #tpu.memory_space<vmem>>, vector<8x32xf32>
    %cst_267 = arith.constant dense<0.000000e+00> : vector<2x32xf32>
    %713 = tpu.matmul %689, %712, %cst_267 {dimension_numbers = #tpu.dot_dimension_numbers<[1], [0], [0], [1], [0, 0, 1, 1], [], []>} : vector<2x8xf32>, vector<8x32xf32>, vector<2x32xf32> -> vector<2x32xf32>
    %714 = arith.addf %711, %713 : vector<2x32xf32>
    %715 = arith.negf %714 : vector<2x32xf32>
    %716 = math.exp %715 : vector<2x32xf32>
    %cst_268 = arith.constant 1.000000e+00 : f32
    %717 = vector.broadcast %cst_268 : f32 to vector<2x32xf32>
    %718 = arith.addf %717, %716 : vector<2x32xf32>
    %719 = arith.divf %717, %718 : vector<2x32xf32>
    %720 = math.tanh %714 : vector<2x32xf32>
    %721 = vector.extract_strided_slice %719 {offsets = [0, 0], sizes = [2, 8], strides = [1, 1]} : vector<2x32xf32> to vector<2x8xf32>
    %722 = vector.extract_strided_slice %719 {offsets = [0, 8], sizes = [2, 8], strides = [1, 1]} : vector<2x32xf32> to vector<2x8xf32>
    %723 = vector.extract_strided_slice %720 {offsets = [0, 16], sizes = [2, 8], strides = [1, 1]} : vector<2x32xf32> to vector<2x8xf32>
    %724 = vector.extract_strided_slice %719 {offsets = [0, 24], sizes = [2, 8], strides = [1, 1]} : vector<2x32xf32> to vector<2x8xf32>
    %725 = arith.mulf %722, %687 : vector<2x8xf32>
    %726 = arith.mulf %721, %723 : vector<2x8xf32>
    %727 = arith.addf %725, %726 : vector<2x8xf32>
    %728 = math.tanh %727 : vector<2x8xf32>
    %729 = arith.mulf %724, %728 : vector<2x8xf32>
    %730 = vector.extract_strided_slice %479 {offsets = [0, 6, 0], sizes = [2, 1, 32], strides = [1, 1, 1]} : vector<2x8x32xf32> to vector<2x1x32xf32>
    %731 = vector.shape_cast %730 : vector<2x1x32xf32> to vector<2x32xf32>
    %c0_269 = arith.constant 0 : index
    %c0_270 = arith.constant 0 : index
    %732 = vector.load %arg16[%c0_269, %c0_270] : memref<8x32xf32, #tpu.memory_space<vmem>>, vector<8x32xf32>
    %cst_271 = arith.constant dense<0.000000e+00> : vector<2x32xf32>
    %733 = tpu.matmul %709, %732, %cst_271 {dimension_numbers = #tpu.dot_dimension_numbers<[1], [0], [0], [1], [0, 0, 1, 1], [], []>} : vector<2x8xf32>, vector<8x32xf32>, vector<2x32xf32> -> vector<2x32xf32>
    %734 = arith.addf %731, %733 : vector<2x32xf32>
    %735 = arith.negf %734 : vector<2x32xf32>
    %736 = math.exp %735 : vector<2x32xf32>
    %cst_272 = arith.constant 1.000000e+00 : f32
    %737 = vector.broadcast %cst_272 : f32 to vector<2x32xf32>
    %738 = arith.addf %737, %736 : vector<2x32xf32>
    %739 = arith.divf %737, %738 : vector<2x32xf32>
    %740 = math.tanh %734 : vector<2x32xf32>
    %741 = vector.extract_strided_slice %739 {offsets = [0, 0], sizes = [2, 8], strides = [1, 1]} : vector<2x32xf32> to vector<2x8xf32>
    %742 = vector.extract_strided_slice %739 {offsets = [0, 8], sizes = [2, 8], strides = [1, 1]} : vector<2x32xf32> to vector<2x8xf32>
    %743 = vector.extract_strided_slice %740 {offsets = [0, 16], sizes = [2, 8], strides = [1, 1]} : vector<2x32xf32> to vector<2x8xf32>
    %744 = vector.extract_strided_slice %739 {offsets = [0, 24], sizes = [2, 8], strides = [1, 1]} : vector<2x32xf32> to vector<2x8xf32>
    %745 = arith.mulf %742, %707 : vector<2x8xf32>
    %746 = arith.mulf %741, %743 : vector<2x8xf32>
    %747 = arith.addf %745, %746 : vector<2x8xf32>
    %748 = math.tanh %747 : vector<2x8xf32>
    %749 = arith.mulf %744, %748 : vector<2x8xf32>
    %750 = vector.extract_strided_slice %485 {offsets = [0, 1, 0], sizes = [2, 1, 32], strides = [1, 1, 1]} : vector<2x8x32xf32> to vector<2x1x32xf32>
    %751 = vector.shape_cast %750 : vector<2x1x32xf32> to vector<2x32xf32>
    %c0_273 = arith.constant 0 : index
    %c0_274 = arith.constant 0 : index
    %752 = vector.load %arg19[%c0_273, %c0_274] : memref<8x32xf32, #tpu.memory_space<vmem>>, vector<8x32xf32>
    %cst_275 = arith.constant dense<0.000000e+00> : vector<2x32xf32>
    %753 = tpu.matmul %729, %752, %cst_275 {dimension_numbers = #tpu.dot_dimension_numbers<[1], [0], [0], [1], [0, 0, 1, 1], [], []>} : vector<2x8xf32>, vector<8x32xf32>, vector<2x32xf32> -> vector<2x32xf32>
    %754 = arith.addf %751, %753 : vector<2x32xf32>
    %755 = arith.negf %754 : vector<2x32xf32>
    %756 = math.exp %755 : vector<2x32xf32>
    %cst_276 = arith.constant 1.000000e+00 : f32
    %757 = vector.broadcast %cst_276 : f32 to vector<2x32xf32>
    %758 = arith.addf %757, %756 : vector<2x32xf32>
    %759 = arith.divf %757, %758 : vector<2x32xf32>
    %760 = math.tanh %754 : vector<2x32xf32>
    %761 = vector.extract_strided_slice %759 {offsets = [0, 0], sizes = [2, 8], strides = [1, 1]} : vector<2x32xf32> to vector<2x8xf32>
    %762 = vector.extract_strided_slice %759 {offsets = [0, 8], sizes = [2, 8], strides = [1, 1]} : vector<2x32xf32> to vector<2x8xf32>
    %763 = vector.extract_strided_slice %760 {offsets = [0, 16], sizes = [2, 8], strides = [1, 1]} : vector<2x32xf32> to vector<2x8xf32>
    %764 = vector.extract_strided_slice %759 {offsets = [0, 24], sizes = [2, 8], strides = [1, 1]} : vector<2x32xf32> to vector<2x8xf32>
    %765 = arith.mulf %762, %727 : vector<2x8xf32>
    %766 = arith.mulf %761, %763 : vector<2x8xf32>
    %767 = arith.addf %765, %766 : vector<2x8xf32>
    %768 = math.tanh %767 : vector<2x8xf32>
    %769 = arith.mulf %764, %768 : vector<2x8xf32>
    %770 = vector.extract_strided_slice %479 {offsets = [0, 7, 0], sizes = [2, 1, 32], strides = [1, 1, 1]} : vector<2x8x32xf32> to vector<2x1x32xf32>
    %771 = vector.shape_cast %770 : vector<2x1x32xf32> to vector<2x32xf32>
    %c0_277 = arith.constant 0 : index
    %c0_278 = arith.constant 0 : index
    %772 = vector.load %arg16[%c0_277, %c0_278] : memref<8x32xf32, #tpu.memory_space<vmem>>, vector<8x32xf32>
    %cst_279 = arith.constant dense<0.000000e+00> : vector<2x32xf32>
    %773 = tpu.matmul %749, %772, %cst_279 {dimension_numbers = #tpu.dot_dimension_numbers<[1], [0], [0], [1], [0, 0, 1, 1], [], []>} : vector<2x8xf32>, vector<8x32xf32>, vector<2x32xf32> -> vector<2x32xf32>
    %774 = arith.addf %771, %773 : vector<2x32xf32>
    %775 = arith.negf %774 : vector<2x32xf32>
    %776 = math.exp %775 : vector<2x32xf32>
    %cst_280 = arith.constant 1.000000e+00 : f32
    %777 = vector.broadcast %cst_280 : f32 to vector<2x32xf32>
    %778 = arith.addf %777, %776 : vector<2x32xf32>
    %779 = arith.divf %777, %778 : vector<2x32xf32>
    %780 = math.tanh %774 : vector<2x32xf32>
    %781 = vector.extract_strided_slice %779 {offsets = [0, 0], sizes = [2, 8], strides = [1, 1]} : vector<2x32xf32> to vector<2x8xf32>
    %782 = vector.extract_strided_slice %779 {offsets = [0, 8], sizes = [2, 8], strides = [1, 1]} : vector<2x32xf32> to vector<2x8xf32>
    %783 = vector.extract_strided_slice %780 {offsets = [0, 16], sizes = [2, 8], strides = [1, 1]} : vector<2x32xf32> to vector<2x8xf32>
    %784 = vector.extract_strided_slice %779 {offsets = [0, 24], sizes = [2, 8], strides = [1, 1]} : vector<2x32xf32> to vector<2x8xf32>
    %785 = arith.mulf %782, %747 : vector<2x8xf32>
    %786 = arith.mulf %781, %783 : vector<2x8xf32>
    %787 = arith.addf %785, %786 : vector<2x8xf32>
    %788 = math.tanh %787 : vector<2x8xf32>
    %789 = arith.mulf %784, %788 : vector<2x8xf32>
    %790 = vector.extract_strided_slice %485 {offsets = [0, 0, 0], sizes = [2, 1, 32], strides = [1, 1, 1]} : vector<2x8x32xf32> to vector<2x1x32xf32>
    %791 = vector.shape_cast %790 : vector<2x1x32xf32> to vector<2x32xf32>
    %c0_281 = arith.constant 0 : index
    %c0_282 = arith.constant 0 : index
    %792 = vector.load %arg19[%c0_281, %c0_282] : memref<8x32xf32, #tpu.memory_space<vmem>>, vector<8x32xf32>
    %cst_283 = arith.constant dense<0.000000e+00> : vector<2x32xf32>
    %793 = tpu.matmul %769, %792, %cst_283 {dimension_numbers = #tpu.dot_dimension_numbers<[1], [0], [0], [1], [0, 0, 1, 1], [], []>} : vector<2x8xf32>, vector<8x32xf32>, vector<2x32xf32> -> vector<2x32xf32>
    %794 = arith.addf %791, %793 : vector<2x32xf32>
    %795 = arith.negf %794 : vector<2x32xf32>
    %796 = math.exp %795 : vector<2x32xf32>
    %cst_284 = arith.constant 1.000000e+00 : f32
    %797 = vector.broadcast %cst_284 : f32 to vector<2x32xf32>
    %798 = arith.addf %797, %796 : vector<2x32xf32>
    %799 = arith.divf %797, %798 : vector<2x32xf32>
    %800 = math.tanh %794 : vector<2x32xf32>
    %801 = vector.extract_strided_slice %799 {offsets = [0, 0], sizes = [2, 8], strides = [1, 1]} : vector<2x32xf32> to vector<2x8xf32>
    %802 = vector.extract_strided_slice %799 {offsets = [0, 8], sizes = [2, 8], strides = [1, 1]} : vector<2x32xf32> to vector<2x8xf32>
    %803 = vector.extract_strided_slice %800 {offsets = [0, 16], sizes = [2, 8], strides = [1, 1]} : vector<2x32xf32> to vector<2x8xf32>
    %804 = vector.extract_strided_slice %799 {offsets = [0, 24], sizes = [2, 8], strides = [1, 1]} : vector<2x32xf32> to vector<2x8xf32>
    %805 = arith.mulf %802, %767 : vector<2x8xf32>
    %806 = arith.mulf %801, %803 : vector<2x8xf32>
    %807 = arith.addf %805, %806 : vector<2x8xf32>
    %808 = math.tanh %807 : vector<2x8xf32>
    %809 = arith.mulf %804, %808 : vector<2x8xf32>
    %810 = tpu.concatenate %629, %809 in 1 : vector<2x8xf32>, vector<2x8xf32> -> vector<2x16xf32>
    %811 = tpu.concatenate %789, %649 in 1 : vector<2x8xf32>, vector<2x8xf32> -> vector<2x16xf32>
    %812 = vector.shape_cast %810 : vector<2x16xf32> to vector<2x1x16xf32>
    %c0_285 = arith.constant 0 : index
    %c0_286 = arith.constant 0 : index
    %c0_287 = arith.constant 0 : index
    %813 = vector.load %arg21[%c0_285, %c0_286, %c0_287] : memref<2x2x16xf32, #tpu.memory_space<vmem>>, vector<2x1x16xf32>
    tpu.vector_store %arg21[%c0_285, %c0_286, %c0_287], %812 {strides = array<i32>} : memref<2x2x16xf32, #tpu.memory_space<vmem>>, vector<2x1x16xf32>,
    %814 = vector.shape_cast %811 : vector<2x16xf32> to vector<2x1x16xf32>
    %c0_288 = arith.constant 0 : index
    %c1_289 = arith.constant 1 : index
    %c0_290 = arith.constant 0 : index
    %815 = vector.load %arg21[%c0_288, %c1_289, %c0_290] : memref<2x2x16xf32, #tpu.memory_space<vmem>>, vector<2x1x16xf32>
    tpu.vector_store %arg21[%c0_288, %c1_289, %c0_290], %814 {strides = array<i32>} : memref<2x2x16xf32, #tpu.memory_space<vmem>>, vector<2x1x16xf32>,
    return
  }
  func.func @transform_0(%arg0: i32) -> (i32, i32, i32) {
    %c0_i32 = arith.constant 0 : i32
    %c0_i32_0 = arith.constant 0 : i32
    %c0_i32_1 = arith.constant 0 : i32
    return %arg0, %c0_i32, %c0_i32_0 : i32, i32, i32
  }
  func.func @transform_1(%arg0: i32) -> (i32, i32, i32) {
    %c0_i32 = arith.constant 0 : i32
    %c0_i32_0 = arith.constant 0 : i32
    %c0_i32_1 = arith.constant 0 : i32
    return %arg0, %c0_i32, %c0_i32_0 : i32, i32, i32
  }
  func.func @transform_2(%arg0: i32) -> (i32, i32, i32) {
    %c0_i32 = arith.constant 0 : i32
    %c0_i32_0 = arith.constant 0 : i32
    %c0_i32_1 = arith.constant 0 : i32
    %c0_i32_2 = arith.constant 0 : i32
    return %c0_i32, %c0_i32_0, %c0_i32_1 : i32, i32, i32
  }
  func.func @transform_3(%arg0: i32) -> (i32, i32) {
    %c0_i32 = arith.constant 0 : i32
    %c0_i32_0 = arith.constant 0 : i32
    %c0_i32_1 = arith.constant 0 : i32
    return %c0_i32, %c0_i32_0 : i32, i32
  }
  func.func @transform_4(%arg0: i32) -> (i32, i32, i32) {
    %c0_i32 = arith.constant 0 : i32
    %c0_i32_0 = arith.constant 0 : i32
    %c0_i32_1 = arith.constant 0 : i32
    %c0_i32_2 = arith.constant 0 : i32
    return %c0_i32, %c0_i32_0, %c0_i32_1 : i32, i32, i32
  }
  func.func @transform_5(%arg0: i32) -> (i32, i32) {
    %c0_i32 = arith.constant 0 : i32
    %c0_i32_0 = arith.constant 0 : i32
    %c0_i32_1 = arith.constant 0 : i32
    return %c0_i32, %c0_i32_0 : i32, i32
  }
  func.func @transform_6(%arg0: i32) -> (i32, i32, i32) {
    %c0_i32 = arith.constant 0 : i32
    %c0_i32_0 = arith.constant 0 : i32
    %c0_i32_1 = arith.constant 0 : i32
    %c0_i32_2 = arith.constant 0 : i32
    return %c0_i32, %c0_i32_0, %c0_i32_1 : i32, i32, i32
  }
  func.func @transform_7(%arg0: i32) -> (i32, i32) {
    %c0_i32 = arith.constant 0 : i32
    %c0_i32_0 = arith.constant 0 : i32
    %c0_i32_1 = arith.constant 0 : i32
    return %c0_i32, %c0_i32_0 : i32, i32
  }
  func.func @transform_8(%arg0: i32) -> (i32, i32) {
    %c0_i32 = arith.constant 0 : i32
    %c0_i32_0 = arith.constant 0 : i32
    %c0_i32_1 = arith.constant 0 : i32
    return %c0_i32, %c0_i32_0 : i32, i32
  }
  func.func @transform_9(%arg0: i32) -> (i32, i32) {
    %c0_i32 = arith.constant 0 : i32
    %c0_i32_0 = arith.constant 0 : i32
    %c0_i32_1 = arith.constant 0 : i32
    return %c0_i32, %c0_i32_0 : i32, i32
  }
  func.func @transform_10(%arg0: i32) -> (i32, i32) {
    %c0_i32 = arith.constant 0 : i32
    %c0_i32_0 = arith.constant 0 : i32
    %c0_i32_1 = arith.constant 0 : i32
    return %c0_i32, %c0_i32_0 : i32, i32
  }
  func.func @transform_11(%arg0: i32) -> (i32, i32) {
    %c0_i32 = arith.constant 0 : i32
    %c0_i32_0 = arith.constant 0 : i32
    %c0_i32_1 = arith.constant 0 : i32
    return %c0_i32, %c0_i32_0 : i32, i32
  }
  func.func @transform_12(%arg0: i32) -> (i32, i32) {
    %c0_i32 = arith.constant 0 : i32
    %c0_i32_0 = arith.constant 0 : i32
    %c0_i32_1 = arith.constant 0 : i32
    return %c0_i32, %c0_i32_0 : i32, i32
  }
  func.func @transform_13(%arg0: i32) -> (i32, i32) {
    %c0_i32 = arith.constant 0 : i32
    %c0_i32_0 = arith.constant 0 : i32
    %c0_i32_1 = arith.constant 0 : i32
    return %c0_i32, %c0_i32_0 : i32, i32
  }
  func.func @transform_14(%arg0: i32) -> (i32, i32) {
    %c0_i32 = arith.constant 0 : i32
    %c0_i32_0 = arith.constant 0 : i32
    %c0_i32_1 = arith.constant 0 : i32
    return %c0_i32, %c0_i32_0 : i32, i32
  }
  func.func @transform_15(%arg0: i32) -> (i32, i32) {
    %c0_i32 = arith.constant 0 : i32
    %c0_i32_0 = arith.constant 0 : i32
    %c0_i32_1 = arith.constant 0 : i32
    return %c0_i32, %c0_i32_0 : i32, i32
  }
  func.func @transform_16(%arg0: i32) -> (i32, i32) {
    %c0_i32 = arith.constant 0 : i32
    %c0_i32_0 = arith.constant 0 : i32
    %c0_i32_1 = arith.constant 0 : i32
    return %c0_i32, %c0_i32_0 : i32, i32
  }
  func.func @transform_17(%arg0: i32) -> (i32, i32) {
    %c0_i32 = arith.constant 0 : i32
    %c0_i32_0 = arith.constant 0 : i32
    %c0_i32_1 = arith.constant 0 : i32
    return %c0_i32, %c0_i32_0 : i32, i32
  }
  func.func @transform_18(%arg0: i32) -> (i32, i32) {
    %c0_i32 = arith.constant 0 : i32
    %c0_i32_0 = arith.constant 0 : i32
    %c0_i32_1 = arith.constant 0 : i32
    return %c0_i32, %c0_i32_0 : i32, i32
  }
  func.func @transform_19(%arg0: i32) -> (i32, i32) {
    %c0_i32 = arith.constant 0 : i32
    %c0_i32_0 = arith.constant 0 : i32
    %c0_i32_1 = arith.constant 0 : i32
    return %c0_i32, %c0_i32_0 : i32, i32
  }
  func.func @transform_20(%arg0: i32) -> (i32, i32, i32) {
    %c0_i32 = arith.constant 0 : i32
    %c0_i32_0 = arith.constant 0 : i32
    %c0_i32_1 = arith.constant 0 : i32
    return %arg0, %c0_i32, %c0_i32_0 : i32, i32, i32
  }
}

</mosaic_0001>

<bundles_post_ra>
// kernel: tpu_custom_call.1
= control target key start
LH: loop header
LB: loop body
LE: loop exit
PB: predicated region body
PF: predicated region fallthrough
CT: control target
= control target key end

     0   :  { %s9381_s0 = inlined_call_operand.hbm [shape: f32[2,8,16], index: 0, kind: input, shape index: {}]   ;;  %s9382_s1 = inlined_call_operand.hbm [shape: f32[2,1,16], index: 1, kind: input, shape index: {}]   ;;  %s9383_s2 = inlined_call_operand.hbm [shape: f32[5,32,32], index: 2, kind: input, shape index: {}]   ;;  %s9384_s3 = inlined_call_operand.hbm [shape: f32[1,32], index: 3, kind: input, shape index: {}]   ;;  %s9385_s4 = inlined_call_operand.hbm [shape: f32[5,32,32], index: 4, kind: input, shape index: {}]   ;;  %s9386_s5 = inlined_call_operand.hbm [shape: f32[1,32], index: 5, kind: input, shape index: {}]   ;;  %s9387_s6 = inlined_call_operand.hbm [shape: f32[5,32,32], index: 6, kind: input, shape index: {}]   ;;  %s9388_s7 = inlined_call_operand.hbm [shape: f32[1,32], index: 7, kind: input, shape index: {}]   ;;  %s9389_s8 = inlined_call_operand.hbm [shape: f32[32,32], index: 8, kind: input, shape index: {}]   ;;  %s9390_s9 = inlined_call_operand.vmem [shape: f32[8,32], index: 9, kind: input, shape index: {}]   ;;  %s9391_s10 = inlined_call_operand.hbm [shape: f32[1,32], index: 10, kind: input, shape index: {}]   ;;  %s9392_s11 = inlined_call_operand.hbm [shape: f32[32,32], index: 11, kind: input, shape index: {}]   ;;  %s9393_s12 = inlined_call_operand.hbm [shape: f32[8,32], index: 12, kind: input, shape index: {}]   ;;  %s9394_s13 = inlined_call_operand.hbm [shape: f32[1,32], index: 13, kind: input, shape index: {}]   ;;  %s9395_s14 = inlined_call_operand.vmem [shape: f32[16,32], index: 14, kind: input, shape index: {}]   ;;  %s9396_s15 = inlined_call_operand.hbm [shape: f32[8,32], index: 15, kind: input, shape index: {}]   ;;  %s9397_s16 = inlined_call_operand.hbm [shape: f32[1,32], index: 16, kind: input, shape index: {}]   ;;  %s9398_s17 = inlined_call_operand.hbm [shape: f32[16,32], index: 17, kind: input, shape index: {}]   ;;  %s9399_s18 = inlined_call_operand.vmem [shape: f32[8,32], index: 18, kind: input, shape index: {}]   ;;  %s9400_s19 = inlined_call_operand.vmem [shape: f32[1,32], index: 19, kind: input, shape index: {}]   ;;  %s9401_s20 = inlined_call_operand.hbm [shape: f32[2,2,16], index: 20, kind: output, shape index: {}]  }
   0x1   :  { %9402 = sst [smem:[#allocation40_spill]] %s9381_s0 }
   0x2   :  { %9403 = sst [smem:[#allocation41_spill]] %s9382_s1 }
   0x3   :  { %9404 = sst [smem:[#allocation42_spill]] %s9383_s2 }
   0x4   :  { %9405 = sst [smem:[#allocation43_spill]] %s9384_s3 }
   0x5   :  { %9406 = sst [smem:[#allocation44_spill]] %s9385_s4 }
   0x6   :  { %25 = vsyncpa [#allocation4], 0 }
   0x7   :  { %26 = vsyncpa [#allocation7], 0 }
   0x8   :  { %27 = vsyncpa [#allocation10], 0 }
   0x9   :  { %28 = vsyncpa [#allocation13], 0 }
   0xa   :  { %29 = vsyncpa [#allocation16], 0 }
   0xb   :  { %30 = vsyncpa [#allocation19], 0 }
   0xc   :  { %31 = vsyncpa [#allocation22], 0 }
   0xd   :  { %32 = vsyncpa [#allocation25], 0 }
   0xe   :  { %33 = vsyncpa [#allocation28], 0 }
   0xf   :  { %34 = vsyncpa [#allocation5], 0  ;;  %s8201_s1 = smov [#allocation6]  }
  0x10   :  { %s52_s22 = sshll.u32 %s8201_s1, 4  ;;  %s53_s22 = int_to_ptr.vmem [resolvable:$true] %s52_s22 }
  0x11   :  { %s7849_s23 = scalar_lea.vmem %s53_s22, 32  ;;  %p7854_p1 = scmp.lt.s32.totalorder %s53_s22, %s53_s22 }
  0x12   :  { %p7850_p0 = scmp.ne.s32.totalorder %s53_s22, %s7849_s23  ;;  %p7855_p2 = scmp.lt.s32.totalorder %s7849_s23, %s7849_s23 }
  0x14   :  { %p7856_p3 = por %p7855_p2, %p7854_p1 }
  0x16   :  { %p7857_p4 = pnand %p7856_p3, %p7850_p0 }
  0x18   :  { %7860 = shalt.err (!%p7857_p4)
}
  0x19   :  { %s8202_s24 = smov 16   ;;  %s8203_s2 = smov 1  }
  0x1a   :  { %s9407_s26 = sld [smem:[#allocation41_spill]]  ;;  %s8204_s27 = smov [#allocation9]  }
  0x1b   :  { %s77_s28 = sshll.u32 %s8204_s27, 4  ;;  %s8205_s4 = smov [#allocation12]   ;;  %s78_s28 = int_to_ptr.vmem [resolvable:$true] %s77_s28 }
  0x1c   :  { %s99_s29 = sshll.u32 %s8205_s4, 4  ;;  %s7869_s30 = scalar_lea.vmem %s78_s28, 16  ;;  %s100_s29 = int_to_ptr.vmem [resolvable:$true] %s99_s29 }
  0x1d   :  { %p7870_p5 = scmp.ne.s32.totalorder %s78_s28, %s7869_s30  ;;  %s7873_s0 = scalar_lea.vmem %s78_s28, 32 }
  0x1e   :  { %p7874_p6 = scmp.lt.s32.totalorder %s78_s28, %s78_s28  ;;  %p7875_p7 = scmp.lt.s32.totalorder %s7873_s0, %s7869_s30 }
  0x20   :  { %58 = dma.hbm_to_vmem [thread:$0]  %s9407_s26, 32, %s53_s22, [#allocation7], %s8202_s24, %s8202_s24, %s8203_s2  }
  0x21   :  { %p7876_p8 = por %p7875_p7, %p7874_p6 }
  0x23   :  { %p7877_p9 = pnand %p7876_p8, %p7870_p5 }
  0x25   :  { %7880 = shalt.err (!%p7877_p9)
}
  0x26   :  { %s9408_s23 = sld [smem:[#allocation43_spill]]  ;;  %s7889_s25 = scalar_lea.vmem %s100_s29, 16 }
  0x27   :  { %p7890_p10 = scmp.ne.s32.totalorder %s100_s29, %s7889_s25  ;;  %s7893_s22 = scalar_lea.vmem %s100_s29, 32 }
  0x28   :  { %p7894_p11 = scmp.lt.s32.totalorder %s100_s29, %s100_s29  ;;  %p7895_p12 = scmp.lt.s32.totalorder %s7893_s22, %s7889_s25 }
  0x2a   :  { %p7896_p13 = por %p7895_p12, %p7894_p11 }
  0x2c   :  { %80 = dma.hbm_to_vmem [thread:$0]  %s9408_s23, 16, %s78_s28, [#allocation10]  }
  0x2d   :  { %p7897_p0 = pnand %p7896_p13, %p7890_p10 }
  0x2f   :  { %7900 = shalt.err (!%p7897_p0)
}
  0x30   :  { %102 = dma.hbm_to_vmem [thread:$0]  %s9386_s5, 16, %s100_s29, [#allocation13]  }
  0x31   :  { %s8206_s26 = smov [#allocation15]   ;;  %s8207_s4 = smov [#allocation18]  }
  0x32   :  { %s121_s27 = sshll.u32 %s8206_s26, 4  ;;  %s145_s30 = sshll.u32 %s8207_s4, 4  ;;  %s122_s27 = int_to_ptr.vmem [resolvable:$true] %s121_s27  ;;  %s146_s30 = int_to_ptr.vmem [resolvable:$true] %s145_s30 }
  0x33   :  { %s7909_s0 = scalar_lea.vmem %s122_s27, 16  ;;  %s7913_s28 = scalar_lea.vmem %s122_s27, 32 }
  0x34   :  { %p7910_p1 = scmp.ne.s32.totalorder %s122_s27, %s7909_s0  ;;  %p7914_p2 = scmp.lt.s32.totalorder %s122_s27, %s122_s27 }
  0x35   :  { %p7915_p3 = scmp.lt.s32.totalorder %s7913_s28, %s7909_s0 }
  0x37   :  { %p7916_p4 = por %p7915_p3, %p7914_p2 }
  0x39   :  { %p7917_p5 = pnand %p7916_p4, %p7910_p1 }
  0x3b   :  { %7920 = shalt.err (!%p7917_p5)
}
  0x3c   :  { %124 = dma.hbm_to_vmem [thread:$0]  %s9388_s7, 16, %s122_s27, [#allocation16]  }
  0x3d   :  { %s7929_s23 = scalar_lea.vmem %s146_s30, 16  ;;  %s7933_s5 = scalar_lea.vmem %s146_s30, 32 }
  0x3e   :  { %p7930_p6 = scmp.ne.s32.totalorder %s146_s30, %s7929_s23  ;;  %p7934_p7 = scmp.lt.s32.totalorder %s146_s30, %s146_s30 }
  0x3f   :  { %p7935_p8 = scmp.lt.s32.totalorder %s7933_s5, %s7929_s23 }
  0x41   :  { %p7936_p9 = por %p7935_p8, %p7934_p7 }
  0x43   :  { %p7937_p10 = pnand %p7936_p9, %p7930_p6 }
  0x45   :  { %7940 = shalt.err (!%p7937_p10)
}
  0x46   :  { %148 = dma.hbm_to_vmem [thread:$0]  %s9391_s10, 16, %s146_s30, [#allocation19]  }
  0x47   :  { %s8208_s22 = smov [#allocation21]   ;;  %s8209_s3 = smov [#allocation24]  }
  0x48   :  { %s167_s2 = sshll.u32 %s8208_s22, 4  ;;  %s189_s26 = sshll.u32 %s8209_s3, 4  ;;  %s168_s2 = int_to_ptr.vmem [resolvable:$true] %s167_s2  ;;  %s190_s26 = int_to_ptr.vmem [resolvable:$true] %s189_s26 }
  0x49   :  { %s7949_s4 = scalar_lea.vmem %s168_s2, 128  ;;  %p7954_p12 = scmp.lt.s32.totalorder %s168_s2, %s168_s2 }
  0x4a   :  { %p7950_p11 = scmp.ne.s32.totalorder %s168_s2, %s7949_s4  ;;  %p7955_p13 = scmp.lt.s32.totalorder %s7949_s4, %s7949_s4 }
  0x4c   :  { %p7956_p0 = por %p7955_p13, %p7954_p12 }
  0x4e   :  { %p7957_p1 = pnand %p7956_p0, %p7950_p11 }
  0x50   :  { %7960 = shalt.err (!%p7957_p1)
}
  0x51   :  { %170 = dma.hbm_to_vmem [thread:$0]  %s9393_s12, 128, %s168_s2, [#allocation22]  }
  0x52   :  { %s7969_s0 = scalar_lea.vmem %s190_s26, 128  ;;  %p7974_p3 = scmp.lt.s32.totalorder %s190_s26, %s190_s26 }
  0x53   :  { %p7970_p2 = scmp.ne.s32.totalorder %s190_s26, %s7969_s0  ;;  %p7975_p4 = scmp.lt.s32.totalorder %s7969_s0, %s7969_s0 }
  0x55   :  { %p7976_p5 = por %p7975_p4, %p7974_p3 }
  0x57   :  { %p7977_p6 = pnand %p7976_p5, %p7970_p2 }
  0x59   :  { %7980 = shalt.err (!%p7977_p6)
}
  0x5a   :  { %192 = dma.hbm_to_vmem [thread:$0]  %s9396_s15, 128, %s190_s26, [#allocation25]  }
  0x5b   :  { %s8210_s28 = smov [#allocation3]  }
  0x5c   :  { %s40_s21 = sshll.u32 %s8210_s28, 4  ;;  %s41_s21 = int_to_ptr.vmem [resolvable:$true] %s40_s21 }
  0x5d   :  { %s7989_s1 = scalar_lea.vmem %s41_s21, 256  ;;  %p7994_p8 = scmp.lt.s32.totalorder %s41_s21, %s41_s21 }
  0x5e   :  { %p7990_p7 = scmp.ne.s32.totalorder %s41_s21, %s7989_s1  ;;  %p7995_p9 = scmp.lt.s32.totalorder %s7989_s1, %s7989_s1 }
  0x60   :  { %p7996_p10 = por %p7995_p9, %p7994_p8 }
  0x62   :  { %p7997_p11 = pnand %p7996_p10, %p7990_p7 }
  0x64   :  { %8000 = shalt.err (!%p7997_p11)
}
  0x65   :  { %s8211_s12 = smov 128   ;;  %s8212_s23 = smov 8  }
  0x66   :  { %s9409_s25 = sld [smem:[#allocation40_spill]]  ;;  %s8213_s15 = smov [#allocation8]  }
  0x67   :  { %s64_s22 = sshll.u32 %s8213_s15, 4  ;;  %s8214_s2 = smov [#allocation11]   ;;  %s65_s22 = int_to_ptr.vmem [resolvable:$true] %s64_s22 }
  0x68   :  { %s86_s3 = sshll.u32 %s8214_s2, 4  ;;  %s8009_s26 = scalar_lea.vmem %s65_s22, 2560  ;;  %s87_s3 = int_to_ptr.vmem [resolvable:$true] %s86_s3 }
  0x69   :  { %p8010_p12 = scmp.ne.s32.totalorder %s65_s22, %s8009_s26  ;;  %p8014_p13 = scmp.lt.s32.totalorder %s65_s22, %s65_s22 }
  0x6a   :  { %p8015_p0 = scmp.lt.s32.totalorder %s8009_s26, %s8009_s26 }
  0x6c   :  { %46 = dma.hbm_to_vmem [thread:$0]  %s9409_s25, 256, %s41_s21, [#allocation4], %s8211_s12, %s8211_s12, %s8212_s23  }
  0x6d   :  { %p8016_p1 = por %p8015_p0, %p8014_p13 }
  0x6f   :  { %p8017_p2 = pnand %p8016_p1, %p8010_p12 }
  0x71   :  { %8020 = shalt.err (!%p8017_p2)
}
  0x72   :  { %s9410_s27 = sld [smem:[#allocation42_spill]]  ;;  %s8029_s0 = scalar_lea.vmem %s87_s3, 2560 }
  0x73   :  { %p8030_p3 = scmp.ne.s32.totalorder %s87_s3, %s8029_s0  ;;  %p8034_p4 = scmp.lt.s32.totalorder %s87_s3, %s87_s3 }
  0x74   :  { %p8035_p5 = scmp.lt.s32.totalorder %s8029_s0, %s8029_s0 }
  0x76   :  { %p8036_p6 = por %p8035_p5, %p8034_p4 }
  0x78   :  { %70 = dma.hbm_to_vmem [thread:$0]  %s9410_s27, 2560, %s65_s22, [#allocation7], %s8211_s12, %s8211_s12, %s8212_s23  }
  0x79   :  { %p8037_p7 = pnand %p8036_p6, %p8030_p3 }
  0x7b   :  { %8040 = shalt.err (!%p8037_p7)
}
  0x7c   :  { %s9411_s28 = sld [smem:[#allocation44_spill]]  ;;  %s8215_s21 = smov [#allocation14]  }
  0x7d   :  { %s108_s1 = sshll.u32 %s8215_s21, 4  ;;  %s8216_s5 = smov [#allocation17]   ;;  %s109_s1 = int_to_ptr.vmem [resolvable:$true] %s108_s1 }
  0x7e   :  { %s130_s29 = sshll.u32 %s8216_s5, 4  ;;  %s8049_s25 = scalar_lea.vmem %s109_s1, 2560  ;;  %s131_s29 = int_to_ptr.vmem [resolvable:$true] %s130_s29 }
  0x7f   :  { %p8050_p8 = scmp.ne.s32.totalorder %s109_s1, %s8049_s25  ;;  %p8054_p9 = scmp.lt.s32.totalorder %s109_s1, %s109_s1 }
  0x80   :  { %p8055_p10 = scmp.lt.s32.totalorder %s8049_s25, %s8049_s25 }
  0x82   :  { %92 = dma.hbm_to_vmem [thread:$0]  %s9411_s28, 2560, %s87_s3, [#allocation10], %s8211_s12, %s8211_s12, %s8212_s23  }
  0x83   :  { %p8056_p11 = por %p8055_p10, %p8054_p9 }
  0x85   :  { %p8057_p12 = pnand %p8056_p11, %p8050_p8 }
  0x87   :  { %8060 = shalt.err (!%p8057_p12)
}
  0x88   :  { %114 = dma.hbm_to_vmem [thread:$0]  %s9387_s6, 2560, %s109_s1, [#allocation13], %s8211_s12, %s8211_s12, %s8212_s23  }
  0x89   :  { %s8069_s2 = scalar_lea.vmem %s131_s29, 512  ;;  %p8074_p0 = scmp.lt.s32.totalorder %s131_s29, %s131_s29 }
  0x8a   :  { %p8070_p13 = scmp.ne.s32.totalorder %s131_s29, %s8069_s2  ;;  %p8075_p1 = scmp.lt.s32.totalorder %s8069_s2, %s8069_s2 }
  0x8c   :  { %p8076_p2 = por %p8075_p1, %p8074_p0 }
  0x8e   :  { %p8077_p3 = pnand %p8076_p2, %p8070_p13 }
  0x90   :  { %8080 = shalt.err (!%p8077_p3)
}
  0x91   :  { %136 = dma.hbm_to_vmem [thread:$0]  %s9389_s8, 512, %s131_s29, [#allocation16], %s8211_s12, %s8211_s12, %s8212_s23  }
  0x92   :  { %s8217_s4 = smov [#allocation20]   ;;  %s8218_s27 = smov [#allocation23]  }
  0x93   :  { %s154_s7 = sshll.u32 %s8217_s4, 4  ;;  %s177_s0 = sshll.u32 %s8218_s27, 4  ;;  %s155_s7 = int_to_ptr.vmem [resolvable:$true] %s154_s7  ;;  %s178_s0 = int_to_ptr.vmem [resolvable:$true] %s177_s0 }
  0x94   :  { %s8089_s6 = scalar_lea.vmem %s155_s7, 512  ;;  %p8094_p5 = scmp.lt.s32.totalorder %s155_s7, %s155_s7 }
  0x95   :  { %p8090_p4 = scmp.ne.s32.totalorder %s155_s7, %s8089_s6  ;;  %p8095_p6 = scmp.lt.s32.totalorder %s8089_s6, %s8089_s6 }
  0x97   :  { %p8096_p7 = por %p8095_p6, %p8094_p5 }
  0x99   :  { %p8097_p8 = pnand %p8096_p7, %p8090_p4 }
  0x9b   :  { %8100 = shalt.err (!%p8097_p8)
}
  0x9c   :  { %160 = dma.hbm_to_vmem [thread:$0]  %s9392_s11, 512, %s155_s7, [#allocation19], %s8211_s12, %s8211_s12, %s8212_s23  }
  0x9d   :  { %s8109_s8 = scalar_lea.vmem %s178_s0, 16  ;;  %s8113_s28 = scalar_lea.vmem %s178_s0, 32 }
  0x9e   :  { %p8110_p9 = scmp.ne.s32.totalorder %s178_s0, %s8109_s8  ;;  %p8114_p10 = scmp.lt.s32.totalorder %s178_s0, %s178_s0 }
  0x9f   :  { %p8115_p11 = scmp.lt.s32.totalorder %s8113_s28, %s8109_s8 }
  0xa1   :  { %p8116_p12 = por %p8115_p11, %p8114_p10 }
  0xa3   :  { %p8117_p13 = pnand %p8116_p12, %p8110_p9 }
  0xa5   :  { %8120 = shalt.err (!%p8117_p13)
}
  0xa6   :  { %180 = dma.hbm_to_vmem [thread:$0]  %s9394_s13, 16, %s178_s0, [#allocation22]  }
  0xa7   :  { %s8219_s5 = smov [#allocation26]   ;;  %s8220_s25 = smov [#allocation27]  }
  0xa8   :  { %s199_s29 = sshll.u32 %s8219_s5, 4  ;;  %s208_s15 = sshll.u32 %s8220_s25, 4  ;;  %s200_s29 = int_to_ptr.vmem [resolvable:$true] %s199_s29  ;;  %s209_s15 = int_to_ptr.vmem [resolvable:$true] %s208_s15 }
  0xa9   :  { %s8129_s22 = scalar_lea.vmem %s200_s29, 16  ;;  %s8133_s11 = scalar_lea.vmem %s200_s29, 32 }
  0xaa   :  { %p8130_p0 = scmp.ne.s32.totalorder %s200_s29, %s8129_s22  ;;  %p8134_p1 = scmp.lt.s32.totalorder %s200_s29, %s200_s29 }
  0xab   :  { %p8135_p2 = scmp.lt.s32.totalorder %s8133_s11, %s8129_s22 }
  0xad   :  { %p8136_p3 = por %p8135_p2, %p8134_p1 }
  0xaf   :  { %p8137_p4 = pnand %p8136_p3, %p8130_p0 }
  0xb1   :  { %8140 = shalt.err (!%p8137_p4)
}
  0xb2   :  { %202 = dma.hbm_to_vmem [thread:$0]  %s9397_s16, 16, %s200_s29, [#allocation25]  }
  0xb3   :  { %s8149_s26 = scalar_lea.vmem %s209_s15, 256  ;;  %p8154_p6 = scmp.lt.s32.totalorder %s209_s15, %s209_s15 }
  0xb4   :  { %p8150_p5 = scmp.ne.s32.totalorder %s209_s15, %s8149_s26  ;;  %p8155_p7 = scmp.lt.s32.totalorder %s8149_s26, %s8149_s26 }
  0xb6   :  { %p8156_p8 = por %p8155_p7, %p8154_p6 }
  0xb8   :  { %p8157_p9 = pnand %p8156_p8, %p8150_p5 }
  0xba   :  { %8160 = shalt.err (!%p8157_p9)
}
  0xbb   :  { %214 = dma.hbm_to_vmem [thread:$0]  %s9398_s17, 256, %s209_s15, [#allocation28], %s8211_s12, %s8211_s12, %s8212_s23  }
  0xbc   :  { %8181 = dma.done.wait [#allocation4], 256  }
  0xbd   :  { %8182 = vsyncadd [#allocation4], 4294967040 }
  0xbe   :  { %8183 = dma.done.wait [#allocation7], 2592  }
  0xbf   :  { %8184 = vsyncadd [#allocation7], 4294964704 }
  0xc0   :  { %8185 = dma.done.wait [#allocation10], 2576  }
  0xc1   :  { %8186 = vsyncadd [#allocation10], 4294964720 }
  0xc2   :  { %8187 = dma.done.wait [#allocation13], 2576  }
  0xc3   :  { %8188 = vsyncadd [#allocation13], 4294964720 }
  0xc4   :  { %8189 = dma.done.wait [#allocation16], 528  }
  0xc5   :  { %8190 = vsyncadd [#allocation16], 4294966768 }
  0xc6   :  { %8191 = dma.done.wait [#allocation19], 528  }
  0xc7   :  { %8192 = vsyncadd [#allocation19], 4294966768 }
  0xc8   :  { %8193 = dma.done.wait [#allocation22], 144  }
  0xc9   :  { %8194 = vsyncadd [#allocation22], 4294967152 }
  0xca   :  { %8195 = dma.done.wait [#allocation25], 144  }
  0xcb   :  { %8196 = vsyncadd [#allocation25], 4294967152 }
  0xcc   :  { %8197 = dma.done.wait [#allocation28], 256  }
  0xcd   :  { %8198 = vsyncadd [#allocation28], 4294967040  ;;  %vm267_vm0 = vcmask 254976   ;;  %v8221_v0 = vmov 0.0   ;;  %v6623_v1 = vld [vmem:[#allocation6] ss:$0 sm:$0xff] }
  0xce   :  { %268 = vst.msk [vmem:[#allocation2] sm:$0x3] %vm267_vm0, %v8221_v0  ;;  %269 = vst.msk [vmem:[#allocation2 + $0x10] sm:$0x3] %vm267_vm0, %v8221_v0  ;;  %286 = vrot.lane.b32.xlu0 %v6623_v1, %s8202_s24  ;;  %v310_v2 = vld [vmem:[#allocation8 + $0x38] sm:$0xff]  ;;  %v309_v5 = vld [vmem:[#allocation8 + $0x30] sm:$0xff] }
  0xcf   :  { %270 = vst.msk [vmem:[#allocation2 + $0xa] sm:$0x3] %vm267_vm0, %v8221_v0  ;;  %271 = vst.msk [vmem:[#allocation2 + $0x1a] sm:$0x3] %vm267_vm0, %v8221_v0  ;;  %v303_v3 = vld [vmem:[#allocation8 + $0x18] sm:$0xff]  ;;  %6936 = vmatprep.subr.mxu0 %v310_v2  ;;  %v302_v6 = vld [vmem:[#allocation8 + $0x10] sm:$0xff] }
  0xd0   :  { %v6624_v4 = vld [vmem:[#allocation6 + $0x1] ss:$0 sm:$0xff]  ;;  %6947 = vmatprep.subr.mxu1 %v303_v3  ;;  %6937 = vmatpush3.msra.mxu0 %v310_v2  ;;  %v308_v7 = vld [vmem:[#allocation8 + $0x28] sm:$0xff]  ;;  %v307_v9 = vld [vmem:[#allocation8 + $0x20] sm:$0xff]  ;;  %vm292_vm1 = vcmask 130048   ;;  %vm295_vm2 = vcmask 261120  }
  0xd1   :  { %6948 = vmatpush3.msra.mxu1 %v303_v3  ;;  %6938 = vmatprep.subr.mxu0 %v309_v5  ;;  %v301_v8 = vld [vmem:[#allocation8 + $0x8] sm:$0xff]  ;;  %v300_v10 = vld [vmem:[#allocation8] sm:$0xff]  ;;  %v479_v11 = vld [vmem:[#allocation8 + $0x58] sm:$0xff]  ;;  %vm8222_vm3 = vmmov 0   ;;  %s8223_s12 = smov 112   ;;  %vm2106_vm4 = vcmask 1041409  }
  0xd2   :  { %6949 = vmatprep.subr.mxu1 %v302_v6  ;;  %288 = vrot.lane.b32.xlu0 %v6624_v4, %s8202_s24  ;;  %v569_v12 = vld [vmem:[#allocation8 + $0x78] sm:$0xff]  ;;  %v272_v13 = vld [vmem:[#allocation3] sm:$0xff]  ;;  %v476_v29 = vld [vmem:[#allocation8 + $0x40] sm:$0xff]  ;;  %s8224_s7 = smov 104   ;;  %vm1849_vm5 = vcmask 64512   ;;  %vm4058_vm6 = vcmask 1040384  }
  0xd3   :  { %6939 = vmatpush3.msra.mxu0 %v309_v5  ;;  %6950 = vmatpush3.msra.mxu1 %v302_v6  ;;  %v273_v16 = vld [vmem:[#allocation3 + $0x8] sm:$0xff]  ;;  %v477_v27 = vld [vmem:[#allocation8 + $0x48] sm:$0xff]  ;;  %v566_v30 = vld [vmem:[#allocation8 + $0x60] sm:$0xff]  ;;  %vm4061_vm7 = vcmask 1041408   ;;  %vm4064_vm8 = vcmask 1042432   ;;  %vm4067_vm9 = vcmask 1043456  }
  0xd4   :  { %6940 = vmatprep.subr.mxu0 %v308_v7  ;;  %6951 = vmatprep.subr.mxu1 %v301_v8  ;;  %v478_v23 = vld [vmem:[#allocation8 + $0x50] sm:$0xff]  ;;  %v567_v28 = vld [vmem:[#allocation8 + $0x68] sm:$0xff]  ;;  %v659_v31 = vld [vmem:[#allocation8 + $0x98] sm:$0xff]  ;;  %vm4070_vm10 = vcmask 1044480   ;;  %vm4073_vm11 = vcmask 1045504   ;;  %vm4076_vm12 = vcmask 1046528  }
  0xd5   :  { %6941 = vmatpush3.msra.mxu0 %v308_v7  ;;  %6952 = vmatpush3.msra.mxu1 %v301_v8  ;;  %v568_v24 = vld [vmem:[#allocation8 + $0x70] sm:$0xff]  ;;  %v657_v36 = vld [vmem:[#allocation8 + $0x88] sm:$0xff]  ;;  %v656_v37 = vld [vmem:[#allocation8 + $0x80] sm:$0xff]  ;;  %vm6491_vm13 = vcmask 1044484   ;;  %vm6558_vm14 = vcmask 122880  }
  0xd6   :  { %6942 = vmatprep.subr.mxu0 %v307_v9  ;;  %6953 = vmatprep.subr.mxu1 %v300_v10  ;;  %v658_v35 = vld [vmem:[#allocation8 + $0x90] sm:$0xff]  ;;  %v768_v39 = vld [vmem:[#allocation11 + $0x38] sm:$0xff]  ;;  %v765_v45 = vld [vmem:[#allocation11 + $0x20] sm:$0xff] }
  0xd7   :  { %6943 = vmatpush3.msra.mxu0 %v307_v9  ;;  %6954 = vmatpush3.msra.mxu1 %v300_v10  ;;  %v761_v40 = vld [vmem:[#allocation11 + $0x18] sm:$0xff]  ;;  %v767_v41 = vld [vmem:[#allocation11 + $0x30] sm:$0xff]  ;;  %v766_v43 = vld [vmem:[#allocation11 + $0x28] sm:$0xff] }
  0xd8   :  { %6958 = vmatprep.subr.mxu0 %v479_v11  ;;  %6969 = vmatprep.subr.mxu1 %v569_v12  ;;  %v760_v42 = vld [vmem:[#allocation11 + $0x10] sm:$0xff]  ;;  %v759_v44 = vld [vmem:[#allocation11 + $0x8] sm:$0xff]  ;;  %v758_v46 = vld [vmem:[#allocation11] sm:$0xff] }
  0xd9   :  { %v937_v47 = vld [vmem:[#allocation11 + $0x58] sm:$0xff] }
  0xda   :  { %v1027_v48 = vld [vmem:[#allocation11 + $0x78] sm:$0xff] }
  0xdb   :  { %v6635_v63 = vld [vmem:[#allocation9] ss:$0 sm:$0xff] }
 0x140   :  { %v287_v14 = vpop.permute.xlu0 %286 }
 0x141   :  { %v293_v15 = vsel %vm292_vm1, %v272_v13, %v287_v14  ;;  %v936_v13 = vld [vmem:[#allocation11 + $0x50] sm:$0xff] }
 0x142   :  { %296 = vst.msk [vmem:[#allocation2 + $0x2] sm:$0xff] %vm295_vm2, %v293_v15  ;;  %v1026_v14 = vld [vmem:[#allocation11 + $0x70] sm:$0xff] }
 0x144   :  { %v289_v17 = vpop.permute.xlu0 %288 }
 0x145   :  { %v294_v18 = vsel %vm292_vm1, %v273_v16, %v289_v17  ;;  %v935_v17 = vld [vmem:[#allocation11 + $0x48] sm:$0xff] }
 0x146   :  { %297 = vst.msk [vmem:[#allocation2 + $0x12] sm:$0xff] %vm295_vm2, %v294_v18  ;;  %v1025_v18 = vld [vmem:[#allocation11 + $0x68] sm:$0xff] }
 0x149   :  { %v304_v19 = vld [vmem:[#allocation2 + $0x1] sm:$0xff] }
 0x14a   :  { %v298_v20 = vld [vmem:[#allocation2] sm:$0xff]  ;;  %6944 = vmatprep.mubr.msk.f32.mxu0 %vm295_vm2, %v304_v19  ;;  %v934_v19 = vld [vmem:[#allocation11 + $0x40] sm:$0xff] }
 0x14b   :  { %6955 = vmatprep.mubr.msk.f32.mxu1 %vm295_vm2, %v298_v20  ;;  %v473_v25 = vld [vmem:[#allocation2 + $0x2] sm:$0xff]  ;;  %v1024_v20 = vld [vmem:[#allocation11 + $0x60] sm:$0xff] }
 0x14c   :  { %v563_v26 = vld [vmem:[#allocation2 + $0x3] sm:$0xff] }
 0x14d   :  { %v305_v21 = vld [vmem:[#allocation2 + $0x11] sm:$0xff]  ;;  %v653_v34 = vld [vmem:[#allocation2 + $0x4] sm:$0xff] }
 0x14e   :  { %v299_v22 = vld [vmem:[#allocation2 + $0x10] sm:$0xff]  ;;  %6945 = vmatmul.mubr.msk.f32.vlgmr.msra.gmra.mxu0 %vm295_vm2, %v305_v21 }
 0x14f   :  { %6956 = vmatmul.mubr.msk.f32.vlgmr.msra.gmra.mxu1 %vm295_vm2, %v299_v22  ;;  %6959 = vmatpush3.msra.mxu0 %v479_v11  ;;  %v474_v32 = vld [vmem:[#allocation2 + $0x12] sm:$0xff] }
 0x150   :  { %6970 = vmatpush3.msra.mxu1 %v569_v12  ;;  %6960 = vmatprep.subr.mxu0 %v478_v23  ;;  %v564_v33 = vld [vmem:[#allocation2 + $0x13] sm:$0xff] }
 0x151   :  { %6966 = vmatprep.mubr.msk.f32.mxu0 %vm295_vm2, %v473_v25  ;;  %6971 = vmatprep.subr.mxu1 %v568_v24  ;;  %v654_v38 = vld [vmem:[#allocation2 + $0x14] sm:$0xff]  ;;  %v1117_v21 = vld [vmem:[#allocation11 + $0x98] sm:$0xff]  ;;  %v1116_v25 = vld [vmem:[#allocation11 + $0x90] sm:$0xff] }
 0x152   :  { %6977 = vmatprep.mubr.msk.f32.mxu1 %vm295_vm2, %v563_v26  ;;  %6961 = vmatpush3.msra.mxu0 %v478_v23  ;;  %v1115_v26 = vld [vmem:[#allocation11 + $0x88] sm:$0xff] }
 0x153   :  { %6972 = vmatpush3.msra.mxu1 %v568_v24  ;;  %6962 = vmatprep.subr.mxu0 %v477_v27 }
 0x154   :  { %6973 = vmatprep.subr.mxu1 %v567_v28  ;;  %6963 = vmatpush3.msra.mxu0 %v477_v27  ;;  %v1114_v27 = vld [vmem:[#allocation11 + $0x80] sm:$0xff] }
 0x155   :  { %6974 = vmatpush3.msra.mxu1 %v567_v28  ;;  %6964 = vmatprep.subr.mxu0 %v476_v29 }
 0x156   :  { %6975 = vmatprep.subr.mxu1 %v566_v30  ;;  %6965 = vmatpush3.msra.mxu0 %v476_v29  ;;  %v1226_v29 = vld [vmem:[#allocation14 + $0x38] sm:$0xff] }
 0x157   :  { %6976 = vmatpush3.msra.mxu1 %v566_v30  ;;  %6967 = vmatmul.mubr.msk.f32.vlgmr.msra.gmra.mxu0 %vm295_vm2, %v474_v32  ;;  %v1219_v30 = vld [vmem:[#allocation14 + $0x18] sm:$0xff]  ;;  %v1218_v32 = vld [vmem:[#allocation14 + $0x10] sm:$0xff] }
 0x158   :  { %6978 = vmatmul.mubr.msk.f32.vlgmr.msra.gmra.mxu1 %vm295_vm2, %v564_v33  ;;  %6980 = vmatprep.subr.mxu0 %v659_v31  ;;  %v1224_v33 = vld [vmem:[#allocation14 + $0x28] sm:$0xff] }
 0x159   :  { %6988 = vmatprep.mubr.msk.f32.mxu0 %vm295_vm2, %v653_v34  ;;  %6981 = vmatpush3.msra.mxu0 %v659_v31  ;;  %v1225_v31 = vld [vmem:[#allocation14 + $0x30] sm:$0xff]  ;;  %v1217_v34 = vld [vmem:[#allocation14 + $0x8] sm:$0xff] }
 0x15a   :  { %6982 = vmatprep.subr.mxu0 %v658_v35  ;;  %6991 = vmatprep.subr.mxu1 %v768_v39 }
 0x15b   :  { %6983 = vmatpush3.msra.mxu0 %v658_v35  ;;  %6992 = vmatpush3.msra.mxu1 %v768_v39  ;;  %v1223_v35 = vld [vmem:[#allocation14 + $0x20] sm:$0xff] }
 0x15c   :  { %6984 = vmatprep.subr.mxu0 %v657_v36  ;;  %6993 = vmatprep.subr.mxu1 %v767_v41 }
 0x15d   :  { %6985 = vmatpush3.msra.mxu0 %v657_v36  ;;  %6994 = vmatpush3.msra.mxu1 %v767_v41  ;;  %v1216_v36 = vld [vmem:[#allocation14] sm:$0xff] }
 0x15e   :  { %6986 = vmatprep.subr.mxu0 %v656_v37  ;;  %6995 = vmatprep.subr.mxu1 %v766_v43 }
 0x15f   :  { %6987 = vmatpush3.msra.mxu0 %v656_v37  ;;  %6996 = vmatpush3.msra.mxu1 %v766_v43  ;;  %v1395_v37 = vld [vmem:[#allocation14 + $0x58] sm:$0xff] }
 0x160   :  { %6989 = vmatmul.mubr.msk.f32.vlgmr.msra.gmra.mxu0 %vm295_vm2, %v654_v38  ;;  %7002 = vmatprep.subr.mxu0 %v761_v40  ;;  %v1485_v38 = vld [vmem:[#allocation14 + $0x78] sm:$0xff] }
 0x161   :  { %7003 = vmatpush3.msra.mxu0 %v761_v40  ;;  %6997 = vmatprep.subr.mxu1 %v765_v45 }
 0x162   :  { %7004 = vmatprep.subr.mxu0 %v760_v42  ;;  %6998 = vmatpush3.msra.mxu1 %v765_v45 }
 0x163   :  { %7005 = vmatpush3.msra.mxu0 %v760_v42  ;;  %7013 = vmatprep.subr.mxu1 %v937_v47 }
 0x164   :  { %7006 = vmatprep.subr.mxu0 %v759_v44 }
 0x165   :  { %7007 = vmatpush3.msra.mxu0 %v759_v44 }
 0x166   :  { %7008 = vmatprep.subr.mxu0 %v758_v46 }
 0x167   :  { %7009 = vmatpush3.msra.mxu0 %v758_v46 }
 0x168   :  { %7024 = vmatprep.subr.mxu0 %v1027_v48 }
 0x20e   :  { %v6946_v49 = vpop.f32.mrf.mxu0 }
 0x20f   :  { %v6957_v50 = vpop.f32.mrf.mxu1 }
 0x210   :  { %v383_v51 = vpop.f32.mrf.mxu0  ;;  %v470_v54 = vadd.f32 %v6957_v50, %v6946_v49 }
 0x211   :  { %v464_v53 = vpop.f32.mrf.mxu1 }
 0x212   :  { %v465_v56 = vadd.f32 %v464_v53, %v383_v51  ;;  %v6646_v53 = vld [vmem:[#allocation12] ss:$0 sm:$0xff] }
 0x217   :  { %v6968_v52 = vpop.f32.mrf.mxu0 }
 0x218   :  { %v562_v57 = vadd.f32 %v6968_v52, %v470_v54  ;;  %v6979_v58 = vpop.f32.mrf.mxu1 }
 0x219   :  { %v552_v55 = vpop.f32.mrf.mxu0 }
 0x21a   :  { %v561_v59 = vadd.f32 %v552_v55, %v465_v56  ;;  %v652_v60 = vadd.f32 %v6979_v58, %v562_v57  ;;  %v642_v61 = vpop.f32.mrf.mxu1 }
 0x21c   :  { %v651_v1 = vadd.f32 %v642_v61, %v561_v59 }
 0x220   :  { %v6990_v62 = vpop.f32.mrf.mxu0 }
 0x221   :  { %v742_v2 = vadd.f32 %v6990_v62, %v652_v60 }
 0x222   :  { %v732_v3 = vpop.f32.mrf.mxu0 }
 0x223   :  { %v751_v4 = vadd.f32 %v6635_v63, %v742_v2  ;;  %v741_v5 = vadd.f32 %v732_v3, %v651_v1  ;;  %v1394_v3 = vld [vmem:[#allocation14 + $0x50] sm:$0xff] }
 0x225   :  { %v753_v6 = vmax.f32 %v751_v4, 0.0  ;;  %v750_v7 = vadd.f32 %v6635_v63, %v741_v5  ;;  %v1484_v4 = vld [vmem:[#allocation14 + $0x70] sm:$0xff] }
 0x227   :  { %755 = vst.msk [vmem:[#allocation2 + $0x12] sm:$0xff] %vm295_vm2, %v753_v6  ;;  %v752_v8 = vmax.f32 %v750_v7, 0.0  ;;  %v1393_v7 = vld [vmem:[#allocation14 + $0x48] sm:$0xff] }
 0x229   :  { %754 = vst.msk [vmem:[#allocation2 + $0x2] sm:$0xff] %vm295_vm2, %v752_v8  ;;  %v1483_v8 = vld [vmem:[#allocation14 + $0x68] sm:$0xff] }
 0x22e   :  { %v763_v11 = vld [vmem:[#allocation2 + $0x11] sm:$0xff] }
 0x22f   :  { %v757_v12 = vld [vmem:[#allocation2 + $0x10] sm:$0xff] }
 0x230   :  { %v762_v9 = vld [vmem:[#allocation2 + $0x1] sm:$0xff]  ;;  %v932_v22 = vld [vmem:[#allocation2 + $0x12] sm:$0xff] }
 0x231   :  { %v756_v10 = vld [vmem:[#allocation2] sm:$0xff]  ;;  %6999 = vmatprep.mubr.msk.f32.mxu1 %vm295_vm2, %v762_v9  ;;  %v1022_v23 = vld [vmem:[#allocation2 + $0x13] sm:$0xff] }
 0x232   :  { %7010 = vmatprep.mubr.msk.f32.mxu0 %vm295_vm2, %v756_v10  ;;  %7000 = vmatmul.mubr.msk.f32.vlgmr.msra.gmra.mxu1 %vm295_vm2, %v763_v11  ;;  %v931_v15 = vld [vmem:[#allocation2 + $0x2] sm:$0xff]  ;;  %v1112_v28 = vld [vmem:[#allocation2 + $0x14] sm:$0xff] }
 0x233   :  { %7011 = vmatmul.mubr.msk.f32.vlgmr.msra.gmra.mxu0 %vm295_vm2, %v757_v12  ;;  %7014 = vmatpush3.msra.mxu1 %v937_v47  ;;  %v1021_v16 = vld [vmem:[#allocation2 + $0x3] sm:$0xff]  ;;  %v1392_v9 = vld [vmem:[#allocation14 + $0x40] sm:$0xff]  ;;  %v1575_v11 = vld [vmem:[#allocation14 + $0x98] sm:$0xff] }
 0x234   :  { %7025 = vmatpush3.msra.mxu0 %v1027_v48  ;;  %7015 = vmatprep.subr.mxu1 %v936_v13  ;;  %v1111_v24 = vld [vmem:[#allocation2 + $0x4] sm:$0xff]  ;;  %v1482_v10 = vld [vmem:[#allocation14 + $0x60] sm:$0xff] }
 0x235   :  { %7021 = vmatprep.mubr.msk.f32.mxu1 %vm295_vm2, %v931_v15  ;;  %7026 = vmatprep.subr.mxu0 %v1026_v14  ;;  %v1574_v15 = vld [vmem:[#allocation14 + $0x90] sm:$0xff] }
 0x236   :  { %7032 = vmatprep.mubr.msk.f32.mxu0 %vm295_vm2, %v1021_v16  ;;  %7016 = vmatpush3.msra.mxu1 %v936_v13  ;;  %v1573_v16 = vld [vmem:[#allocation14 + $0x88] sm:$0xff] }
 0x237   :  { %7027 = vmatpush3.msra.mxu0 %v1026_v14  ;;  %7017 = vmatprep.subr.mxu1 %v935_v17 }
 0x238   :  { %7028 = vmatprep.subr.mxu0 %v1025_v18  ;;  %7018 = vmatpush3.msra.mxu1 %v935_v17  ;;  %v1572_v17 = vld [vmem:[#allocation14 + $0x80] sm:$0xff] }
 0x239   :  { %7029 = vmatpush3.msra.mxu0 %v1025_v18  ;;  %7019 = vmatprep.subr.mxu1 %v934_v19 }
 0x23a   :  { %7030 = vmatprep.subr.mxu0 %v1024_v20  ;;  %7020 = vmatpush3.msra.mxu1 %v934_v19  ;;  %v1673_v19 = vld [vmem:[#allocation17 + $0x18] sm:$0xff] }
 0x23b   :  { %7031 = vmatpush3.msra.mxu0 %v1024_v20  ;;  %7022 = vmatmul.mubr.msk.f32.vlgmr.msra.gmra.mxu1 %vm295_vm2, %v932_v22  ;;  %v1765_v20 = vld [vmem:[#allocation20 + $0x18] sm:$0xff]  ;;  %v1764_v22 = vld [vmem:[#allocation20 + $0x10] sm:$0xff] }
 0x23c   :  { %7033 = vmatmul.mubr.msk.f32.vlgmr.msra.gmra.mxu0 %vm295_vm2, %v1022_v23  ;;  %7035 = vmatprep.subr.mxu1 %v1117_v21  ;;  %v1671_v23 = vld [vmem:[#allocation17 + $0x8] sm:$0xff] }
 0x23d   :  { %7043 = vmatprep.mubr.msk.f32.mxu1 %vm295_vm2, %v1111_v24  ;;  %7036 = vmatpush3.msra.mxu1 %v1117_v21  ;;  %v1672_v21 = vld [vmem:[#allocation17 + $0x10] sm:$0xff] }
 0x23e   :  { %7037 = vmatprep.subr.mxu1 %v1116_v25  ;;  %7046 = vmatprep.subr.mxu0 %v1226_v29  ;;  %v1763_v24 = vld [vmem:[#allocation20 + $0x8] sm:$0xff] }
 0x23f   :  { %7038 = vmatpush3.msra.mxu1 %v1116_v25  ;;  %7047 = vmatpush3.msra.mxu0 %v1226_v29  ;;  %v1670_v25 = vld [vmem:[#allocation17] sm:$0xff] }
 0x240   :  { %7039 = vmatprep.subr.mxu1 %v1115_v26  ;;  %7048 = vmatprep.subr.mxu0 %v1225_v31 }
 0x241   :  { %7040 = vmatpush3.msra.mxu1 %v1115_v26  ;;  %7049 = vmatpush3.msra.mxu0 %v1225_v31  ;;  %v1762_v26 = vld [vmem:[#allocation20] sm:$0xff] }
 0x242   :  { %7041 = vmatprep.subr.mxu1 %v1114_v27  ;;  %7050 = vmatprep.subr.mxu0 %v1224_v33 }
 0x243   :  { %7042 = vmatpush3.msra.mxu1 %v1114_v27  ;;  %7051 = vmatpush3.msra.mxu0 %v1224_v33 }
 0x244   :  { %7044 = vmatmul.mubr.msk.f32.vlgmr.msra.gmra.mxu1 %vm295_vm2, %v1112_v28  ;;  %7057 = vmatprep.subr.mxu1 %v1219_v30 }
 0x245   :  { %7058 = vmatpush3.msra.mxu1 %v1219_v30  ;;  %7052 = vmatprep.subr.mxu0 %v1223_v35 }
 0x246   :  { %7059 = vmatprep.subr.mxu1 %v1218_v32  ;;  %7053 = vmatpush3.msra.mxu0 %v1223_v35 }
 0x247   :  { %7060 = vmatpush3.msra.mxu1 %v1218_v32  ;;  %7068 = vmatprep.subr.mxu0 %v1395_v37 }
 0x248   :  { %7061 = vmatprep.subr.mxu1 %v1217_v34 }
 0x249   :  { %7062 = vmatpush3.msra.mxu1 %v1217_v34 }
 0x24a   :  { %7063 = vmatprep.subr.mxu1 %v1216_v36 }
 0x24b   :  { %7064 = vmatpush3.msra.mxu1 %v1216_v36 }
 0x24c   :  { %7079 = vmatprep.subr.mxu1 %v1485_v38 }
 0x2f2   :  { %v7001_v39 = vpop.f32.mrf.mxu1 }
 0x2f3   :  { %v7012_v40 = vpop.f32.mrf.mxu0 }
 0x2f4   :  { %v841_v41 = vpop.f32.mrf.mxu1  ;;  %v928_v44 = vadd.f32 %v7012_v40, %v7001_v39 }
 0x2f5   :  { %v922_v43 = vpop.f32.mrf.mxu0 }
 0x2f6   :  { %v923_v46 = vadd.f32 %v922_v43, %v841_v41  ;;  %v6657_v43 = vld [vmem:[#allocation15] ss:$0 sm:$0xff] }
 0x2fb   :  { %v7023_v42 = vpop.f32.mrf.mxu1 }
 0x2fc   :  { %v1020_v47 = vadd.f32 %v7023_v42, %v928_v44  ;;  %v7034_v48 = vpop.f32.mrf.mxu0 }
 0x2fd   :  { %v1010_v45 = vpop.f32.mrf.mxu1 }
 0x2fe   :  { %v1019_v49 = vadd.f32 %v1010_v45, %v923_v46  ;;  %v1110_v50 = vadd.f32 %v7034_v48, %v1020_v47  ;;  %v1100_v51 = vpop.f32.mrf.mxu0 }
 0x300   :  { %v1109_v54 = vadd.f32 %v1100_v51, %v1019_v49  ;;  %v8464_v51 = vld [vmem:[#allocation21] sm:$0xff] }
 0x304   :  { %v7045_v52 = vpop.f32.mrf.mxu1 }
 0x305   :  { %v1200_v55 = vadd.f32 %v7045_v52, %v1110_v50  ;;  %v8454_v50 = vld [vmem:[%s9390_s9] sm:$0xff] }
 0x306   :  { %v1190_v56 = vpop.f32.mrf.mxu1 }
 0x307   :  { %v1209_v57 = vadd.f32 %v6646_v53, %v1200_v55  ;;  %v1199_v58 = vadd.f32 %v1190_v56, %v1109_v54 }
 0x309   :  { %v1211_v59 = vmax.f32 %v1209_v57, 0.0  ;;  %v1208_v60 = vadd.f32 %v6646_v53, %v1199_v58  ;;  %v6658_v53 = vld [vmem:[#allocation18] ss:$0 sm:$0xff] }
 0x30b   :  { %1213 = vst.msk [vmem:[#allocation2 + $0x12] sm:$0xff] %vm295_vm2, %v1211_v59  ;;  %v1210_v61 = vmax.f32 %v1208_v60, 0.0 }
 0x30d   :  { %1212 = vst.msk [vmem:[#allocation2 + $0x2] sm:$0xff] %vm295_vm2, %v1210_v61 }
 0x312   :  { %v1221_v1 = vld [vmem:[#allocation2 + $0x11] sm:$0xff] }
 0x313   :  { %v1215_v2 = vld [vmem:[#allocation2 + $0x10] sm:$0xff] }
 0x314   :  { %v1220_v62 = vld [vmem:[#allocation2 + $0x1] sm:$0xff]  ;;  %v1390_v12 = vld [vmem:[#allocation2 + $0x12] sm:$0xff] }
 0x315   :  { %v1214_v63 = vld [vmem:[#allocation2] sm:$0xff]  ;;  %7054 = vmatprep.mubr.msk.f32.mxu0 %vm295_vm2, %v1220_v62  ;;  %v1480_v13 = vld [vmem:[#allocation2 + $0x13] sm:$0xff] }
 0x316   :  { %7065 = vmatprep.mubr.msk.f32.mxu1 %vm295_vm2, %v1214_v63  ;;  %7055 = vmatmul.mubr.msk.f32.vlgmr.msra.gmra.mxu0 %vm295_vm2, %v1221_v1  ;;  %v1389_v5 = vld [vmem:[#allocation2 + $0x2] sm:$0xff]  ;;  %v1570_v18 = vld [vmem:[#allocation2 + $0x14] sm:$0xff] }
 0x317   :  { %7066 = vmatmul.mubr.msk.f32.vlgmr.msra.gmra.mxu1 %vm295_vm2, %v1215_v2  ;;  %7069 = vmatpush3.msra.mxu0 %v1395_v37  ;;  %v1479_v6 = vld [vmem:[#allocation2 + $0x3] sm:$0xff]  ;;  %v6661_v62 = vld [vmem:[#allocation23] ss:$0 sm:$0xff] }
 0x318   :  { %7080 = vmatpush3.msra.mxu1 %v1485_v38  ;;  %7070 = vmatprep.subr.mxu0 %v1394_v3  ;;  %v1569_v14 = vld [vmem:[#allocation2 + $0x4] sm:$0xff] }
 0x319   :  { %7076 = vmatprep.mubr.msk.f32.mxu0 %vm295_vm2, %v1389_v5  ;;  %7081 = vmatprep.subr.mxu1 %v1484_v4 }
 0x31a   :  { %7087 = vmatprep.mubr.msk.f32.mxu1 %vm295_vm2, %v1479_v6  ;;  %7071 = vmatpush3.msra.mxu0 %v1394_v3 }
 0x31b   :  { %7082 = vmatpush3.msra.mxu1 %v1484_v4  ;;  %7072 = vmatprep.subr.mxu0 %v1393_v7 }
 0x31c   :  { %7083 = vmatprep.subr.mxu1 %v1483_v8  ;;  %7073 = vmatpush3.msra.mxu0 %v1393_v7 }
 0x31d   :  { %7084 = vmatpush3.msra.mxu1 %v1483_v8  ;;  %7074 = vmatprep.subr.mxu0 %v1392_v9 }
 0x31e   :  { %7085 = vmatprep.subr.mxu1 %v1482_v10  ;;  %7075 = vmatpush3.msra.mxu0 %v1392_v9 }
 0x31f   :  { %7086 = vmatpush3.msra.mxu1 %v1482_v10  ;;  %7077 = vmatmul.mubr.msk.f32.vlgmr.msra.gmra.mxu0 %vm295_vm2, %v1390_v12 }
 0x320   :  { %7088 = vmatmul.mubr.msk.f32.vlgmr.msra.gmra.mxu1 %vm295_vm2, %v1480_v13  ;;  %7090 = vmatprep.subr.mxu0 %v1575_v11 }
 0x321   :  { %7098 = vmatprep.mubr.msk.f32.mxu0 %vm295_vm2, %v1569_v14  ;;  %7091 = vmatpush3.msra.mxu0 %v1575_v11 }
 0x322   :  { %7092 = vmatprep.subr.mxu0 %v1574_v15  ;;  %7101 = vmatprep.subr.mxu1 %v1673_v19 }
 0x323   :  { %7093 = vmatpush3.msra.mxu0 %v1574_v15  ;;  %7102 = vmatpush3.msra.mxu1 %v1673_v19 }
 0x324   :  { %7094 = vmatprep.subr.mxu0 %v1573_v16  ;;  %7103 = vmatprep.subr.mxu1 %v1672_v21 }
 0x325   :  { %7095 = vmatpush3.msra.mxu0 %v1573_v16  ;;  %7104 = vmatpush3.msra.mxu1 %v1672_v21 }
 0x326   :  { %7096 = vmatprep.subr.mxu0 %v1572_v17  ;;  %7105 = vmatprep.subr.mxu1 %v1671_v23 }
 0x327   :  { %7097 = vmatpush3.msra.mxu0 %v1572_v17  ;;  %7106 = vmatpush3.msra.mxu1 %v1671_v23 }
 0x328   :  { %7099 = vmatmul.mubr.msk.f32.vlgmr.msra.gmra.mxu0 %vm295_vm2, %v1570_v18  ;;  %7112 = vmatprep.subr.mxu0 %v1765_v20 }
 0x329   :  { %7113 = vmatpush3.msra.mxu0 %v1765_v20  ;;  %7107 = vmatprep.subr.mxu1 %v1670_v25 }
 0x32a   :  { %7114 = vmatprep.subr.mxu0 %v1764_v22  ;;  %7108 = vmatpush3.msra.mxu1 %v1670_v25 }
 0x32b   :  { %7115 = vmatpush3.msra.mxu0 %v1764_v22  ;;  %7123 = vmatprep.subr.mxu1 %v8221_v0 }
 0x32c   :  { %7116 = vmatprep.subr.mxu0 %v1763_v24 }
 0x32d   :  { %7117 = vmatpush3.msra.mxu0 %v1763_v24 }
 0x32e   :  { %7118 = vmatprep.subr.mxu0 %v1762_v26 }
 0x32f   :  { %7119 = vmatpush3.msra.mxu0 %v1762_v26 }
 0x330   :  { %7133 = vmatprep.subr.mxu0 %v8221_v0 }
 0x3d6   :  { %v7056_v27 = vpop.f32.mrf.mxu0 }
 0x3d7   :  { %v7067_v28 = vpop.f32.mrf.mxu1 }
 0x3d8   :  { %v1299_v29 = vpop.f32.mrf.mxu0  ;;  %v1386_v32 = vadd.f32 %v7067_v28, %v7056_v27 }
 0x3d9   :  { %v1380_v31 = vpop.f32.mrf.mxu1 }
 0x3da   :  { %v1381_v34 = vadd.f32 %v1380_v31, %v1299_v29 }
 0x3df   :  { %v7078_v30 = vpop.f32.mrf.mxu0 }
 0x3e0   :  { %v1478_v35 = vadd.f32 %v7078_v30, %v1386_v32  ;;  %v7089_v36 = vpop.f32.mrf.mxu1 }
 0x3e1   :  { %v1468_v33 = vpop.f32.mrf.mxu0 }
 0x3e2   :  { %v1477_v37 = vadd.f32 %v1468_v33, %v1381_v34  ;;  %v1568_v38 = vadd.f32 %v7089_v36, %v1478_v35  ;;  %v1558_v39 = vpop.f32.mrf.mxu1 }
 0x3e4   :  { %v1567_v41 = vadd.f32 %v1558_v39, %v1477_v37 }
 0x3e8   :  { %v7100_v40 = vpop.f32.mrf.mxu0 }
 0x3e9   :  { %v1658_v42 = vadd.f32 %v7100_v40, %v1568_v38 }
 0x3ea   :  { %v1648_v44 = vpop.f32.mrf.mxu0 }
 0x3eb   :  { %v1657_v45 = vadd.f32 %v1648_v44, %v1567_v41  ;;  %v1667_v46 = vadd.f32 %v6657_v43, %v1658_v42 }
 0x3ed   :  { %v1666_v47 = vadd.f32 %v6657_v43, %v1657_v45  ;;  %v1669_v49 = vmax.f32 %v1667_v46, 0.0 }
 0x3ef   :  { %v1668_v48 = vmax.f32 %v1666_v47, 0.0 }
 0x3f1   :  { %7109 = vmatprep.mubr.msk.f32.mxu1 %vm295_vm2, %v1668_v48  ;;  %7120 = vmatprep.mubr.msk.f32.mxu0 %vm295_vm2, %v1668_v48 }
 0x3f2   :  { %7110 = vmatmul.mubr.msk.f32.vlgmr.msra.gmra.mxu1 %vm295_vm2, %v1669_v49  ;;  %7121 = vmatmul.mubr.msk.f32.vlgmr.msra.gmra.mxu0 %vm295_vm2, %v1669_v49 }
 0x3f3   :  { %7124 = vmatpush3.msra.mxu1 %v8454_v50  ;;  %7125 = vmatprep.mubr.msk.f32.mxu1 %vm8222_vm3, %v8221_v0 }
 0x3f4   :  { %7128 = vmatprep.subr.mxu1 %v8221_v0  ;;  %7134 = vmatpush3.msra.mxu0 %v8454_v50 }
 0x3f5   :  { %7135 = vmatprep.mubr.msk.f32.mxu0 %vm8222_vm3, %v8221_v0  ;;  %7143 = vmatprep.subr.mxu0 %v8221_v0 }
 0x3f6   :  { %7126 = vmatmul.mubr.f32.vlgmr.msra.gmra.mxu1 %v8221_v0 }
 0x3f7   :  { %7129 = vmatpush3.msra.mxu1 %v8464_v51  ;;  %7130 = vmatprep.mubr.msk.f32.mxu1 %vm8222_vm3, %v8221_v0 }
 0x3f8   :  { %7138 = vmatprep.subr.mxu1 %v8221_v0 }
 0x3fa   :  { %7131 = vmatmul.mubr.f32.vlgmr.msra.gmra.mxu1 %v8221_v0 }
 0x3fb   :  { %7139 = vmatpush3.msra.mxu1 %v8464_v51  ;;  %7140 = vmatprep.mubr.msk.f32.mxu1 %vm8222_vm3, %v8221_v0 }
 0x3fc   :  { %7148 = vmatprep.subr.mxu1 %v8221_v0 }
 0x4b2   :  { %v7111_v52 = vpop.f32.mrf.mxu1  ;;  %v7122_v54 = vpop.f32.mrf.mxu0 }
 0x4b3   :  { %v8480_v57 = vadd.f32 %v7111_v52, %v6658_v53  ;;  %v8485_v5 = vadd.f32 %v7122_v54, %v6661_v62 }
 0x4b4   :  { %v1753_v55 = vpop.f32.mrf.mxu1  ;;  %v1839_v59 = vpop.f32.mrf.mxu0 }
 0x4b5   :  { %v8483_v1 = vadd.f32 %v6661_v62, %v1839_v59  ;;  %v8488_v7 = vadd.f32 %v6658_v53, %v1753_v55 }
 0x4b6   :  { %v1919_v56 = vpop.f32.mrf.mxu1 }
 0x4b7   :  { %v1924_v58 = vrot.slane %v1919_v56, 1  ;;  %v1927_v9 = vadd.f32 %v1919_v56, %v8488_v7 }
 0x4b8   :  { %v7127_v60 = vpop.f32.mrf.mxu1 }
 0x4b9   :  { %v1928_v61 = vadd.f32 %v1924_v58, %v8480_v57  ;;  %v6664_v17 = vmul.f32 -1.442695, %v1927_v9 }
 0x4ba   :  { %v2044_v63 = vpop.f32.mrf.mxu1 }
 0x4bb   :  { %v2049_v2 = vrot.slane %v2044_v63, 1  ;;  %v2050_v3 = vrot.slane %v2044_v63, 2  ;;  %7325 = vtanh.f32 %v1928_v61  ;;  %v6665_v15 = vmul.f32 -1.442695, %v1928_v61 }
 0x4bc   :  { %v7132_v4 = vpop.f32.mrf.mxu1 }
 0x4bd   :  { %v2053_v6 = vadd.f32 %v2049_v2, %v8483_v1  ;;  %v2054_v8 = vadd.f32 %v2050_v3, %v8485_v5 }
 0x4bf   :  { %7327 = vtanh.f32 %v2053_v6  ;;  %v6666_v14 = vmul.f32 -1.442695, %v2053_v6  ;;  %v6667_v16 = vmul.f32 -1.442695, %v2054_v8 }
 0x4c0   :  { %7329 = vtanh.f32 %v2054_v8 }
 0x4c1   :  { %7331 = vtanh.f32 %v1927_v9 }
 0x4c2   :  { %7333 = vpow2.f32 %v6666_v14 }
 0x4c3   :  { %7335 = vpow2.f32 %v6665_v15 }
 0x4c4   :  { %7337 = vpow2.f32 %v6667_v16 }
 0x4c5   :  { %7339 = vpow2.f32 %v6664_v17 }
 0x4c8   :  { %v7326_v10 = vpop.eup %7325 }
 0x4c9   :  { %1949 = vrot.lane.b32.xlu0 %v7326_v10, %s8223_s12 }
 0x4cc   :  { %v7328_v11 = vpop.eup %7327 }
 0x4cd   :  { %2073 = vrot.lane.b32.xlu1 %v7328_v11, %s8223_s12  ;;  %v7330_v12 = vpop.eup %7329 }
 0x4ce   :  { %v7332_v13 = vpop.eup %7331 }
 0x4cf   :  { %v7334_v18 = vpop.eup %7333 }
 0x4d0   :  { %v7336_v19 = vpop.eup %7335  ;;  %v2061_v20 = vadd.f32 1.0, %v7334_v18 }
 0x4d1   :  { %2075 = vrot.lane.b32.xlu1 %v7330_v12, %s8223_s12  ;;  %v7338_v21 = vpop.eup %7337  ;;  %v1936_v22 = vadd.f32 1.0, %v7336_v19 }
 0x4d2   :  { %v2062_v23 = vadd.f32 1.0, %v7338_v21  ;;  %7341 = vrcp.f32 %v2061_v20  ;;  %v7340_v24 = vpop.eup %7339 }
 0x4d3   :  { %7343 = vrcp.f32 %v1936_v22  ;;  %v1935_v25 = vadd.f32 1.0, %v7340_v24 }
 0x4d4   :  { %7345 = vrcp.f32 %v2062_v23 }
 0x4d5   :  { %1947 = vrot.lane.b32.xlu1 %v7332_v13, %s8223_s12  ;;  %7347 = vrcp.f32 %v1935_v25 }
 0x4df   :  { %v7342_v26 = vpop.eup %7341 }
 0x4e0   :  { %v7344_v30 = vpop.eup %7343  ;;  %v2069_v38 = vmul.f32 0.0, %v7342_v26 }
 0x4e1   :  { %v7346_v31 = vpop.eup %7345  ;;  %v1944_v41 = vmul.f32 0.0, %v7344_v30 }
 0x4e2   :  { %v7348_v35 = vpop.eup %7347  ;;  %v2070_v42 = vmul.f32 0.0, %v7346_v31 }
 0x4e3   :  { %v1943_v47 = vmul.f32 0.0, %v7348_v35 }
 0x53b   :  { %v1950_v29 = vpop.permute.xlu0 %1949 }
 0x53c   :  { %v1954_v33 = vmul.f32 %v7344_v30, %v1950_v29 }
 0x53f   :  { %v2074_v27 = vpop.permute.xlu1 %2073 }
 0x540   :  { %v2079_v28 = vmul.f32 %v7342_v26, %v2074_v27 }
 0x542   :  { %2083 = vrot.lane.b32.xlu0 %v2079_v28, %s8212_s23 }
 0x543   :  { %v2076_v32 = vpop.permute.xlu1 %2075 }
 0x544   :  { %v2080_v34 = vmul.f32 %v7346_v31, %v2076_v32 }
 0x546   :  { %1959 = vrot.lane.b32.xlu0 %v1954_v33, %s8212_s23  ;;  %2085 = vrot.lane.b32.xlu1 %v2080_v34, %s8212_s23 }
 0x547   :  { %v1948_v36 = vpop.permute.xlu1 %1947 }
 0x548   :  { %v1953_v37 = vmul.f32 %v7348_v35, %v1948_v36 }
 0x54a   :  { %1957 = vrot.lane.b32.xlu1 %v1953_v37, %s8212_s23 }
 0x5b4   :  { %v2084_v39 = vpop.permute.xlu0 %2083 }
 0x5b5   :  { %v8500_v40 = vadd.f32 %v2084_v39, %v2069_v38 }
 0x5b7   :  { %7349 = vtanh.f32 %v8500_v40 }
 0x5b8   :  { %v1960_v43 = vpop.permute.xlu0 %1959  ;;  %v2086_v44 = vpop.permute.xlu1 %2085 }
 0x5b9   :  { %v8503_v45 = vadd.f32 %v1960_v43, %v1944_v41  ;;  %v8505_v46 = vadd.f32 %v2086_v44, %v2070_v42 }
 0x5bb   :  { %7351 = vtanh.f32 %v8503_v45 }
 0x5bc   :  { %7353 = vtanh.f32 %v8505_v46  ;;  %v1958_v48 = vpop.permute.xlu1 %1957 }
 0x5bd   :  { %v8509_v49 = vadd.f32 %v1958_v48, %v1943_v47 }
 0x5bf   :  { %7355 = vtanh.f32 %v8509_v49 }
 0x5c4   :  { %v7350_v52 = vpop.eup %7349 }
 0x5c5   :  { %2095 = vrot.lane.b32.xlu0 %v7350_v52, %s8202_s24 }
 0x5c8   :  { %v7352_v53 = vpop.eup %7351 }
 0x5c9   :  { %v7354_v54 = vpop.eup %7353  ;;  %1971 = vrot.lane.b32.xlu0 %v7352_v53, %s8202_s24 }
 0x5ca   :  { %2097 = vrot.lane.b32.xlu1 %v7354_v54, %s8202_s24 }
 0x5cc   :  { %v7356_v55 = vpop.eup %7355 }
 0x5ce   :  { %1969 = vrot.lane.b32.xlu1 %v7356_v55, %s8202_s24 }
 0x637   :  { %v2096_v56 = vpop.permute.xlu0 %2095 }
 0x638   :  { %v8516_v58 = vmul.f32 %v7342_v26, %v2096_v56 }
 0x63a   :  { %v2244_v63 = vrot.slane %v8516_v58, 7 }
 0x63b   :  { %v1972_v59 = vpop.permute.xlu0 %1971 }
 0x63c   :  { %v2098_v60 = vpop.permute.xlu1 %2097  ;;  %v8518_v61 = vmul.f32 %v7344_v30, %v1972_v59  ;;  %v2344_v59 = vrot.slane %v8500_v40, 1 }
 0x63d   :  { %v8520_v62 = vmul.f32 %v7346_v31, %v2098_v60  ;;  %v2345_v60 = vrot.slane %v8505_v46, 1 }
 0x63e   :  { %v2105_v4 = vrot.slane %v8518_v61, 7 }
 0x63f   :  { %v2245_v2 = vrot.slane %v8520_v62, 6 }
 0x640   :  { %v1970_v3 = vpop.permute.xlu1 %1969 }
 0x641   :  { %v8525_v6 = vmul.f32 %v7348_v35, %v1970_v3  ;;  %v2246_v8 = vsel %vm2106_vm4, %v2245_v2, %v2244_v63 }
 0x642   :  { %2247 = vrot.lane.b32.xlu0 %v2246_v8, %s8224_s7 }
 0x643   :  { %v2107_v9 = vsel %vm2106_vm4, %v2105_v4, %v8525_v6 }
 0x644   :  { %2108 = vrot.lane.b32.xlu1 %v2107_v9, %s8224_s7 }
 0x6b4   :  { %v2248_v10 = vpop.permute.xlu0 %2247 }
 0x6b5   :  { %7141 = vmatmul.mubr.msk.f32.vlgmr.msra.gmra.mxu1 %vm1849_vm5, %v2248_v10  ;;  %v2204_v10 = vrot.slane %v8509_v49, 7 }
 0x6b6   :  { %v2109_v11 = vpop.permute.xlu1 %2108  ;;  %7149 = vmatpush3.msra.mxu1 %v8464_v51  ;;  %7150 = vmatprep.mubr.msk.f32.mxu1 %vm8222_vm3, %v8221_v0 }
 0x6b7   :  { %7136 = vmatmul.mubr.msk.f32.vlgmr.msra.gmra.mxu0 %vm1849_vm5, %v2109_v11  ;;  %7158 = vmatprep.subr.mxu1 %v8221_v0  ;;  %v2205_v11 = vrot.slane %v8503_v45, 7 }
 0x6b8   :  { %7144 = vmatpush3.msra.mxu0 %v8454_v50  ;;  %7145 = vmatprep.mubr.msk.f32.mxu0 %vm8222_vm3, %v8221_v0 }
 0x6b9   :  { %7153 = vmatprep.subr.mxu0 %v8221_v0 }
 0x775   :  { %v2317_v12 = vpop.f32.mrf.mxu1 }
 0x776   :  { %v2322_v13 = vrot.slane %v2317_v12, 2  ;;  %v2323_v14 = vrot.slane %v2317_v12, 3 }
 0x777   :  { %v2178_v15 = vpop.f32.mrf.mxu0  ;;  %v7142_v16 = vpop.f32.mrf.mxu1 }
 0x778   :  { %v2326_v17 = vadd.f32 %v2322_v13, %v8483_v1  ;;  %v2327_v18 = vadd.f32 %v2323_v14, %v8485_v5  ;;  %v2183_v19 = vrot.slane %v2178_v15, 7  ;;  %v2187_v22 = vadd.f32 %v2178_v15, %v8480_v57 }
 0x779   :  { %v7137_v20 = vpop.f32.mrf.mxu0 }
 0x77a   :  { %7357 = vtanh.f32 %v2326_v17  ;;  %v2186_v21 = vadd.f32 %v2183_v19, %v8488_v7  ;;  %v6672_v27 = vmul.f32 -1.442695, %v2326_v17  ;;  %v6673_v28 = vmul.f32 -1.442695, %v2327_v18 }
 0x77b   :  { %7359 = vtanh.f32 %v2327_v18  ;;  %v6670_v30 = vmul.f32 -1.442695, %v2187_v22 }
 0x77c   :  { %7361 = vtanh.f32 %v2186_v21  ;;  %v6669_v29 = vmul.f32 -1.442695, %v2186_v21 }
 0x77d   :  { %7363 = vtanh.f32 %v2187_v22 }
 0x77e   :  { %7365 = vpow2.f32 %v6672_v27 }
 0x77f   :  { %7367 = vpow2.f32 %v6673_v28 }
 0x780   :  { %7369 = vpow2.f32 %v6669_v29 }
 0x781   :  { %7371 = vpow2.f32 %v6670_v30 }
 0x787   :  { %v7358_v23 = vpop.eup %7357 }
 0x788   :  { %v7360_v24 = vpop.eup %7359  ;;  %2352 = vrot.lane.b32.xlu0 %v7358_v23, %s8223_s12 }
 0x789   :  { %2354 = vrot.lane.b32.xlu1 %v7360_v24, %s8223_s12  ;;  %v7362_v25 = vpop.eup %7361 }
 0x78a   :  { %v7364_v26 = vpop.eup %7363 }
 0x78b   :  { %v7366_v31 = vpop.eup %7365 }
 0x78c   :  { %2212 = vrot.lane.b32.xlu0 %v7362_v25, %s8223_s12  ;;  %v7368_v32 = vpop.eup %7367  ;;  %v2334_v33 = vadd.f32 1.0, %v7366_v31 }
 0x78d   :  { %2214 = vrot.lane.b32.xlu1 %v7364_v26, %s8223_s12  ;;  %v2335_v34 = vadd.f32 1.0, %v7368_v32  ;;  %v7370_v35 = vpop.eup %7369 }
 0x78e   :  { %v7372_v36 = vpop.eup %7371  ;;  %7373 = vrcp.f32 %v2334_v33  ;;  %v2194_v37 = vadd.f32 1.0, %v7370_v35 }
 0x78f   :  { %7375 = vrcp.f32 %v2335_v34  ;;  %v2195_v38 = vadd.f32 1.0, %v7372_v36 }
 0x790   :  { %7377 = vrcp.f32 %v2194_v37 }
 0x791   :  { %7379 = vrcp.f32 %v2195_v38 }
 0x79b   :  { %v7374_v39 = vpop.eup %7373 }
 0x79c   :  { %v7376_v42 = vpop.eup %7375  ;;  %v2348_v63 = vmul.f32 %v7374_v39, %v2344_v59 }
 0x79d   :  { %v7378_v48 = vpop.eup %7377  ;;  %v2349_v3 = vmul.f32 %v7376_v42, %v2345_v60 }
 0x79e   :  { %v7380_v53 = vpop.eup %7379  ;;  %v2208_v12 = vmul.f32 %v7378_v48, %v2204_v10 }
 0x79f   :  { %v2209_v13 = vmul.f32 %v7380_v53, %v2205_v11 }
 0x7fa   :  { %v2353_v41 = vpop.permute.xlu0 %2352 }
 0x7fb   :  { %v2355_v43 = vpop.permute.xlu1 %2354  ;;  %v2358_v44 = vmul.f32 %v7374_v39, %v2353_v41 }
 0x7fc   :  { %v2359_v47 = vmul.f32 %v7376_v42, %v2355_v43 }
 0x7fd   :  { %2362 = vrot.lane.b32.xlu0 %v2358_v44, %s8212_s23 }
 0x7fe   :  { %2364 = vrot.lane.b32.xlu1 %v2359_v47, %s8212_s23  ;;  %v2213_v52 = vpop.permute.xlu0 %2212 }
 0x7ff   :  { %v2215_v54 = vpop.permute.xlu1 %2214  ;;  %v2218_v55 = vmul.f32 %v7378_v48, %v2213_v52 }
 0x800   :  { %v2219_v56 = vmul.f32 %v7380_v53, %v2215_v54 }
 0x801   :  { %2222 = vrot.lane.b32.xlu0 %v2218_v55, %s8212_s23 }
 0x802   :  { %2224 = vrot.lane.b32.xlu1 %v2219_v56, %s8212_s23 }
 0x86f   :  { %v2363_v2 = vpop.permute.xlu0 %2362 }
 0x870   :  { %v8556_v4 = vadd.f32 %v2363_v2, %v2348_v63  ;;  %v2365_v8 = vpop.permute.xlu1 %2364 }
 0x871   :  { %v8558_v9 = vadd.f32 %v2365_v8, %v2349_v3 }
 0x872   :  { %7381 = vtanh.f32 %v8556_v4 }
 0x873   :  { %7383 = vtanh.f32 %v8558_v9  ;;  %v2223_v40 = vpop.permute.xlu0 %2222 }
 0x874   :  { %v8564_v46 = vadd.f32 %v2223_v40, %v2208_v12  ;;  %v2225_v14 = vpop.permute.xlu1 %2224 }
 0x875   :  { %v8566_v15 = vadd.f32 %v2225_v14, %v2209_v13 }
 0x876   :  { %7385 = vtanh.f32 %v8564_v46 }
 0x877   :  { %7387 = vtanh.f32 %v8566_v15 }
 0x87f   :  { %v7382_v16 = vpop.eup %7381 }
 0x880   :  { %v7384_v49 = vpop.eup %7383  ;;  %2374 = vrot.lane.b32.xlu0 %v7382_v16, %s8202_s24 }
 0x881   :  { %2376 = vrot.lane.b32.xlu1 %v7384_v49, %s8202_s24 }
 0x883   :  { %v7386_v45 = vpop.eup %7385 }
 0x884   :  { %v7388_v17 = vpop.eup %7387  ;;  %2234 = vrot.lane.b32.xlu0 %v7386_v45, %s8202_s24 }
 0x885   :  { %2236 = vrot.lane.b32.xlu1 %v7388_v17, %s8202_s24 }
 0x8f2   :  { %v2375_v18 = vpop.permute.xlu0 %2374 }
 0x8f3   :  { %v8574_v19 = vmul.f32 %v7374_v39, %v2375_v18  ;;  %v2377_v20 = vpop.permute.xlu1 %2376 }
 0x8f4   :  { %v8576_v21 = vmul.f32 %v7376_v42, %v2377_v20 }
 0x8f5   :  { %v2523_v22 = vrot.slane %v8574_v19, 6 }
 0x8f6   :  { %v2524_v23 = vrot.slane %v8576_v21, 5  ;;  %v2235_v24 = vpop.permute.xlu0 %2234 }
 0x8f7   :  { %v8581_v26 = vmul.f32 %v7378_v48, %v2235_v24  ;;  %v2237_v27 = vpop.permute.xlu1 %2236 }
 0x8f8   :  { %v2525_v25 = vsel %vm2106_vm4, %v2524_v23, %v2523_v22  ;;  %v8585_v29 = vmul.f32 %v7380_v53, %v2237_v27  ;;  %v2623_v27 = vrot.slane %v8556_v4, 1 }
 0x8f9   :  { %2526 = vrot.lane.b32.xlu0 %v2525_v25, %s8224_s7  ;;  %v2384_v28 = vrot.slane %v8581_v26, 1 }
 0x8fb   :  { %v2385_v30 = vsel %vm2106_vm4, %v8585_v29, %v2384_v28  ;;  %v2624_v28 = vrot.slane %v8558_v9, 1 }
 0x8fc   :  { %2386 = vrot.lane.b32.xlu1 %v2385_v30, %s8224_s7 }
 0x96b   :  { %v2527_v31 = vpop.permute.xlu0 %2526 }
 0x96c   :  { %7151 = vmatmul.mubr.msk.f32.vlgmr.msra.gmra.mxu1 %vm1849_vm5, %v2527_v31 }
 0x96d   :  { %7159 = vmatpush3.msra.mxu1 %v8464_v51  ;;  %7160 = vmatprep.mubr.msk.f32.mxu1 %vm8222_vm3, %v8221_v0 }
 0x96e   :  { %7168 = vmatprep.subr.mxu1 %v8221_v0  ;;  %v2387_v32 = vpop.permute.xlu1 %2386 }
 0x96f   :  { %7146 = vmatmul.mubr.msk.f32.vlgmr.msra.gmra.mxu0 %vm1849_vm5, %v2387_v32 }
 0x970   :  { %7154 = vmatpush3.msra.mxu0 %v8454_v50  ;;  %7155 = vmatprep.mubr.msk.f32.mxu0 %vm8222_vm3, %v8221_v0 }
 0x971   :  { %7163 = vmatprep.subr.mxu0 %v8221_v0 }
 0xa2c   :  { %v2596_v33 = vpop.f32.mrf.mxu1 }
 0xa2d   :  { %v2601_v34 = vrot.slane %v2596_v33, 3  ;;  %v2602_v35 = vrot.slane %v2596_v33, 4 }
 0xa2e   :  { %v7152_v36 = vpop.f32.mrf.mxu1 }
 0xa2f   :  { %v2605_v37 = vadd.f32 %v2601_v34, %v8483_v1  ;;  %v2606_v38 = vadd.f32 %v2602_v35, %v8485_v5  ;;  %v2456_v39 = vpop.f32.mrf.mxu0  ;;  %v2483_v35 = vrot.slane %v8564_v46, 7 }
 0xa30   :  { %v2461_v41 = vrot.slane %v2456_v39, 6  ;;  %v2462_v42 = vrot.slane %v2456_v39, 7 }
 0xa31   :  { %7389 = vtanh.f32 %v2605_v37  ;;  %v7147_v43 = vpop.f32.mrf.mxu0  ;;  %v6678_v55 = vmul.f32 -1.442695, %v2605_v37  ;;  %v6679_v56 = vmul.f32 -1.442695, %v2606_v38  ;;  %v2484_v37 = vrot.slane %v8566_v15, 7 }
 0xa32   :  { %7391 = vtanh.f32 %v2606_v38  ;;  %v2465_v44 = vadd.f32 %v2461_v41, %v8488_v7  ;;  %v2466_v47 = vadd.f32 %v2462_v42, %v8480_v57 }
 0xa34   :  { %7393 = vtanh.f32 %v2465_v44  ;;  %v6675_v59 = vmul.f32 -1.442695, %v2465_v44  ;;  %v6676_v60 = vmul.f32 -1.442695, %v2466_v47 }
 0xa35   :  { %7395 = vtanh.f32 %v2466_v47 }
 0xa36   :  { %7397 = vpow2.f32 %v6678_v55 }
 0xa37   :  { %7399 = vpow2.f32 %v6679_v56 }
 0xa38   :  { %7401 = vpow2.f32 %v6675_v59 }
 0xa39   :  { %7403 = vpow2.f32 %v6676_v60 }
 0xa3e   :  { %v7390_v48 = vpop.eup %7389 }
 0xa3f   :  { %v7392_v52 = vpop.eup %7391  ;;  %2631 = vrot.lane.b32.xlu0 %v7390_v48, %s8223_s12 }
 0xa40   :  { %2633 = vrot.lane.b32.xlu1 %v7392_v52, %s8223_s12 }
 0xa41   :  { %v7394_v53 = vpop.eup %7393 }
 0xa42   :  { %v7396_v54 = vpop.eup %7395 }
 0xa43   :  { %2491 = vrot.lane.b32.xlu0 %v7394_v53, %s8223_s12  ;;  %v7398_v63 = vpop.eup %7397 }
 0xa44   :  { %2493 = vrot.lane.b32.xlu1 %v7396_v54, %s8223_s12  ;;  %v7400_v2 = vpop.eup %7399  ;;  %v2613_v3 = vadd.f32 1.0, %v7398_v63 }
 0xa45   :  { %v2614_v8 = vadd.f32 1.0, %v7400_v2  ;;  %v7402_v10 = vpop.eup %7401  ;;  %v4059_v2 = vsel %vm4058_vm6, %v8525_v6, %v8581_v26 }
 0xa46   :  { %v7404_v11 = vpop.eup %7403  ;;  %7405 = vrcp.f32 %v2613_v3  ;;  %v2473_v12 = vadd.f32 1.0, %v7402_v10 }
 0xa47   :  { %7407 = vrcp.f32 %v2614_v8  ;;  %v2474_v40 = vadd.f32 1.0, %v7404_v11  ;;  %v4060_v8 = vsel %vm4058_vm6, %v8518_v61, %v8585_v29 }
 0xa48   :  { %7409 = vrcp.f32 %v2473_v12 }
 0xa49   :  { %7411 = vrcp.f32 %v2474_v40 }
 0xa53   :  { %v7406_v13 = vpop.eup %7405 }
 0xa54   :  { %v7408_v16 = vpop.eup %7407  ;;  %v2627_v30 = vmul.f32 %v7406_v13, %v2623_v27 }
 0xa55   :  { %v7410_v18 = vpop.eup %7409  ;;  %v2628_v32 = vmul.f32 %v7408_v16, %v2624_v28 }
 0xa56   :  { %v7412_v22 = vpop.eup %7411  ;;  %v2487_v38 = vmul.f32 %v7410_v18, %v2483_v35 }
 0xa57   :  { %v2488_v39 = vmul.f32 %v7412_v22, %v2484_v37 }
 0xab1   :  { %v2632_v14 = vpop.permute.xlu0 %2631 }
 0xab2   :  { %v2634_v49 = vpop.permute.xlu1 %2633  ;;  %v2637_v45 = vmul.f32 %v7406_v13, %v2632_v14 }
 0xab3   :  { %v2638_v17 = vmul.f32 %v7408_v16, %v2634_v49 }
 0xab4   :  { %2641 = vrot.lane.b32.xlu0 %v2637_v45, %s8212_s23 }
 0xab5   :  { %2643 = vrot.lane.b32.xlu1 %v2638_v17, %s8212_s23  ;;  %v2492_v20 = vpop.permute.xlu0 %2491 }
 0xab6   :  { %v2494_v23 = vpop.permute.xlu1 %2493  ;;  %v2497_v24 = vmul.f32 %v7410_v18, %v2492_v20 }
 0xab7   :  { %v2498_v25 = vmul.f32 %v7412_v22, %v2494_v23 }
 0xab8   :  { %2501 = vrot.lane.b32.xlu0 %v2497_v24, %s8212_s23 }
 0xab9   :  { %2503 = vrot.lane.b32.xlu1 %v2498_v25, %s8212_s23 }
 0xb26   :  { %v2642_v31 = vpop.permute.xlu0 %2641 }
 0xb27   :  { %v8614_v33 = vadd.f32 %v2642_v31, %v2627_v30  ;;  %v2644_v34 = vpop.permute.xlu1 %2643 }
 0xb28   :  { %v8617_v36 = vadd.f32 %v2644_v34, %v2628_v32 }
 0xb29   :  { %7413 = vtanh.f32 %v8614_v33 }
 0xb2a   :  { %7415 = vtanh.f32 %v8617_v36  ;;  %v2502_v4 = vpop.permute.xlu0 %2501 }
 0xb2b   :  { %v8622_v9 = vadd.f32 %v2502_v4, %v2487_v38  ;;  %v2504_v41 = vpop.permute.xlu1 %2503 }
 0xb2c   :  { %v8624_v42 = vadd.f32 %v2504_v41, %v2488_v39 }
 0xb2d   :  { %7417 = vtanh.f32 %v8622_v9 }
 0xb2e   :  { %7419 = vtanh.f32 %v8624_v42 }
 0xb36   :  { %v7414_v46 = vpop.eup %7413 }
 0xb37   :  { %v7416_v43 = vpop.eup %7415  ;;  %2653 = vrot.lane.b32.xlu0 %v7414_v46, %s8202_s24 }
 0xb38   :  { %2655 = vrot.lane.b32.xlu1 %v7416_v43, %s8202_s24 }
 0xb3a   :  { %v7418_v15 = vpop.eup %7417 }
 0xb3b   :  { %v7420_v44 = vpop.eup %7419  ;;  %2513 = vrot.lane.b32.xlu0 %v7418_v15, %s8202_s24 }
 0xb3c   :  { %2515 = vrot.lane.b32.xlu1 %v7420_v44, %s8202_s24 }
 0xba9   :  { %v2654_v47 = vpop.permute.xlu0 %2653 }
 0xbaa   :  { %v8632_v48 = vmul.f32 %v7406_v13, %v2654_v47  ;;  %v2656_v52 = vpop.permute.xlu1 %2655 }
 0xbab   :  { %v8634_v53 = vmul.f32 %v7408_v16, %v2656_v52 }
 0xbac   :  { %v2803_v54 = vrot.slane %v8632_v48, 5 }
 0xbad   :  { %v2804_v55 = vrot.slane %v8634_v53, 4  ;;  %v2514_v56 = vpop.permute.xlu0 %2513 }
 0xbae   :  { %v2519_v59 = vmul.f32 %v7410_v18, %v2514_v56  ;;  %v2516_v60 = vpop.permute.xlu1 %2515 }
 0xbaf   :  { %v2805_v63 = vsel %vm2106_vm4, %v2804_v55, %v2803_v54  ;;  %v2520_v3 = vmul.f32 %v7412_v22, %v2516_v60 }
 0xbb0   :  { %2806 = vrot.lane.b32.xlu0 %v2805_v63, %s8224_s7  ;;  %v2663_v10 = vrot.slane %v2519_v59, 2  ;;  %v8647_v11 = vsel %vm4061_vm7, %v4059_v2, %v2519_v59 }
 0xbb1   :  { %v2664_v12 = vrot.slane %v2520_v3, 1  ;;  %v8650_v40 = vsel %vm4061_vm7, %v4060_v8, %v2520_v3 }
 0xbb3   :  { %v2665_v13 = vsel %vm2106_vm4, %v2664_v12, %v2663_v10  ;;  %v2903_v10 = vrot.slane %v8614_v33, 1  ;;  %v2904_v12 = vrot.slane %v8617_v36, 1 }
 0xbb4   :  { %2666 = vrot.lane.b32.xlu1 %v2665_v13, %s8224_s7 }
 0xc22   :  { %v2807_v6 = vpop.permute.xlu0 %2806 }
 0xc23   :  { %7161 = vmatmul.mubr.msk.f32.vlgmr.msra.gmra.mxu1 %vm1849_vm5, %v2807_v6 }
 0xc24   :  { %7169 = vmatpush3.msra.mxu1 %v8464_v51  ;;  %7170 = vmatprep.mubr.msk.f32.mxu1 %vm8222_vm3, %v8221_v0 }
 0xc25   :  { %7178 = vmatprep.subr.mxu1 %v8221_v0 }
 0xc26   :  { %v2667_v61 = vpop.permute.xlu1 %2666 }
 0xc27   :  { %7156 = vmatmul.mubr.msk.f32.vlgmr.msra.gmra.mxu0 %vm1849_vm5, %v2667_v61 }
 0xc28   :  { %7164 = vmatpush3.msra.mxu0 %v8454_v50  ;;  %7165 = vmatprep.mubr.msk.f32.mxu0 %vm8222_vm3, %v8221_v0 }
 0xc29   :  { %7173 = vmatprep.subr.mxu0 %v8221_v0 }
 0xce3   :  { %v2876_v26 = vpop.f32.mrf.mxu1 }
 0xce4   :  { %v2881_v29 = vrot.slane %v2876_v26, 4  ;;  %v2882_v14 = vrot.slane %v2876_v26, 5 }
 0xce5   :  { %v7162_v16 = vpop.f32.mrf.mxu1 }
 0xce6   :  { %v2885_v49 = vadd.f32 %v2881_v29, %v8483_v1  ;;  %v2886_v45 = vadd.f32 %v2882_v14, %v8485_v5  ;;  %v2763_v14 = vrot.slane %v8622_v9, 7 }
 0xce7   :  { %v2736_v17 = vpop.f32.mrf.mxu0 }
 0xce8   :  { %7421 = vtanh.f32 %v2885_v49  ;;  %v2741_v18 = vrot.slane %v2736_v17, 5  ;;  %v2742_v20 = vrot.slane %v2736_v17, 6  ;;  %v6684_v31 = vmul.f32 -1.442695, %v2885_v49 }
 0xce9   :  { %7423 = vtanh.f32 %v2886_v45  ;;  %v7157_v22 = vpop.f32.mrf.mxu0  ;;  %v6685_v32 = vmul.f32 -1.442695, %v2886_v45  ;;  %v2764_v49 = vrot.slane %v8624_v42, 7 }
 0xcea   :  { %v2745_v23 = vadd.f32 %v2741_v18, %v8488_v7  ;;  %v2746_v24 = vadd.f32 %v2742_v20, %v8480_v57 }
 0xcec   :  { %7425 = vtanh.f32 %v2745_v23  ;;  %v6681_v34 = vmul.f32 -1.442695, %v2745_v23  ;;  %v6682_v35 = vmul.f32 -1.442695, %v2746_v24 }
 0xced   :  { %7427 = vtanh.f32 %v2746_v24 }
 0xcee   :  { %7429 = vpow2.f32 %v6684_v31 }
 0xcef   :  { %7431 = vpow2.f32 %v6685_v32 }
 0xcf0   :  { %7433 = vpow2.f32 %v6681_v34 }
 0xcf1   :  { %7435 = vpow2.f32 %v6682_v35 }
 0xcf5   :  { %v7422_v25 = vpop.eup %7421 }
 0xcf6   :  { %v7424_v27 = vpop.eup %7423  ;;  %2911 = vrot.lane.b32.xlu0 %v7422_v25, %s8223_s12 }
 0xcf7   :  { %2913 = vrot.lane.b32.xlu1 %v7424_v27, %s8223_s12 }
 0xcf9   :  { %v7426_v28 = vpop.eup %7425 }
 0xcfa   :  { %v7428_v30 = vpop.eup %7427  ;;  %2771 = vrot.lane.b32.xlu0 %v7426_v28, %s8223_s12 }
 0xcfb   :  { %2773 = vrot.lane.b32.xlu1 %v7428_v30, %s8223_s12  ;;  %v7430_v37 = vpop.eup %7429 }
 0xcfc   :  { %v7432_v38 = vpop.eup %7431  ;;  %v2893_v4 = vadd.f32 1.0, %v7430_v37 }
 0xcfd   :  { %v2894_v39 = vadd.f32 1.0, %v7432_v38  ;;  %v7434_v41 = vpop.eup %7433 }
 0xcfe   :  { %v7436_v46 = vpop.eup %7435  ;;  %7437 = vrcp.f32 %v2893_v4  ;;  %v2753_v43 = vadd.f32 1.0, %v7434_v41 }
 0xcff   :  { %7439 = vrcp.f32 %v2894_v39  ;;  %v2754_v15 = vadd.f32 1.0, %v7436_v46 }
 0xd00   :  { %7441 = vrcp.f32 %v2753_v43 }
 0xd01   :  { %7443 = vrcp.f32 %v2754_v15 }
 0xd0b   :  { %v7438_v44 = vpop.eup %7437 }
 0xd0c   :  { %v7440_v52 = vpop.eup %7439  ;;  %v2907_v13 = vmul.f32 %v7438_v44, %v2903_v10 }
 0xd0d   :  { %v7442_v59 = vpop.eup %7441  ;;  %v2908_v61 = vmul.f32 %v7440_v52, %v2904_v12 }
 0xd0e   :  { %v7444_v63 = vpop.eup %7443  ;;  %v2767_v45 = vmul.f32 %v7442_v59, %v2763_v14 }
 0xd0f   :  { %v2768_v17 = vmul.f32 %v7444_v63, %v2764_v49 }
 0xd68   :  { %v2912_v47 = vpop.permute.xlu0 %2911 }
 0xd69   :  { %v2914_v54 = vpop.permute.xlu1 %2913  ;;  %v2917_v55 = vmul.f32 %v7438_v44, %v2912_v47 }
 0xd6a   :  { %v2918_v56 = vmul.f32 %v7440_v52, %v2914_v54 }
 0xd6b   :  { %2921 = vrot.lane.b32.xlu0 %v2917_v55, %s8212_s23 }
 0xd6c   :  { %2923 = vrot.lane.b32.xlu1 %v2918_v56, %s8212_s23  ;;  %v2772_v60 = vpop.permute.xlu0 %2771 }
 0xd6d   :  { %v2774_v2 = vpop.permute.xlu1 %2773  ;;  %v2777_v3 = vmul.f32 %v7442_v59, %v2772_v60 }
 0xd6e   :  { %v2778_v8 = vmul.f32 %v7444_v63, %v2774_v2 }
 0xd6f   :  { %2781 = vrot.lane.b32.xlu0 %v2777_v3, %s8212_s23 }
 0xd70   :  { %2783 = vrot.lane.b32.xlu1 %v2778_v8, %s8212_s23 }
 0xddd   :  { %v2922_v6 = vpop.permute.xlu0 %2921 }
 0xdde   :  { %v8678_v26 = vadd.f32 %v2922_v6, %v2907_v13  ;;  %v2924_v29 = vpop.permute.xlu1 %2923 }
 0xddf   :  { %v8681_v16 = vadd.f32 %v2924_v29, %v2908_v61 }
 0xde0   :  { %7445 = vtanh.f32 %v8678_v26 }
 0xde1   :  { %7447 = vtanh.f32 %v8681_v16  ;;  %v2782_v33 = vpop.permute.xlu0 %2781 }
 0xde2   :  { %v8686_v36 = vadd.f32 %v2782_v33, %v2767_v45  ;;  %v2784_v18 = vpop.permute.xlu1 %2783 }
 0xde3   :  { %v8688_v20 = vadd.f32 %v2784_v18, %v2768_v17 }
 0xde4   :  { %7449 = vtanh.f32 %v8686_v36 }
 0xde5   :  { %7451 = vtanh.f32 %v8688_v20 }
 0xded   :  { %v7446_v9 = vpop.eup %7445 }
 0xdee   :  { %v7448_v22 = vpop.eup %7447  ;;  %2933 = vrot.lane.b32.xlu0 %v7446_v9, %s8202_s24 }
 0xdef   :  { %2935 = vrot.lane.b32.xlu1 %v7448_v22, %s8202_s24 }
 0xdf1   :  { %v7450_v42 = vpop.eup %7449 }
 0xdf2   :  { %v7452_v23 = vpop.eup %7451  ;;  %2793 = vrot.lane.b32.xlu0 %v7450_v42, %s8202_s24 }
 0xdf3   :  { %2795 = vrot.lane.b32.xlu1 %v7452_v23, %s8202_s24 }
 0xe60   :  { %v2934_v24 = vpop.permute.xlu0 %2933 }
 0xe61   :  { %v8696_v25 = vmul.f32 %v7438_v44, %v2934_v24  ;;  %v2936_v27 = vpop.permute.xlu1 %2935 }
 0xe62   :  { %v8698_v28 = vmul.f32 %v7440_v52, %v2936_v27 }
 0xe63   :  { %v3083_v30 = vrot.slane %v8696_v25, 4 }
 0xe64   :  { %v3084_v31 = vrot.slane %v8698_v28, 3  ;;  %v2794_v32 = vpop.permute.xlu0 %2793 }
 0xe65   :  { %v2799_v34 = vmul.f32 %v7442_v59, %v2794_v32  ;;  %v2796_v35 = vpop.permute.xlu1 %2795 }
 0xe66   :  { %v3085_v37 = vsel %vm2106_vm4, %v3084_v31, %v3083_v30  ;;  %v2800_v38 = vmul.f32 %v7444_v63, %v2796_v35 }
 0xe67   :  { %3086 = vrot.lane.b32.xlu0 %v3085_v37, %s8224_s7  ;;  %v2943_v4 = vrot.slane %v2799_v34, 3  ;;  %v8706_v39 = vsel %vm4064_vm8, %v8647_v11, %v2799_v34 }
 0xe68   :  { %v2944_v41 = vrot.slane %v2800_v38, 2  ;;  %v8710_v46 = vsel %vm4064_vm8, %v8650_v40, %v2800_v38 }
 0xe6a   :  { %v2945_v43 = vsel %vm2106_vm4, %v2944_v41, %v2943_v4  ;;  %v3183_v4 = vrot.slane %v8678_v26, 1  ;;  %v3184_v41 = vrot.slane %v8681_v16, 1 }
 0xe6b   :  { %2946 = vrot.lane.b32.xlu1 %v2945_v43, %s8224_s7 }
 0xed9   :  { %v3087_v15 = vpop.permute.xlu0 %3086 }
 0xeda   :  { %7171 = vmatmul.mubr.msk.f32.vlgmr.msra.gmra.mxu1 %vm1849_vm5, %v3087_v15 }
 0xedb   :  { %7179 = vmatpush3.msra.mxu1 %v8464_v51  ;;  %7180 = vmatprep.mubr.msk.f32.mxu1 %vm8222_vm3, %v8221_v0 }
 0xedc   :  { %7188 = vmatprep.subr.mxu1 %v8221_v0 }
 0xedd   :  { %v2947_v11 = vpop.permute.xlu1 %2946 }
 0xede   :  { %7166 = vmatmul.mubr.msk.f32.vlgmr.msra.gmra.mxu0 %vm1849_vm5, %v2947_v11 }
 0xedf   :  { %7174 = vmatpush3.msra.mxu0 %v8454_v50  ;;  %7175 = vmatprep.mubr.msk.f32.mxu0 %vm8222_vm3, %v8221_v0 }
 0xee0   :  { %7183 = vmatprep.subr.mxu0 %v8221_v0 }
 0xf9a   :  { %v3156_v40 = vpop.f32.mrf.mxu1 }
 0xf9b   :  { %v3161_v44 = vrot.slane %v3156_v40, 5  ;;  %v3162_v47 = vrot.slane %v3156_v40, 6 }
 0xf9c   :  { %v7172_v52 = vpop.f32.mrf.mxu1 }
 0xf9d   :  { %v3165_v51 = vadd.f32 %v3161_v44, %v8483_v1  ;;  %v3166_v54 = vadd.f32 %v3162_v47, %v8485_v5  ;;  %v3043_v47 = vrot.slane %v8686_v36, 7 }
 0xf9e   :  { %v3016_v55 = vpop.f32.mrf.mxu0 }
 0xf9f   :  { %7453 = vtanh.f32 %v3165_v51  ;;  %v3021_v56 = vrot.slane %v3016_v55, 4  ;;  %v3022_v59 = vrot.slane %v3016_v55, 5  ;;  %v6690_v12 = vmul.f32 -1.442695, %v3165_v51 }
 0xfa0   :  { %7455 = vtanh.f32 %v3166_v54  ;;  %v7167_v60 = vpop.f32.mrf.mxu0  ;;  %v6691_v13 = vmul.f32 -1.442695, %v3166_v54  ;;  %v3044_v51 = vrot.slane %v8688_v20, 7 }
 0xfa1   :  { %v3025_v50 = vadd.f32 %v3021_v56, %v8488_v7  ;;  %v3026_v63 = vadd.f32 %v3022_v59, %v8480_v57 }
 0xfa3   :  { %7457 = vtanh.f32 %v3025_v50  ;;  %v6687_v6 = vmul.f32 -1.442695, %v3025_v50  ;;  %v6688_v61 = vmul.f32 -1.442695, %v3026_v63 }
 0xfa4   :  { %7459 = vtanh.f32 %v3026_v63 }
 0xfa5   :  { %7461 = vpow2.f32 %v6690_v12 }
 0xfa6   :  { %7463 = vpow2.f32 %v6691_v13 }
 0xfa7   :  { %7465 = vpow2.f32 %v6687_v6 }
 0xfa8   :  { %7467 = vpow2.f32 %v6688_v61 }
 0xfac   :  { %v7454_v2 = vpop.eup %7453 }
 0xfad   :  { %v7456_v3 = vpop.eup %7455  ;;  %3191 = vrot.lane.b32.xlu0 %v7454_v2, %s8223_s12 }
 0xfae   :  { %3193 = vrot.lane.b32.xlu1 %v7456_v3, %s8223_s12 }
 0xfb0   :  { %v7458_v8 = vpop.eup %7457 }
 0xfb1   :  { %v7460_v10 = vpop.eup %7459  ;;  %3051 = vrot.lane.b32.xlu0 %v7458_v8, %s8223_s12 }
 0xfb2   :  { %3053 = vrot.lane.b32.xlu1 %v7460_v10, %s8223_s12  ;;  %v7462_v29 = vpop.eup %7461 }
 0xfb3   :  { %v7464_v14 = vpop.eup %7463  ;;  %v3173_v49 = vadd.f32 1.0, %v7462_v29 }
 0xfb4   :  { %v3174_v45 = vadd.f32 1.0, %v7464_v14  ;;  %v7466_v33 = vpop.eup %7465 }
 0xfb5   :  { %v7468_v17 = vpop.eup %7467  ;;  %7469 = vrcp.f32 %v3173_v49  ;;  %v3033_v18 = vadd.f32 1.0, %v7466_v33 }
 0xfb6   :  { %7471 = vrcp.f32 %v3174_v45  ;;  %v3034_v9 = vadd.f32 1.0, %v7468_v17 }
 0xfb7   :  { %7473 = vrcp.f32 %v3033_v18 }
 0xfb8   :  { %7475 = vrcp.f32 %v3034_v9 }
 0xfc2   :  { %v7470_v22 = vpop.eup %7469 }
 0xfc3   :  { %v7472_v23 = vpop.eup %7471  ;;  %v3187_v43 = vmul.f32 %v7470_v22, %v3183_v4 }
 0xfc4   :  { %v7474_v31 = vpop.eup %7473  ;;  %v3188_v11 = vmul.f32 %v7472_v23, %v3184_v41 }
 0xfc5   :  { %v7476_v34 = vpop.eup %7475  ;;  %v3047_v54 = vmul.f32 %v7474_v31, %v3043_v47 }
 0xfc6   :  { %v3048_v55 = vmul.f32 %v7476_v34, %v3044_v51 }
0x101f   :  { %v3192_v42 = vpop.permute.xlu0 %3191 }
0x1020   :  { %v3194_v24 = vpop.permute.xlu1 %3193  ;;  %v3197_v27 = vmul.f32 %v7470_v22, %v3192_v42 }
0x1021   :  { %v3198_v30 = vmul.f32 %v7472_v23, %v3194_v24 }
0x1022   :  { %3201 = vrot.lane.b32.xlu0 %v3197_v27, %s8212_s23 }
0x1023   :  { %3203 = vrot.lane.b32.xlu1 %v3198_v30, %s8212_s23  ;;  %v3052_v32 = vpop.permute.xlu0 %3051 }
0x1024   :  { %v3054_v35 = vpop.permute.xlu1 %3053  ;;  %v3057_v37 = vmul.f32 %v7474_v31, %v3052_v32 }
0x1025   :  { %v3058_v38 = vmul.f32 %v7476_v34, %v3054_v35 }
0x1026   :  { %3061 = vrot.lane.b32.xlu0 %v3057_v37, %s8212_s23 }
0x1027   :  { %3063 = vrot.lane.b32.xlu1 %v3058_v38, %s8212_s23 }
0x1094   :  { %v3202_v15 = vpop.permute.xlu0 %3201 }
0x1095   :  { %v8738_v40 = vadd.f32 %v3202_v15, %v3187_v43  ;;  %v3204_v44 = vpop.permute.xlu1 %3203 }
0x1096   :  { %v8741_v52 = vadd.f32 %v3204_v44, %v3188_v11 }
0x1097   :  { %7477 = vtanh.f32 %v8738_v40 }
0x1098   :  { %7479 = vtanh.f32 %v8741_v52  ;;  %v3062_v26 = vpop.permute.xlu0 %3061 }
0x1099   :  { %v8746_v16 = vadd.f32 %v3062_v26, %v3047_v54  ;;  %v3064_v56 = vpop.permute.xlu1 %3063 }
0x109a   :  { %v8748_v59 = vadd.f32 %v3064_v56, %v3048_v55 }
0x109b   :  { %7481 = vtanh.f32 %v8746_v16 }
0x109c   :  { %7483 = vtanh.f32 %v8748_v59 }
0x10a4   :  { %v7478_v36 = vpop.eup %7477 }
0x10a5   :  { %v7480_v60 = vpop.eup %7479  ;;  %3213 = vrot.lane.b32.xlu0 %v7478_v36, %s8202_s24 }
0x10a6   :  { %3215 = vrot.lane.b32.xlu1 %v7480_v60, %s8202_s24 }
0x10a8   :  { %v7482_v20 = vpop.eup %7481 }
0x10a9   :  { %v7484_v50 = vpop.eup %7483  ;;  %3073 = vrot.lane.b32.xlu0 %v7482_v20, %s8202_s24 }
0x10aa   :  { %3075 = vrot.lane.b32.xlu1 %v7484_v50, %s8202_s24 }
0x1117   :  { %v3214_v63 = vpop.permute.xlu0 %3213 }
0x1118   :  { %v8756_v2 = vmul.f32 %v7470_v22, %v3214_v63  ;;  %v3216_v3 = vpop.permute.xlu1 %3215  ;;  %v8775_v22 = vld [vmem:[#allocation21] sm:$0xff] }
0x1119   :  { %v8758_v8 = vmul.f32 %v7472_v23, %v3216_v3 }
0x111a   :  { %v3363_v10 = vrot.slane %v8756_v2, 3 }
0x111b   :  { %v3364_v12 = vrot.slane %v8758_v8, 2  ;;  %v3074_v13 = vpop.permute.xlu0 %3073 }
0x111c   :  { %v3079_v6 = vmul.f32 %v7474_v31, %v3074_v13  ;;  %v3076_v61 = vpop.permute.xlu1 %3075 }
0x111d   :  { %v3365_v29 = vsel %vm2106_vm4, %v3364_v12, %v3363_v10  ;;  %v3080_v14 = vmul.f32 %v7476_v34, %v3076_v61 }
0x111e   :  { %3366 = vrot.lane.b32.xlu0 %v3365_v29, %s8224_s7  ;;  %v3223_v49 = vrot.slane %v3079_v6, 4  ;;  %v8766_v45 = vsel %vm4067_vm9, %v8706_v39, %v3079_v6 }
0x111f   :  { %v3224_v33 = vrot.slane %v3080_v14, 3  ;;  %v8770_v17 = vsel %vm4067_vm9, %v8710_v46, %v3080_v14  ;;  %v8785_v46 = vld [vmem:[%s9390_s9] sm:$0xff] }
0x1121   :  { %v3225_v18 = vsel %vm2106_vm4, %v3224_v33, %v3223_v49 }
0x1122   :  { %3226 = vrot.lane.b32.xlu1 %v3225_v18, %s8224_s7 }
0x1190   :  { %v3367_v9 = vpop.permute.xlu0 %3366 }
0x1191   :  { %7181 = vmatmul.mubr.msk.f32.vlgmr.msra.gmra.mxu1 %vm1849_vm5, %v3367_v9 }
0x1192   :  { %7189 = vmatpush3.msra.mxu1 %v8775_v22  ;;  %7190 = vmatprep.mubr.msk.f32.mxu1 %vm8222_vm3, %v8221_v0 }
0x1193   :  { %7198 = vmatprep.subr.mxu1 %v8221_v0 }
0x1194   :  { %v3227_v39 = vpop.permute.xlu1 %3226 }
0x1195   :  { %7176 = vmatmul.mubr.msk.f32.vlgmr.msra.gmra.mxu0 %vm1849_vm5, %v3227_v39  ;;  %v3463_v39 = vrot.slane %v8738_v40, 1 }
0x1196   :  { %7184 = vmatpush3.msra.mxu0 %v8785_v46  ;;  %7185 = vmatprep.mubr.msk.f32.mxu0 %vm8222_vm3, %v8221_v0 }
0x1197   :  { %7193 = vmatprep.subr.mxu0 %v8221_v0 }
0x1251   :  { %v3436_v42 = vpop.f32.mrf.mxu1 }
0x1252   :  { %v3441_v23 = vrot.slane %v3436_v42, 6  ;;  %v3442_v24 = vrot.slane %v3436_v42, 7  ;;  %v3464_v42 = vrot.slane %v8741_v52, 1 }
0x1253   :  { %v7182_v27 = vpop.f32.mrf.mxu1 }
0x1254   :  { %v3445_v30 = vadd.f32 %v3441_v23, %v8483_v1  ;;  %v3446_v31 = vadd.f32 %v3442_v24, %v8485_v5 }
0x1255   :  { %v3296_v32 = vpop.f32.mrf.mxu0 }
0x1256   :  { %7485 = vtanh.f32 %v3445_v30  ;;  %v3301_v34 = vrot.slane %v3296_v32, 3  ;;  %v3302_v35 = vrot.slane %v3296_v32, 4  ;;  %v6696_v44 = vmul.f32 -1.442695, %v3445_v30 }
0x1257   :  { %7487 = vtanh.f32 %v3446_v31  ;;  %v7177_v37 = vpop.f32.mrf.mxu0  ;;  %v6697_v47 = vmul.f32 -1.442695, %v3446_v31  ;;  %v3323_v32 = vrot.slane %v8746_v16, 7 }
0x1258   :  { %v3305_v38 = vadd.f32 %v3301_v34, %v8488_v7  ;;  %v3306_v4 = vadd.f32 %v3302_v35, %v8480_v57  ;;  %v3324_v35 = vrot.slane %v8748_v59, 7 }
0x125a   :  { %7489 = vtanh.f32 %v3305_v38  ;;  %v6693_v51 = vmul.f32 -1.442695, %v3305_v38  ;;  %v6694_v54 = vmul.f32 -1.442695, %v3306_v4 }
0x125b   :  { %7491 = vtanh.f32 %v3306_v4 }
0x125c   :  { %7493 = vpow2.f32 %v6696_v44 }
0x125d   :  { %7495 = vpow2.f32 %v6697_v47 }
0x125e   :  { %7497 = vpow2.f32 %v6693_v51 }
0x125f   :  { %7499 = vpow2.f32 %v6694_v54 }
0x1263   :  { %v7486_v41 = vpop.eup %7485 }
0x1264   :  { %v7488_v43 = vpop.eup %7487  ;;  %3471 = vrot.lane.b32.xlu0 %v7486_v41, %s8223_s12 }
0x1265   :  { %3473 = vrot.lane.b32.xlu1 %v7488_v43, %s8223_s12 }
0x1267   :  { %v7490_v15 = vpop.eup %7489 }
0x1268   :  { %v7492_v11 = vpop.eup %7491  ;;  %3331 = vrot.lane.b32.xlu0 %v7490_v15, %s8223_s12 }
0x1269   :  { %3333 = vrot.lane.b32.xlu1 %v7492_v11, %s8223_s12  ;;  %v7494_v26 = vpop.eup %7493 }
0x126a   :  { %v7496_v55 = vpop.eup %7495  ;;  %v3453_v56 = vadd.f32 1.0, %v7494_v26 }
0x126b   :  { %v3454_v36 = vadd.f32 1.0, %v7496_v55  ;;  %v7498_v60 = vpop.eup %7497 }
0x126c   :  { %v7500_v20 = vpop.eup %7499  ;;  %7501 = vrcp.f32 %v3453_v56  ;;  %v3313_v50 = vadd.f32 1.0, %v7498_v60 }
0x126d   :  { %7503 = vrcp.f32 %v3454_v36  ;;  %v3314_v63 = vadd.f32 1.0, %v7500_v20 }
0x126e   :  { %7505 = vrcp.f32 %v3313_v50 }
0x126f   :  { %7507 = vrcp.f32 %v3314_v63 }
0x1279   :  { %v7502_v3 = vpop.eup %7501 }
0x127a   :  { %v7504_v12 = vpop.eup %7503  ;;  %v3467_v23 = vmul.f32 %v7502_v3, %v3463_v39 }
0x127b   :  { %v7506_v29 = vpop.eup %7505  ;;  %v3468_v27 = vmul.f32 %v7504_v12, %v3464_v42 }
0x127c   :  { %v7508_v49 = vpop.eup %7507  ;;  %v3327_v37 = vmul.f32 %v7506_v29, %v3323_v32 }
0x127d   :  { %v3328_v38 = vmul.f32 %v7508_v49, %v3324_v35 }
0x12d6   :  { %v3472_v10 = vpop.permute.xlu0 %3471 }
0x12d7   :  { %v3474_v13 = vpop.permute.xlu1 %3473  ;;  %v3477_v6 = vmul.f32 %v7502_v3, %v3472_v10 }
0x12d8   :  { %v3478_v61 = vmul.f32 %v7504_v12, %v3474_v13 }
0x12d9   :  { %3481 = vrot.lane.b32.xlu0 %v3477_v6, %s8212_s23 }
0x12da   :  { %3483 = vrot.lane.b32.xlu1 %v3478_v61, %s8212_s23  ;;  %v3332_v14 = vpop.permute.xlu0 %3331 }
0x12db   :  { %v3334_v33 = vpop.permute.xlu1 %3333  ;;  %v3337_v18 = vmul.f32 %v7506_v29, %v3332_v14 }
0x12dc   :  { %v3338_v9 = vmul.f32 %v7508_v49, %v3334_v33 }
0x12dd   :  { %3341 = vrot.lane.b32.xlu0 %v3337_v18, %s8212_s23 }
0x12de   :  { %3343 = vrot.lane.b32.xlu1 %v3338_v9, %s8212_s23 }
0x134b   :  { %v3482_v24 = vpop.permute.xlu0 %3481 }
0x134c   :  { %v8805_v30 = vadd.f32 %v3482_v24, %v3467_v23  ;;  %v3484_v31 = vpop.permute.xlu1 %3483 }
0x134d   :  { %v8808_v34 = vadd.f32 %v3484_v31, %v3468_v27 }
0x134e   :  { %7509 = vtanh.f32 %v8805_v30 }
0x134f   :  { %7511 = vtanh.f32 %v8808_v34  ;;  %v3342_v40 = vpop.permute.xlu0 %3341 }
0x1350   :  { %v8813_v52 = vadd.f32 %v3342_v40, %v3327_v37  ;;  %v3344_v4 = vpop.permute.xlu1 %3343 }
0x1351   :  { %v8815_v41 = vadd.f32 %v3344_v4, %v3328_v38 }
0x1352   :  { %7513 = vtanh.f32 %v8813_v52 }
0x1353   :  { %7515 = vtanh.f32 %v8815_v41 }
0x135b   :  { %v7510_v16 = vpop.eup %7509 }
0x135c   :  { %v7512_v43 = vpop.eup %7511  ;;  %3493 = vrot.lane.b32.xlu0 %v7510_v16, %s8202_s24 }
0x135d   :  { %3495 = vrot.lane.b32.xlu1 %v7512_v43, %s8202_s24 }
0x135f   :  { %v7514_v59 = vpop.eup %7513 }
0x1360   :  { %v7516_v15 = vpop.eup %7515  ;;  %3353 = vrot.lane.b32.xlu0 %v7514_v59, %s8202_s24 }
0x1361   :  { %3355 = vrot.lane.b32.xlu1 %v7516_v15, %s8202_s24 }
0x13ce   :  { %v3494_v11 = vpop.permute.xlu0 %3493 }
0x13cf   :  { %v8823_v44 = vmul.f32 %v7502_v3, %v3494_v11  ;;  %v3496_v47 = vpop.permute.xlu1 %3495 }
0x13d0   :  { %v8825_v51 = vmul.f32 %v7504_v12, %v3496_v47 }
0x13d1   :  { %v3643_v54 = vrot.slane %v8823_v44, 2 }
0x13d2   :  { %v3644_v26 = vrot.slane %v8825_v51, 1  ;;  %v3354_v55 = vpop.permute.xlu0 %3353 }
0x13d3   :  { %v3359_v56 = vmul.f32 %v7506_v29, %v3354_v55  ;;  %v3356_v36 = vpop.permute.xlu1 %3355 }
0x13d4   :  { %v3645_v60 = vsel %vm2106_vm4, %v3644_v26, %v3643_v54  ;;  %v3360_v20 = vmul.f32 %v7508_v49, %v3356_v36 }
0x13d5   :  { %3646 = vrot.lane.b32.xlu0 %v3645_v60, %s8224_s7  ;;  %v3503_v50 = vrot.slane %v3359_v56, 5  ;;  %v8833_v63 = vsel %vm4070_vm10, %v8766_v45, %v3359_v56 }
0x13d6   :  { %v3504_v3 = vrot.slane %v3360_v20, 4  ;;  %v8837_v10 = vsel %vm4070_vm10, %v8770_v17, %v3360_v20 }
0x13d8   :  { %v3505_v12 = vsel %vm2106_vm4, %v3504_v3, %v3503_v50 }
0x13d9   :  { %3506 = vrot.lane.b32.xlu1 %v3505_v12, %s8224_s7 }
0x1447   :  { %v3647_v13 = vpop.permute.xlu0 %3646 }
0x1448   :  { %7191 = vmatmul.mubr.msk.f32.vlgmr.msra.gmra.mxu1 %vm1849_vm5, %v3647_v13  ;;  %v3743_v13 = vrot.slane %v8808_v34, 1 }
0x1449   :  { %7199 = vmatpush3.msra.mxu1 %v8775_v22  ;;  %7200 = vmatprep.mubr.msk.f32.mxu1 %vm8222_vm3, %v8221_v0 }
0x144b   :  { %v3507_v6 = vpop.permute.xlu1 %3506 }
0x144c   :  { %7186 = vmatmul.mubr.msk.f32.vlgmr.msra.gmra.mxu0 %vm1849_vm5, %v3507_v6 }
0x144d   :  { %7194 = vmatpush3.msra.mxu0 %v8785_v46  ;;  %7195 = vmatprep.mubr.msk.f32.mxu0 %vm8222_vm3, %v8221_v0 }
0x1508   :  { %v3716_v45 = vpop.f32.mrf.mxu1 }
0x1509   :  { %v3721_v17 = vrot.slane %v3716_v45, 7  ;;  %v3725_v61 = vadd.f32 %v3716_v45, %v8485_v5  ;;  %v3742_v45 = vrot.slane %v8805_v30, 1 }
0x150a   :  { %v7192_v29 = vpop.f32.mrf.mxu1 }
0x150b   :  { %v3724_v14 = vadd.f32 %v3721_v17, %v8483_v1  ;;  %7517 = vtanh.f32 %v3725_v61  ;;  %v6703_v27 = vmul.f32 -1.442695, %v3725_v61 }
0x150c   :  { %v3576_v22 = vpop.f32.mrf.mxu0 }
0x150d   :  { %7519 = vtanh.f32 %v3724_v14  ;;  %v3581_v49 = vrot.slane %v3576_v22, 2  ;;  %v3582_v33 = vrot.slane %v3576_v22, 3  ;;  %v6702_v31 = vmul.f32 -1.442695, %v3724_v14 }
0x150e   :  { %v7187_v18 = vpop.f32.mrf.mxu0  ;;  %v3603_v22 = vrot.slane %v8813_v52, 7 }
0x150f   :  { %v3585_v9 = vadd.f32 %v3581_v49, %v8488_v7  ;;  %v3586_v46 = vadd.f32 %v3582_v33, %v8480_v57  ;;  %v3604_v33 = vrot.slane %v8815_v41, 7 }
0x1511   :  { %7521 = vtanh.f32 %v3585_v9  ;;  %v6699_v32 = vmul.f32 -1.442695, %v3585_v9  ;;  %v6700_v35 = vmul.f32 -1.442695, %v3586_v46 }
0x1512   :  { %7523 = vtanh.f32 %v3586_v46 }
0x1513   :  { %7525 = vpow2.f32 %v6703_v27 }
0x1514   :  { %7527 = vpow2.f32 %v6702_v31 }
0x1515   :  { %7529 = vpow2.f32 %v6699_v32 }
0x1516   :  { %7531 = vpow2.f32 %v6700_v35 }
0x1518   :  { %v7518_v39 = vpop.eup %7517 }
0x1519   :  { %3752 = vrot.lane.b32.xlu1 %v7518_v39, %s8223_s12 }
0x151a   :  { %v7520_v42 = vpop.eup %7519 }
0x151b   :  { %3750 = vrot.lane.b32.xlu0 %v7520_v42, %s8223_s12 }
0x151e   :  { %v7522_v23 = vpop.eup %7521 }
0x151f   :  { %v7524_v24 = vpop.eup %7523  ;;  %3611 = vrot.lane.b32.xlu0 %v7522_v23, %s8223_s12 }
0x1520   :  { %3613 = vrot.lane.b32.xlu1 %v7524_v24, %s8223_s12  ;;  %v7526_v37 = vpop.eup %7525 }
0x1521   :  { %v7528_v40 = vpop.eup %7527  ;;  %v3733_v38 = vadd.f32 1.0, %v7526_v37 }
0x1522   :  { %v3732_v4 = vadd.f32 1.0, %v7528_v40  ;;  %v7530_v16 = vpop.eup %7529 }
0x1523   :  { %7533 = vrcp.f32 %v3733_v38  ;;  %v7532_v43 = vpop.eup %7531  ;;  %v3593_v59 = vadd.f32 1.0, %v7530_v16 }
0x1524   :  { %7535 = vrcp.f32 %v3732_v4  ;;  %v3594_v15 = vadd.f32 1.0, %v7532_v43 }
0x1525   :  { %7537 = vrcp.f32 %v3593_v59 }
0x1526   :  { %7539 = vrcp.f32 %v3594_v15 }
0x1530   :  { %v7534_v11 = vpop.eup %7533 }
0x1531   :  { %v7536_v26 = vpop.eup %7535  ;;  %v3747_v6 = vmul.f32 %v7534_v11, %v3743_v13 }
0x1532   :  { %v7538_v36 = vpop.eup %7537  ;;  %v3746_v29 = vmul.f32 %v7536_v26, %v3742_v45 }
0x1533   :  { %v7540_v20 = vpop.eup %7539  ;;  %v3607_v18 = vmul.f32 %v7538_v36, %v3603_v22 }
0x1534   :  { %v3608_v9 = vmul.f32 %v7540_v20, %v3604_v33 }
0x158b   :  { %v3753_v47 = vpop.permute.xlu1 %3752 }
0x158c   :  { %v3757_v54 = vmul.f32 %v7534_v11, %v3753_v47 }
0x158d   :  { %v3751_v55 = vpop.permute.xlu0 %3750 }
0x158e   :  { %3762 = vrot.lane.b32.xlu1 %v3757_v54, %s8212_s23  ;;  %v3756_v56 = vmul.f32 %v7536_v26, %v3751_v55 }
0x1590   :  { %3760 = vrot.lane.b32.xlu0 %v3756_v56, %s8212_s23 }
0x1591   :  { %v3612_v60 = vpop.permute.xlu0 %3611 }
0x1592   :  { %v3614_v50 = vpop.permute.xlu1 %3613  ;;  %v3617_v3 = vmul.f32 %v7538_v36, %v3612_v60 }
0x1593   :  { %v3618_v12 = vmul.f32 %v7540_v20, %v3614_v50 }
0x1594   :  { %3621 = vrot.lane.b32.xlu0 %v3617_v3, %s8212_s23 }
0x1595   :  { %3623 = vrot.lane.b32.xlu1 %v3618_v12, %s8212_s23 }
0x1600   :  { %v3763_v17 = vpop.permute.xlu1 %3762 }
0x1601   :  { %v8863_v61 = vadd.f32 %v3763_v17, %v3747_v6 }
0x1602   :  { %v3761_v14 = vpop.permute.xlu0 %3760 }
0x1603   :  { %7541 = vtanh.f32 %v8863_v61  ;;  %v8867_v49 = vadd.f32 %v3761_v14, %v3746_v29 }
0x1605   :  { %7543 = vtanh.f32 %v8867_v49 }
0x1606   :  { %v3622_v34 = vpop.permute.xlu0 %3621 }
0x1607   :  { %v8871_v46 = vadd.f32 %v3622_v34, %v3607_v18  ;;  %v3624_v30 = vpop.permute.xlu1 %3623 }
0x1608   :  { %v8873_v39 = vadd.f32 %v3624_v30, %v3608_v9 }
0x1609   :  { %7545 = vtanh.f32 %v8871_v46 }
0x160a   :  { %7547 = vtanh.f32 %v8873_v39 }
0x1610   :  { %v7542_v42 = vpop.eup %7541 }
0x1611   :  { %3774 = vrot.lane.b32.xlu1 %v7542_v42, %s8202_s24 }
0x1612   :  { %v7544_v52 = vpop.eup %7543 }
0x1613   :  { %3772 = vrot.lane.b32.xlu0 %v7544_v52, %s8202_s24 }
0x1616   :  { %v7546_v41 = vpop.eup %7545 }
0x1617   :  { %v7548_v23 = vpop.eup %7547  ;;  %3633 = vrot.lane.b32.xlu0 %v7546_v41, %s8202_s24 }
0x1618   :  { %3635 = vrot.lane.b32.xlu1 %v7548_v23, %s8202_s24 }
0x1683   :  { %v3775_v24 = vpop.permute.xlu1 %3774 }
0x1684   :  { %v8883_v32 = vmul.f32 %v7534_v11, %v3775_v24 }
0x1685   :  { %v3773_v27 = vpop.permute.xlu0 %3772 }
0x1686   :  { %v8881_v31 = vmul.f32 %v7536_v26, %v3773_v27 }
0x1688   :  { %v3922_v35 = vrot.slane %v8881_v31, 1 }
0x1689   :  { %v3634_v37 = vpop.permute.xlu0 %3633 }
0x168a   :  { %v3639_v40 = vmul.f32 %v7538_v36, %v3634_v37  ;;  %v3636_v38 = vpop.permute.xlu1 %3635  ;;  %v3923_v4 = vsel %vm2106_vm4, %v8883_v32, %v3922_v35 }
0x168b   :  { %v3640_v16 = vmul.f32 %v7540_v20, %v3636_v38  ;;  %3924 = vrot.lane.b32.xlu0 %v3923_v4, %s8224_s7 }
0x168c   :  { %v3782_v43 = vrot.slane %v3639_v40, 6  ;;  %v8891_v59 = vsel %vm4073_vm11, %v8833_v63, %v3639_v40 }
0x168d   :  { %v3783_v15 = vrot.slane %v3640_v16, 5  ;;  %v8895_v11 = vsel %vm4073_vm11, %v8837_v10, %v3640_v16 }
0x168f   :  { %v3784_v47 = vsel %vm2106_vm4, %v3783_v15, %v3782_v43  ;;  %v4020_v15 = vrot.slane %v8867_v49, 1 }
0x1690   :  { %3785 = vrot.lane.b32.xlu1 %v3784_v47, %s8224_s7 }
0x16fd   :  { %v3925_v54 = vpop.permute.xlu0 %3924 }
0x16fe   :  { %7201 = vmatmul.mubr.msk.f32.vlgmr.msra.gmra.mxu1 %vm1849_vm5, %v3925_v54  ;;  %v4021_v54 = vrot.slane %v8863_v61, 1 }
0x1702   :  { %v3786_v26 = vpop.permute.xlu1 %3785 }
0x1703   :  { %7196 = vmatmul.mubr.msk.f32.vlgmr.msra.gmra.mxu0 %vm1849_vm5, %v3786_v26 }
0x17be   :  { %v3994_v55 = vpop.f32.mrf.mxu1 }
0x17bf   :  { %v3999_v56 = vrot.slane %v3994_v55, 1  ;;  %v4002_v63 = vadd.f32 %v3994_v55, %v8483_v1 }
0x17c0   :  { %v7202_v36 = vpop.f32.mrf.mxu1 }
0x17c1   :  { %v4003_v60 = vadd.f32 %v3999_v56, %v8485_v5  ;;  %7549 = vtanh.f32 %v4002_v63  ;;  %v6708_v17 = vmul.f32 -1.442695, %v4002_v63  ;;  %v3882_v36 = vrot.slane %v8871_v46, 7 }
0x17c3   :  { %v3855_v10 = vpop.f32.mrf.mxu0  ;;  %7551 = vtanh.f32 %v4003_v60  ;;  %v6709_v29 = vmul.f32 -1.442695, %v4003_v60 }
0x17c4   :  { %v3860_v20 = vrot.slane %v3855_v10, 1  ;;  %v3861_v50 = vrot.slane %v3855_v10, 2  ;;  %v3883_v10 = vrot.slane %v8873_v39, 7  ;;  %v4202_v39 = vld [vmem:[#allocation27 + $0x8] sm:$0xff] }
0x17c5   :  { %v7197_v3 = vpop.f32.mrf.mxu0  ;;  %7210 = vmatprep.subr.mxu1 %v4202_v39 }
0x17c6   :  { %v3864_v12 = vadd.f32 %v3860_v20, %v8488_v7  ;;  %v3865_v13 = vadd.f32 %v3861_v50, %v8480_v57  ;;  %7211 = vmatpush3.msra.mxu1 %v4202_v39 }
0x17c8   :  { %7553 = vtanh.f32 %v3864_v12  ;;  %v6705_v7 = vmul.f32 -1.442695, %v3864_v12  ;;  %v6706_v57 = vmul.f32 -1.442695, %v3865_v13 }
0x17c9   :  { %7555 = vtanh.f32 %v3865_v13 }
0x17ca   :  { %7557 = vpow2.f32 %v6708_v17  ;;  %v4111_v17 = vld [vmem:[%s9395_s14] sm:$0xff] }
0x17cb   :  { %7559 = vpow2.f32 %v6709_v29 }
0x17cc   :  { %7561 = vpow2.f32 %v6705_v7 }
0x17cd   :  { %7563 = vpow2.f32 %v6706_v57 }
0x17ce   :  { %v7550_v6 = vpop.eup %7549 }
0x17cf   :  { %4028 = vrot.lane.b32.xlu0 %v7550_v6, %s8223_s12 }
0x17d0   :  { %v7552_v45 = vpop.eup %7551 }
0x17d1   :  { %4030 = vrot.lane.b32.xlu1 %v7552_v45, %s8223_s12 }
0x17d5   :  { %v7554_v1 = vpop.eup %7553 }
0x17d6   :  { %v7556_v5 = vpop.eup %7555  ;;  %3890 = vrot.lane.b32.xlu0 %v7554_v1, %s8223_s12  ;;  %v4112_v1 = vld [vmem:[%s9395_s14 + $0x8] sm:$0xff] }
0x17d7   :  { %3892 = vrot.lane.b32.xlu1 %v7556_v5, %s8223_s12  ;;  %v7558_v14 = vpop.eup %7557  ;;  %7203 = vmatprep.subr.mxu0 %v4112_v1  ;;  %v4201_v5 = vld [vmem:[#allocation27] sm:$0xff] }
0x17d8   :  { %v7560_v22 = vpop.eup %7559  ;;  %v4010_v33 = vadd.f32 1.0, %v7558_v14  ;;  %7204 = vmatpush3.msra.mxu0 %v4112_v1  ;;  %7212 = vmatprep.subr.mxu1 %v4201_v5 }
0x17d9   :  { %v4011_v18 = vadd.f32 1.0, %v7560_v22  ;;  %v7562_v34 = vpop.eup %7561  ;;  %7205 = vmatprep.subr.mxu0 %v4111_v17  ;;  %7213 = vmatpush3.msra.mxu1 %v4201_v5 }
0x17da   :  { %7565 = vrcp.f32 %v4010_v33  ;;  %v7564_v9 = vpop.eup %7563  ;;  %v3872_v30 = vadd.f32 1.0, %v7562_v34  ;;  %7206 = vmatpush3.msra.mxu0 %v4111_v17  ;;  %7222 = vmatprep.subr.mxu1 %v8221_v0 }
0x17db   :  { %7567 = vrcp.f32 %v4011_v18  ;;  %v3873_v42 = vadd.f32 1.0, %v7564_v9  ;;  %7217 = vmatprep.subr.mxu0 %v8221_v0 }
0x17dc   :  { %7569 = vrcp.f32 %v3872_v30 }
0x17dd   :  { %7571 = vrcp.f32 %v3873_v42 }
0x17e7   :  { %v7566_v52 = vpop.eup %7565 }
0x17e8   :  { %v7568_v24 = vpop.eup %7567  ;;  %v4024_v47 = vmul.f32 %v7566_v52, %v4020_v15 }
0x17e9   :  { %v8911_v37 = vpop.eup %7569  ;;  %v4025_v56 = vmul.f32 %v7568_v24, %v4021_v54 }
0x17ea   :  { %v8913_v38 = vpop.eup %7571  ;;  %v3886_v20 = vmul.f32 %v8911_v37, %v3882_v36 }
0x17eb   :  { %v3887_v3 = vmul.f32 %v8913_v38, %v3883_v10 }
0x1841   :  { %v4029_v41 = vpop.permute.xlu0 %4028 }
0x1842   :  { %v4034_v23 = vmul.f32 %v7566_v52, %v4029_v41 }
0x1843   :  { %v4031_v27 = vpop.permute.xlu1 %4030 }
0x1844   :  { %4038 = vrot.lane.b32.xlu0 %v4034_v23, %s8212_s23  ;;  %v4035_v35 = vmul.f32 %v7568_v24, %v4031_v27  ;;  %v8983_v27 = vld [vmem:[#allocation24] sm:$0xff] }
0x1846   :  { %4040 = vrot.lane.b32.xlu1 %v4035_v35, %s8212_s23 }
0x1848   :  { %v3891_v40 = vpop.permute.xlu0 %3890 }
0x1849   :  { %v3896_v4 = vmul.f32 %v8911_v37, %v3891_v40  ;;  %v3893_v16 = vpop.permute.xlu1 %3892 }
0x184a   :  { %v3897_v43 = vmul.f32 %v8913_v38, %v3893_v16 }
0x184b   :  { %3900 = vrot.lane.b32.xlu0 %v3896_v4, %s8212_s23 }
0x184c   :  { %3902 = vrot.lane.b32.xlu1 %v3897_v43, %s8212_s23  ;;  %v6713_v43 = vld [vmem:[%s9400_s19] ss:$0 sm:$0xff] }
0x18b6   :  { %v4039_v26 = vpop.permute.xlu0 %4038 }
0x18b7   :  { %v4044_v55 = vadd.f32 %v4039_v26, %v4024_v47 }
0x18b8   :  { %v4041_v63 = vpop.permute.xlu1 %4040 }
0x18b9   :  { %7573 = vtanh.f32 %v4044_v55  ;;  %v4045_v60 = vadd.f32 %v4041_v63, %v4025_v56  ;;  %v6710_v56 = vld [vmem:[#allocation26] ss:$0 sm:$0xff] }
0x18bb   :  { %7575 = vtanh.f32 %v4045_v60 }
0x18bd   :  { %v3901_v50 = vpop.permute.xlu0 %3900 }
0x18be   :  { %v3906_v49 = vadd.f32 %v3901_v50, %v3886_v20  ;;  %v3903_v12 = vpop.permute.xlu1 %3902 }
0x18bf   :  { %v3907_v13 = vadd.f32 %v3903_v12, %v3887_v3 }
0x18c0   :  { %7577 = vtanh.f32 %v3906_v49 }
0x18c1   :  { %7579 = vtanh.f32 %v3907_v13 }
0x18c6   :  { %v7574_v61 = vpop.eup %7573 }
0x18c7   :  { %4050 = vrot.lane.b32.xlu0 %v7574_v61, %s8202_s24 }
0x18c8   :  { %v7576_v6 = vpop.eup %7575 }
0x18c9   :  { %4052 = vrot.lane.b32.xlu1 %v7576_v6, %s8202_s24 }
0x18cd   :  { %v7578_v46 = vpop.eup %7577 }
0x18ce   :  { %v7580_v45 = vpop.eup %7579  ;;  %3912 = vrot.lane.b32.xlu0 %v7578_v46, %s8202_s24 }
0x18cf   :  { %3914 = vrot.lane.b32.xlu1 %v7580_v45, %s8202_s24 }
0x1939   :  { %v4051_v29 = vpop.permute.xlu0 %4050 }
0x193a   :  { %v4056_v7 = vmul.f32 %v7566_v52, %v4051_v29 }
0x193b   :  { %v4053_v14 = vpop.permute.xlu1 %4052 }
0x193c   :  { %v4079_v57 = vsel %vm4058_vm6, %v4056_v7, %v8881_v31  ;;  %v4057_v33 = vmul.f32 %v7568_v24, %v4053_v14 }
0x193d   :  { %v4081_v22 = vsel %vm4061_vm7, %v4079_v57, %v8823_v44 }
0x193e   :  { %v4083_v18 = vsel %vm4064_vm8, %v4081_v22, %v8756_v2  ;;  %v4080_v34 = vsel %vm4058_vm6, %v4057_v33, %v8883_v32 }
0x193f   :  { %v4085_v9 = vsel %vm4067_vm9, %v4083_v18, %v8696_v25  ;;  %v4082_v31 = vsel %vm4061_vm7, %v4080_v34, %v8825_v51 }
0x1940   :  { %v3913_v30 = vpop.permute.xlu0 %3912  ;;  %v4087_v42 = vsel %vm4070_vm10, %v4085_v9, %v8632_v48  ;;  %v4084_v44 = vsel %vm4064_vm8, %v4082_v31, %v8758_v8 }
0x1941   :  { %v3918_v52 = vmul.f32 %v8911_v37, %v3913_v30  ;;  %v3915_v2 = vpop.permute.xlu1 %3914  ;;  %v4089_v32 = vsel %vm4073_vm11, %v4087_v42, %v8574_v19  ;;  %v4086_v25 = vsel %vm4067_vm9, %v4084_v44, %v8698_v28 }
0x1942   :  { %v4091_v41 = vsel %vm4076_vm12, %v4089_v32, %v8516_v58  ;;  %v3919_v51 = vmul.f32 %v8913_v38, %v3915_v2  ;;  %v4088_v8 = vsel %vm4070_vm10, %v4086_v25, %v8634_v53 }
0x1943   :  { %v4077_v48 = vsel %vm4076_vm12, %v8891_v59, %v3918_v52  ;;  %4103 = vrot.lane.b32.xlu1 %v4091_v41, %s8223_s12  ;;  %v4090_v19 = vsel %vm4073_vm11, %v4088_v8, %v8576_v21 }
0x1944   :  { %4095 = vrot.lane.b32.xlu0 %v4077_v48, %s8224_s7  ;;  %v4092_v58 = vsel %vm4076_vm12, %v4090_v19, %v8520_v62  ;;  %v4078_v28 = vsel %vm4076_vm12, %v8895_v11, %v3919_v51  ;;  %v8981_v62 = vld [vmem:[%s9399_s18] sm:$0xff] }
0x1947   :  { %4105 = vrot.lane.b32.xlu1 %v4092_v58, %s8223_s12 }
0x1948   :  { %4097 = vrot.lane.b32.xlu0 %v4078_v28, %s8224_s7 }
0x19b5   :  { %v4104_v59 = vpop.permute.xlu1 %4103 }
0x19b6   :  { %v4096_v23 = vpop.permute.xlu0 %4095 }
0x19b7   :  { %v4109_v24 = vsel %vm1849_vm5, %v4096_v23, %v4104_v59 }
0x19b8   :  { %7207 = vmatprep.mubr.msk.f32.mxu0 %vm292_vm1, %v4109_v24  ;;  %7214 = vmatprep.mubr.msk.f32.mxu1 %vm292_vm1, %v4109_v24 }
0x19b9   :  { %v4106_v53 = vpop.permute.xlu1 %4105 }
0x19ba   :  { %v4098_v21 = vpop.permute.xlu0 %4097 }
0x19bb   :  { %v4110_v11 = vsel %vm1849_vm5, %v4098_v21, %v4106_v53 }
0x19bc   :  { %7208 = vmatmul.mubr.msk.f32.vlgmr.msra.gmra.mxu0 %vm292_vm1, %v4110_v11  ;;  %7215 = vmatmul.mubr.msk.f32.vlgmr.msra.gmra.mxu1 %vm292_vm1, %v4110_v11 }
0x19bd   :  { %7223 = vmatpush3.msra.mxu1 %v8981_v62  ;;  %7218 = vmatpush3.msra.mxu0 %v8983_v27 }
0x19be   :  { %7219 = vmatprep.mubr.msk.f32.mxu0 %vm8222_vm3, %v8221_v0  ;;  %7224 = vmatprep.mubr.msk.f32.mxu1 %vm8222_vm3, %v8221_v0 }
0x19bf   :  { %7232 = vmatprep.subr.mxu1 %v8221_v0  ;;  %7227 = vmatprep.subr.mxu0 %v8221_v0 }
0x19c0   :  { %7220 = vmatmul.mubr.f32.vlgmr.msra.gmra.mxu0 %v8221_v0  ;;  %7225 = vmatmul.mubr.f32.vlgmr.msra.gmra.mxu1 %v8221_v0 }
0x19c1   :  { %7233 = vmatpush3.msra.mxu1 %v8981_v62  ;;  %7234 = vmatprep.mubr.msk.f32.mxu1 %vm8222_vm3, %v8221_v0 }
0x19c2   :  { %7228 = vmatpush3.msra.mxu0 %v8983_v27  ;;  %7229 = vmatprep.mubr.msk.f32.mxu0 %vm8222_vm3, %v8221_v0 }
0x19c3   :  { %7242 = vmatprep.subr.mxu1 %v8221_v0  ;;  %7237 = vmatprep.subr.mxu0 %v8221_v0 }
0x1a7c   :  { %v7209_v35 = vpop.f32.mrf.mxu0  ;;  %v7216_v37 = vpop.f32.mrf.mxu1 }
0x1a7d   :  { %v9011_v63 = vadd.f32 %v7216_v37, %v6713_v43  ;;  %v9017_v50 = vadd.f32 %v7209_v35, %v6710_v56 }
0x1a7e   :  { %v4192_v40 = vpop.f32.mrf.mxu0  ;;  %v4276_v38 = vpop.f32.mrf.mxu1 }
0x1a7f   :  { %v9009_v55 = vadd.f32 %v6713_v43, %v4276_v38  ;;  %v9014_v10 = vadd.f32 %v6710_v56, %v4192_v40 }
0x1a80   :  { %v4352_v4 = vpop.f32.mrf.mxu0  ;;  %v4477_v16 = vpop.f32.mrf.mxu1 }
0x1a81   :  { %v4482_v15 = vrot.slane %v4477_v16, 1  ;;  %v4483_v26 = vrot.slane %v4477_v16, 2  ;;  %v4357_v36 = vrot.slane %v4352_v4, 1  ;;  %v4360_v49 = vadd.f32 %v4352_v4, %v9014_v10 }
0x1a82   :  { %v7226_v47 = vpop.f32.mrf.mxu1  ;;  %v7221_v54 = vpop.f32.mrf.mxu0 }
0x1a83   :  { %v4486_v60 = vadd.f32 %v4482_v15, %v9009_v55  ;;  %v4487_v20 = vadd.f32 %v4483_v26, %v9011_v63  ;;  %v4361_v3 = vadd.f32 %v4357_v36, %v9017_v50  ;;  %v6716_v1 = vmul.f32 -1.442695, %v4360_v49 }
0x1a85   :  { %7581 = vtanh.f32 %v4486_v60  ;;  %v6718_v46 = vmul.f32 -1.442695, %v4486_v60  ;;  %v6719_v45 = vmul.f32 -1.442695, %v4487_v20  ;;  %v6717_v39 = vmul.f32 -1.442695, %v4361_v3 }
0x1a86   :  { %7583 = vtanh.f32 %v4487_v20 }
0x1a87   :  { %7585 = vtanh.f32 %v4361_v3 }
0x1a88   :  { %7587 = vtanh.f32 %v4360_v49 }
0x1a89   :  { %7589 = vpow2.f32 %v6718_v46 }
0x1a8a   :  { %7591 = vpow2.f32 %v6719_v45 }
0x1a8b   :  { %7593 = vpow2.f32 %v6717_v39 }
0x1a8c   :  { %7595 = vpow2.f32 %v6716_v1 }
0x1a92   :  { %v7582_v12 = vpop.eup %7581 }
0x1a93   :  { %v7584_v13 = vpop.eup %7583  ;;  %4506 = vrot.lane.b32.xlu0 %v7582_v12, %s8223_s12 }
0x1a94   :  { %4508 = vrot.lane.b32.xlu1 %v7584_v13, %s8223_s12  ;;  %v7586_v61 = vpop.eup %7585 }
0x1a95   :  { %v7588_v6 = vpop.eup %7587 }
0x1a96   :  { %v7590_v5 = vpop.eup %7589 }
0x1a97   :  { %4382 = vrot.lane.b32.xlu0 %v7586_v61, %s8223_s12  ;;  %v7592_v17 = vpop.eup %7591  ;;  %v4494_v29 = vadd.f32 1.0, %v7590_v5 }
0x1a98   :  { %4380 = vrot.lane.b32.xlu1 %v7588_v6, %s8223_s12  ;;  %v7594_v7 = vpop.eup %7593  ;;  %v4495_v57 = vadd.f32 1.0, %v7592_v17 }
0x1a99   :  { %v7596_v14 = vpop.eup %7595  ;;  %v4369_v22 = vadd.f32 1.0, %v7594_v7  ;;  %7597 = vrcp.f32 %v4494_v29 }
0x1a9a   :  { %v4368_v33 = vadd.f32 1.0, %v7596_v14  ;;  %7599 = vrcp.f32 %v4495_v57 }
0x1a9b   :  { %7601 = vrcp.f32 %v4369_v22 }
0x1a9c   :  { %7603 = vrcp.f32 %v4368_v33 }
0x1aa6   :  { %v7598_v18 = vpop.eup %7597 }
0x1aa7   :  { %v7600_v9 = vpop.eup %7599  ;;  %v4502_v51 = vmul.f32 0.0, %v7598_v18 }
0x1aa8   :  { %v7602_v44 = vpop.eup %7601  ;;  %v4503_v8 = vmul.f32 0.0, %v7600_v9 }
0x1aa9   :  { %v7604_v2 = vpop.eup %7603  ;;  %v4377_v59 = vmul.f32 0.0, %v7602_v44 }
0x1aaa   :  { %v4376_v24 = vmul.f32 0.0, %v7604_v2 }
0x1b05   :  { %v4507_v34 = vpop.permute.xlu0 %4506 }
0x1b06   :  { %v4509_v31 = vpop.permute.xlu1 %4508  ;;  %v4512_v30 = vmul.f32 %v7598_v18, %v4507_v34 }
0x1b07   :  { %v4513_v42 = vmul.f32 %v7600_v9, %v4509_v31 }
0x1b08   :  { %4516 = vrot.lane.b32.xlu0 %v4512_v30, %s8212_s23 }
0x1b09   :  { %4518 = vrot.lane.b32.xlu1 %v4513_v42, %s8212_s23  ;;  %v4383_v52 = vpop.permute.xlu0 %4382 }
0x1b0a   :  { %v4387_v32 = vmul.f32 %v7602_v44, %v4383_v52  ;;  %v4381_v41 = vpop.permute.xlu1 %4380 }
0x1b0b   :  { %v4386_v25 = vmul.f32 %v7604_v2, %v4381_v41 }
0x1b0c   :  { %4392 = vrot.lane.b32.xlu0 %v4387_v32, %s8212_s23 }
0x1b0d   :  { %4390 = vrot.lane.b32.xlu1 %v4386_v25, %s8212_s23 }
0x1b7a   :  { %v4517_v48 = vpop.permute.xlu0 %4516 }
0x1b7b   :  { %v9029_v19 = vadd.f32 %v4517_v48, %v4502_v51  ;;  %v4519_v58 = vpop.permute.xlu1 %4518 }
0x1b7c   :  { %v9031_v28 = vadd.f32 %v4519_v58, %v4503_v8 }
0x1b7d   :  { %7605 = vtanh.f32 %v9029_v19 }
0x1b7e   :  { %7607 = vtanh.f32 %v9031_v28  ;;  %v4393_v23 = vpop.permute.xlu0 %4392 }
0x1b7f   :  { %v9035_v53 = vadd.f32 %v4393_v23, %v4377_v59  ;;  %v4391_v21 = vpop.permute.xlu1 %4390 }
0x1b80   :  { %v9037_v11 = vadd.f32 %v4391_v21, %v4376_v24 }
0x1b81   :  { %7609 = vtanh.f32 %v9035_v53 }
0x1b82   :  { %7611 = vtanh.f32 %v9037_v11 }
0x1b8a   :  { %v7606_v35 = vpop.eup %7605 }
0x1b8b   :  { %v7608_v37 = vpop.eup %7607  ;;  %4528 = vrot.lane.b32.xlu0 %v7606_v35, %s8202_s24 }
0x1b8c   :  { %4530 = vrot.lane.b32.xlu1 %v7608_v37, %s8202_s24 }
0x1b8e   :  { %v7610_v40 = vpop.eup %7609 }
0x1b8f   :  { %v7612_v38 = vpop.eup %7611  ;;  %4404 = vrot.lane.b32.xlu0 %v7610_v40, %s8202_s24 }
0x1b90   :  { %4402 = vrot.lane.b32.xlu1 %v7612_v38, %s8202_s24 }
0x1bfd   :  { %v4529_v4 = vpop.permute.xlu0 %4528 }
0x1bfe   :  { %v4534_v16 = vmul.f32 %v7598_v18, %v4529_v4  ;;  %v4531_v43 = vpop.permute.xlu1 %4530 }
0x1bff   :  { %v4535_v15 = vmul.f32 %v7600_v9, %v4531_v43  ;;  %v4777_v43 = vrot.slane %v9031_v28, 1 }
0x1c00   :  { %v4676_v47 = vrot.slane %v4534_v16, 7  ;;  %v4776_v16 = vrot.slane %v9029_v19, 1 }
0x1c01   :  { %v4677_v54 = vrot.slane %v4535_v15, 6  ;;  %v4405_v26 = vpop.permute.xlu0 %4404 }
0x1c02   :  { %v4409_v56 = vmul.f32 %v7602_v44, %v4405_v26  ;;  %v4403_v36 = vpop.permute.xlu1 %4402 }
0x1c03   :  { %v4678_v60 = vsel %vm2106_vm4, %v4677_v54, %v4676_v47  ;;  %v4408_v3 = vmul.f32 %v7604_v2, %v4403_v36 }
0x1c04   :  { %v4538_v20 = vrot.slane %v4409_v56, 7  ;;  %4679 = vrot.lane.b32.xlu0 %v4678_v60, %s8224_s7  ;;  %v4636_v60 = vrot.slane %v9037_v11, 7 }
0x1c06   :  { %v4539_v49 = vsel %vm2106_vm4, %v4538_v20, %v4408_v3  ;;  %v4637_v20 = vrot.slane %v9035_v53, 7 }
0x1c07   :  { %4540 = vrot.lane.b32.xlu1 %v4539_v49, %s8224_s7 }
0x1c76   :  { %v4680_v12 = vpop.permute.xlu0 %4679 }
0x1c77   :  { %7235 = vmatmul.mubr.msk.f32.vlgmr.msra.gmra.mxu1 %vm1849_vm5, %v4680_v12 }
0x1c78   :  { %7243 = vmatpush3.msra.mxu1 %v8981_v62  ;;  %7244 = vmatprep.mubr.msk.f32.mxu1 %vm8222_vm3, %v8221_v0 }
0x1c79   :  { %v4541_v13 = vpop.permute.xlu1 %4540  ;;  %7252 = vmatprep.subr.mxu1 %v8221_v0 }
0x1c7a   :  { %7230 = vmatmul.mubr.msk.f32.vlgmr.msra.gmra.mxu0 %vm1849_vm5, %v4541_v13 }
0x1c7b   :  { %7238 = vmatpush3.msra.mxu0 %v8983_v27  ;;  %7239 = vmatprep.mubr.msk.f32.mxu0 %vm8222_vm3, %v8221_v0 }
0x1c7c   :  { %7247 = vmatprep.subr.mxu0 %v8221_v0 }
0x1d37   :  { %v4749_v61 = vpop.f32.mrf.mxu1 }
0x1d38   :  { %v4754_v6 = vrot.slane %v4749_v61, 2  ;;  %v4755_v46 = vrot.slane %v4749_v61, 3 }
0x1d39   :  { %v7236_v45 = vpop.f32.mrf.mxu1 }
0x1d3a   :  { %v4758_v39 = vadd.f32 %v4754_v6, %v9009_v55  ;;  %v4759_v1 = vadd.f32 %v4755_v46, %v9011_v63  ;;  %v4610_v5 = vpop.f32.mrf.mxu0 }
0x1d3b   :  { %v4615_v17 = vrot.slane %v4610_v5, 7  ;;  %v4619_v57 = vadd.f32 %v4610_v5, %v9017_v50 }
0x1d3c   :  { %7613 = vtanh.f32 %v4758_v39  ;;  %v7231_v29 = vpop.f32.mrf.mxu0  ;;  %v6724_v34 = vmul.f32 -1.442695, %v4758_v39  ;;  %v6725_v9 = vmul.f32 -1.442695, %v4759_v1 }
0x1d3d   :  { %7615 = vtanh.f32 %v4759_v1  ;;  %v4618_v7 = vadd.f32 %v4615_v17, %v9014_v10  ;;  %v6722_v30 = vmul.f32 -1.442695, %v4619_v57 }
0x1d3f   :  { %7617 = vtanh.f32 %v4618_v7  ;;  %v6721_v31 = vmul.f32 -1.442695, %v4618_v7 }
0x1d40   :  { %7619 = vtanh.f32 %v4619_v57 }
0x1d41   :  { %7621 = vpow2.f32 %v6724_v34 }
0x1d42   :  { %7623 = vpow2.f32 %v6725_v9 }
0x1d43   :  { %7625 = vpow2.f32 %v6721_v31 }
0x1d44   :  { %7627 = vpow2.f32 %v6722_v30 }
0x1d49   :  { %v7614_v14 = vpop.eup %7613 }
0x1d4a   :  { %v7616_v22 = vpop.eup %7615  ;;  %4784 = vrot.lane.b32.xlu0 %v7614_v14, %s8223_s12 }
0x1d4b   :  { %4786 = vrot.lane.b32.xlu1 %v7616_v22, %s8223_s12 }
0x1d4c   :  { %v7618_v33 = vpop.eup %7617 }
0x1d4d   :  { %v7620_v18 = vpop.eup %7619 }
0x1d4e   :  { %4644 = vrot.lane.b32.xlu0 %v7618_v33, %s8223_s12  ;;  %v7622_v42 = vpop.eup %7621 }
0x1d4f   :  { %4646 = vrot.lane.b32.xlu1 %v7620_v18, %s8223_s12  ;;  %v7624_v44 = vpop.eup %7623  ;;  %v4766_v52 = vadd.f32 1.0, %v7622_v42 }
0x1d50   :  { %v4767_v2 = vadd.f32 1.0, %v7624_v44  ;;  %v7626_v32 = vpop.eup %7625 }
0x1d51   :  { %v7628_v41 = vpop.eup %7627  ;;  %7629 = vrcp.f32 %v4766_v52  ;;  %v4626_v25 = vadd.f32 1.0, %v7626_v32 }
0x1d52   :  { %7631 = vrcp.f32 %v4767_v2  ;;  %v4627_v51 = vadd.f32 1.0, %v7628_v41 }
0x1d53   :  { %7633 = vrcp.f32 %v4626_v25 }
0x1d54   :  { %7635 = vrcp.f32 %v4627_v51 }
0x1d5e   :  { %v7630_v48 = vpop.eup %7629 }
0x1d5f   :  { %v7632_v58 = vpop.eup %7631  ;;  %v4780_v15 = vmul.f32 %v7630_v48, %v4776_v16 }
0x1d60   :  { %v7634_v21 = vpop.eup %7633  ;;  %v4781_v54 = vmul.f32 %v7632_v58, %v4777_v43 }
0x1d61   :  { %v7636_v37 = vpop.eup %7635  ;;  %v4640_v3 = vmul.f32 %v7634_v21, %v4636_v60 }
0x1d62   :  { %v4641_v49 = vmul.f32 %v7636_v37, %v4637_v20 }
0x1dbc   :  { %v4785_v8 = vpop.permute.xlu0 %4784 }
0x1dbd   :  { %v4790_v59 = vmul.f32 %v7630_v48, %v4785_v8  ;;  %v4787_v23 = vpop.permute.xlu1 %4786 }
0x1dbe   :  { %v4791_v24 = vmul.f32 %v7632_v58, %v4787_v23 }
0x1dbf   :  { %4794 = vrot.lane.b32.xlu0 %v4790_v59, %s8212_s23 }
0x1dc0   :  { %4796 = vrot.lane.b32.xlu1 %v4791_v24, %s8212_s23  ;;  %v4645_v35 = vpop.permute.xlu0 %4644 }
0x1dc1   :  { %v4650_v40 = vmul.f32 %v7634_v21, %v4645_v35  ;;  %v4647_v38 = vpop.permute.xlu1 %4646 }
0x1dc2   :  { %v4651_v4 = vmul.f32 %v7636_v37, %v4647_v38 }
0x1dc3   :  { %4654 = vrot.lane.b32.xlu0 %v4650_v40, %s8212_s23 }
0x1dc4   :  { %4656 = vrot.lane.b32.xlu1 %v4651_v4, %s8212_s23 }
0x1e31   :  { %v4795_v47 = vpop.permute.xlu0 %4794 }
0x1e32   :  { %v9073_v26 = vadd.f32 %v4795_v47, %v4780_v15  ;;  %v4797_v56 = vpop.permute.xlu1 %4796 }
0x1e33   :  { %v9075_v36 = vadd.f32 %v4797_v56, %v4781_v54 }
0x1e34   :  { %7637 = vtanh.f32 %v9073_v26 }
0x1e35   :  { %7639 = vtanh.f32 %v9075_v36  ;;  %v4655_v19 = vpop.permute.xlu0 %4654 }
0x1e36   :  { %v9081_v28 = vadd.f32 %v4655_v19, %v4640_v3  ;;  %v4657_v12 = vpop.permute.xlu1 %4656 }
0x1e37   :  { %v9083_v13 = vadd.f32 %v4657_v12, %v4641_v49 }
0x1e38   :  { %7641 = vtanh.f32 %v9081_v28 }
0x1e39   :  { %7643 = vtanh.f32 %v9083_v13 }
0x1e41   :  { %v7638_v61 = vpop.eup %7637 }
0x1e42   :  { %v7640_v11 = vpop.eup %7639  ;;  %4806 = vrot.lane.b32.xlu0 %v7638_v61, %s8202_s24 }
0x1e43   :  { %4808 = vrot.lane.b32.xlu1 %v7640_v11, %s8202_s24 }
0x1e45   :  { %v7642_v53 = vpop.eup %7641 }
0x1e46   :  { %v7644_v6 = vpop.eup %7643  ;;  %4666 = vrot.lane.b32.xlu0 %v7642_v53, %s8202_s24 }
0x1e47   :  { %4668 = vrot.lane.b32.xlu1 %v7644_v6, %s8202_s24 }
0x1eb4   :  { %v4807_v46 = vpop.permute.xlu0 %4806 }
0x1eb5   :  { %v4812_v45 = vmul.f32 %v7630_v48, %v4807_v46  ;;  %v4809_v39 = vpop.permute.xlu1 %4808 }
0x1eb6   :  { %v4813_v1 = vmul.f32 %v7632_v58, %v4809_v39  ;;  %v5055_v39 = vrot.slane %v9073_v26, 1 }
0x1eb7   :  { %v4955_v5 = vrot.slane %v4812_v45, 6 }
0x1eb8   :  { %v4956_v17 = vrot.slane %v4813_v1, 5  ;;  %v4667_v29 = vpop.permute.xlu0 %4666  ;;  %v5056_v1 = vrot.slane %v9075_v36, 1 }
0x1eb9   :  { %v4672_v57 = vmul.f32 %v7634_v21, %v4667_v29  ;;  %v4669_v14 = vpop.permute.xlu1 %4668 }
0x1eba   :  { %v4957_v7 = vsel %vm2106_vm4, %v4956_v17, %v4955_v5  ;;  %v4673_v33 = vmul.f32 %v7636_v37, %v4669_v14  ;;  %v4915_v14 = vrot.slane %v9081_v28, 7 }
0x1ebb   :  { %4958 = vrot.lane.b32.xlu0 %v4957_v7, %s8224_s7  ;;  %v4816_v22 = vrot.slane %v4672_v57, 1 }
0x1ebd   :  { %v4817_v18 = vsel %vm2106_vm4, %v4673_v33, %v4816_v22  ;;  %v4916_v33 = vrot.slane %v9083_v13, 7 }
0x1ebe   :  { %4818 = vrot.lane.b32.xlu1 %v4817_v18, %s8224_s7 }
0x1f2d   :  { %v4959_v34 = vpop.permute.xlu0 %4958 }
0x1f2e   :  { %7245 = vmatmul.mubr.msk.f32.vlgmr.msra.gmra.mxu1 %vm1849_vm5, %v4959_v34 }
0x1f2f   :  { %7253 = vmatpush3.msra.mxu1 %v8981_v62  ;;  %7254 = vmatprep.mubr.msk.f32.mxu1 %vm8222_vm3, %v8221_v0 }
0x1f30   :  { %7262 = vmatprep.subr.mxu1 %v8221_v0  ;;  %v4819_v9 = vpop.permute.xlu1 %4818 }
0x1f31   :  { %7240 = vmatmul.mubr.msk.f32.vlgmr.msra.gmra.mxu0 %vm1849_vm5, %v4819_v9 }
0x1f32   :  { %7248 = vmatpush3.msra.mxu0 %v8983_v27  ;;  %7249 = vmatprep.mubr.msk.f32.mxu0 %vm8222_vm3, %v8221_v0 }
0x1f33   :  { %7257 = vmatprep.subr.mxu0 %v8221_v0 }
0x1fee   :  { %v5028_v31 = vpop.f32.mrf.mxu1 }
0x1fef   :  { %v5033_v30 = vrot.slane %v5028_v31, 3  ;;  %v5034_v42 = vrot.slane %v5028_v31, 4 }
0x1ff0   :  { %v7246_v44 = vpop.f32.mrf.mxu1 }
0x1ff1   :  { %v5037_v52 = vadd.f32 %v5033_v30, %v9009_v55  ;;  %v5038_v2 = vadd.f32 %v5034_v42, %v9011_v63  ;;  %v4888_v32 = vpop.f32.mrf.mxu0 }
0x1ff2   :  { %v4893_v41 = vrot.slane %v4888_v32, 6  ;;  %v4894_v25 = vrot.slane %v4888_v32, 7 }
0x1ff3   :  { %7645 = vtanh.f32 %v5037_v52  ;;  %v7241_v51 = vpop.f32.mrf.mxu0  ;;  %v6730_v21 = vmul.f32 -1.442695, %v5037_v52  ;;  %v6731_v35 = vmul.f32 -1.442695, %v5038_v2 }
0x1ff4   :  { %7647 = vtanh.f32 %v5038_v2  ;;  %v4897_v48 = vadd.f32 %v4893_v41, %v9014_v10  ;;  %v4898_v8 = vadd.f32 %v4894_v25, %v9017_v50 }
0x1ff6   :  { %7649 = vtanh.f32 %v4897_v48  ;;  %v6727_v37 = vmul.f32 -1.442695, %v4897_v48  ;;  %v6728_v40 = vmul.f32 -1.442695, %v4898_v8 }
0x1ff7   :  { %7651 = vtanh.f32 %v4898_v8 }
0x1ff8   :  { %7653 = vpow2.f32 %v6730_v21 }
0x1ff9   :  { %7655 = vpow2.f32 %v6731_v35 }
0x1ffa   :  { %7657 = vpow2.f32 %v6727_v37 }
0x1ffb   :  { %7659 = vpow2.f32 %v6728_v40 }
0x2000   :  { %v7646_v58 = vpop.eup %7645 }
0x2001   :  { %v7648_v59 = vpop.eup %7647  ;;  %5063 = vrot.lane.b32.xlu0 %v7646_v58, %s8223_s12 }
0x2002   :  { %5065 = vrot.lane.b32.xlu1 %v7648_v59, %s8223_s12 }
0x2003   :  { %v7650_v23 = vpop.eup %7649 }
0x2004   :  { %v7652_v24 = vpop.eup %7651 }
0x2005   :  { %4923 = vrot.lane.b32.xlu0 %v7650_v23, %s8223_s12  ;;  %v7654_v38 = vpop.eup %7653 }
0x2006   :  { %4925 = vrot.lane.b32.xlu1 %v7652_v24, %s8223_s12  ;;  %v7656_v4 = vpop.eup %7655  ;;  %v5045_v16 = vadd.f32 1.0, %v7654_v38 }
0x2007   :  { %v5046_v43 = vadd.f32 1.0, %v7656_v4  ;;  %v7658_v15 = vpop.eup %7657 }
0x2008   :  { %v7660_v47 = vpop.eup %7659  ;;  %7661 = vrcp.f32 %v5045_v16  ;;  %v4905_v54 = vadd.f32 1.0, %v7658_v15 }
0x2009   :  { %7663 = vrcp.f32 %v5046_v43  ;;  %v4906_v56 = vadd.f32 1.0, %v7660_v47 }
0x200a   :  { %7665 = vrcp.f32 %v4905_v54 }
0x200b   :  { %7667 = vrcp.f32 %v4906_v56 }
0x2015   :  { %v7662_v60 = vpop.eup %7661 }
0x2016   :  { %v7664_v3 = vpop.eup %7663  ;;  %v5059_v5 = vmul.f32 %v7662_v60, %v5055_v39 }
0x2017   :  { %v7666_v61 = vpop.eup %7665  ;;  %v5060_v29 = vmul.f32 %v7664_v3, %v5056_v1 }
0x2018   :  { %v7668_v53 = vpop.eup %7667  ;;  %v4919_v18 = vmul.f32 %v7666_v61, %v4915_v14 }
0x2019   :  { %v4920_v34 = vmul.f32 %v7668_v53, %v4916_v33 }
0x2073   :  { %v5064_v20 = vpop.permute.xlu0 %5063 }
0x2074   :  { %v5069_v19 = vmul.f32 %v7662_v60, %v5064_v20  ;;  %v5066_v49 = vpop.permute.xlu1 %5065 }
0x2075   :  { %v5070_v12 = vmul.f32 %v7664_v3, %v5066_v49 }
0x2076   :  { %5073 = vrot.lane.b32.xlu0 %v5069_v19, %s8212_s23 }
0x2077   :  { %5075 = vrot.lane.b32.xlu1 %v5070_v12, %s8212_s23  ;;  %v4924_v11 = vpop.permute.xlu0 %4923 }
0x2078   :  { %v4929_v6 = vmul.f32 %v7666_v61, %v4924_v11  ;;  %v4926_v46 = vpop.permute.xlu1 %4925 }
0x2079   :  { %v4930_v45 = vmul.f32 %v7668_v53, %v4926_v46 }
0x207a   :  { %4933 = vrot.lane.b32.xlu0 %v4929_v6, %s8212_s23 }
0x207b   :  { %4935 = vrot.lane.b32.xlu1 %v4930_v45, %s8212_s23 }
0x20e8   :  { %v5074_v17 = vpop.permute.xlu0 %5073 }
0x20e9   :  { %v9119_v7 = vadd.f32 %v5074_v17, %v5059_v5  ;;  %v5076_v57 = vpop.permute.xlu1 %5075 }
0x20ea   :  { %v9122_v22 = vadd.f32 %v5076_v57, %v5060_v29 }
0x20eb   :  { %7669 = vtanh.f32 %v9119_v7 }
0x20ec   :  { %7671 = vtanh.f32 %v9122_v22  ;;  %v4934_v26 = vpop.permute.xlu0 %4933 }
0x20ed   :  { %v9127_v36 = vadd.f32 %v4934_v26, %v4919_v18  ;;  %v4936_v9 = vpop.permute.xlu1 %4935 }
0x20ee   :  { %v9129_v31 = vadd.f32 %v4936_v9, %v4920_v34 }
0x20ef   :  { %7673 = vtanh.f32 %v9127_v36 }
0x20f0   :  { %7675 = vtanh.f32 %v9129_v31 }
0x20f8   :  { %v7670_v28 = vpop.eup %7669 }
0x20f9   :  { %v7672_v30 = vpop.eup %7671  ;;  %5085 = vrot.lane.b32.xlu0 %v7670_v28, %s8202_s24 }
0x20fa   :  { %5087 = vrot.lane.b32.xlu1 %v7672_v30, %s8202_s24 }
0x20fc   :  { %v7674_v13 = vpop.eup %7673 }
0x20fd   :  { %v7676_v42 = vpop.eup %7675  ;;  %4945 = vrot.lane.b32.xlu0 %v7674_v13, %s8202_s24 }
0x20fe   :  { %4947 = vrot.lane.b32.xlu1 %v7676_v42, %s8202_s24 }
0x216b   :  { %v5086_v44 = vpop.permute.xlu0 %5085 }
0x216c   :  { %v5091_v52 = vmul.f32 %v7662_v60, %v5086_v44  ;;  %v5088_v2 = vpop.permute.xlu1 %5087 }
0x216d   :  { %v5092_v32 = vmul.f32 %v7664_v3, %v5088_v2 }
0x216e   :  { %v5235_v41 = vrot.slane %v5091_v52, 5 }
0x216f   :  { %v5236_v25 = vrot.slane %v5092_v32, 4  ;;  %v4946_v51 = vpop.permute.xlu0 %4945  ;;  %v5335_v32 = vrot.slane %v9119_v7, 1 }
0x2170   :  { %v4951_v48 = vmul.f32 %v7666_v61, %v4946_v51  ;;  %v4948_v8 = vpop.permute.xlu1 %4947 }
0x2171   :  { %v5237_v58 = vsel %vm2106_vm4, %v5236_v25, %v5235_v41  ;;  %v4952_v59 = vmul.f32 %v7668_v53, %v4948_v8  ;;  %v5336_v41 = vrot.slane %v9122_v22, 1 }
0x2172   :  { %5238 = vrot.lane.b32.xlu0 %v5237_v58, %s8224_s7  ;;  %v5095_v23 = vrot.slane %v4951_v48, 2 }
0x2173   :  { %v5096_v24 = vrot.slane %v4952_v59, 1  ;;  %v5195_v59 = vrot.slane %v9127_v36, 7 }
0x2175   :  { %v5097_v21 = vsel %vm2106_vm4, %v5096_v24, %v5095_v23  ;;  %v5196_v24 = vrot.slane %v9129_v31, 7 }
0x2176   :  { %5098 = vrot.lane.b32.xlu1 %v5097_v21, %s8224_s7 }
0x21e4   :  { %v5239_v35 = vpop.permute.xlu0 %5238 }
0x21e5   :  { %7255 = vmatmul.mubr.msk.f32.vlgmr.msra.gmra.mxu1 %vm1849_vm5, %v5239_v35 }
0x21e6   :  { %7263 = vmatpush3.msra.mxu1 %v8981_v62  ;;  %7264 = vmatprep.mubr.msk.f32.mxu1 %vm8222_vm3, %v8221_v0 }
0x21e7   :  { %7272 = vmatprep.subr.mxu1 %v8221_v0 }
0x21e8   :  { %v5099_v37 = vpop.permute.xlu1 %5098 }
0x21e9   :  { %7250 = vmatmul.mubr.msk.f32.vlgmr.msra.gmra.mxu0 %vm1849_vm5, %v5099_v37 }
0x21ea   :  { %7258 = vmatpush3.msra.mxu0 %v8983_v27  ;;  %7259 = vmatprep.mubr.msk.f32.mxu0 %vm8222_vm3, %v8221_v0 }
0x21eb   :  { %7267 = vmatprep.subr.mxu0 %v8221_v0 }
0x22a5   :  { %v5308_v40 = vpop.f32.mrf.mxu1 }
0x22a6   :  { %v5313_v38 = vrot.slane %v5308_v40, 4  ;;  %v5314_v4 = vrot.slane %v5308_v40, 5 }
0x22a7   :  { %v7256_v16 = vpop.f32.mrf.mxu1 }
0x22a8   :  { %v5317_v43 = vadd.f32 %v5313_v38, %v9009_v55  ;;  %v5318_v15 = vadd.f32 %v5314_v4, %v9011_v63 }
0x22a9   :  { %v5168_v47 = vpop.f32.mrf.mxu0 }
0x22aa   :  { %7677 = vtanh.f32 %v5317_v43  ;;  %v5173_v54 = vrot.slane %v5168_v47, 5  ;;  %v5174_v56 = vrot.slane %v5168_v47, 6  ;;  %v6736_v11 = vmul.f32 -1.442695, %v5317_v43 }
0x22ab   :  { %7679 = vtanh.f32 %v5318_v15  ;;  %v7251_v60 = vpop.f32.mrf.mxu0  ;;  %v6737_v53 = vmul.f32 -1.442695, %v5318_v15 }
0x22ac   :  { %v5177_v20 = vadd.f32 %v5173_v54, %v9014_v10  ;;  %v5178_v3 = vadd.f32 %v5174_v56, %v9017_v50 }
0x22ae   :  { %7681 = vtanh.f32 %v5177_v20  ;;  %v6733_v6 = vmul.f32 -1.442695, %v5177_v20  ;;  %v6734_v46 = vmul.f32 -1.442695, %v5178_v3 }
0x22af   :  { %7683 = vtanh.f32 %v5178_v3 }
0x22b0   :  { %7685 = vpow2.f32 %v6736_v11 }
0x22b1   :  { %7687 = vpow2.f32 %v6737_v53 }
0x22b2   :  { %7689 = vpow2.f32 %v6733_v6 }
0x22b3   :  { %7691 = vpow2.f32 %v6734_v46 }
0x22b7   :  { %v7678_v19 = vpop.eup %7677 }
0x22b8   :  { %v7680_v49 = vpop.eup %7679  ;;  %5343 = vrot.lane.b32.xlu0 %v7678_v19, %s8223_s12 }
0x22b9   :  { %5345 = vrot.lane.b32.xlu1 %v7680_v49, %s8223_s12 }
0x22bb   :  { %v7682_v12 = vpop.eup %7681 }
0x22bc   :  { %v7684_v61 = vpop.eup %7683  ;;  %5203 = vrot.lane.b32.xlu0 %v7682_v12, %s8223_s12 }
0x22bd   :  { %5205 = vrot.lane.b32.xlu1 %v7684_v61, %s8223_s12  ;;  %v7686_v45 = vpop.eup %7685 }
0x22be   :  { %v7688_v39 = vpop.eup %7687  ;;  %v5325_v1 = vadd.f32 1.0, %v7686_v45 }
0x22bf   :  { %v5326_v5 = vadd.f32 1.0, %v7688_v39  ;;  %v7690_v17 = vpop.eup %7689 }
0x22c0   :  { %v7692_v29 = vpop.eup %7691  ;;  %7693 = vrcp.f32 %v5325_v1  ;;  %v5185_v57 = vadd.f32 1.0, %v7690_v17 }
0x22c1   :  { %7695 = vrcp.f32 %v5326_v5  ;;  %v5186_v14 = vadd.f32 1.0, %v7692_v29 }
0x22c2   :  { %7697 = vrcp.f32 %v5185_v57 }
0x22c3   :  { %7699 = vrcp.f32 %v5186_v14 }
0x22cd   :  { %v7694_v33 = vpop.eup %7693 }
0x22ce   :  { %v7696_v26 = vpop.eup %7695  ;;  %v5339_v25 = vmul.f32 %v7694_v33, %v5335_v32 }
0x22cf   :  { %v7698_v30 = vpop.eup %7697  ;;  %v5340_v48 = vmul.f32 %v7696_v26, %v5336_v41 }
0x22d0   :  { %v7700_v42 = vpop.eup %7699  ;;  %v5199_v21 = vmul.f32 %v7698_v30, %v5195_v59 }
0x22d1   :  { %v5200_v35 = vmul.f32 %v7700_v42, %v5196_v24 }
0x232a   :  { %v5344_v18 = vpop.permute.xlu0 %5343 }
0x232b   :  { %v5349_v34 = vmul.f32 %v7694_v33, %v5344_v18  ;;  %v5346_v9 = vpop.permute.xlu1 %5345 }
0x232c   :  { %v5350_v28 = vmul.f32 %v7696_v26, %v5346_v9 }
0x232d   :  { %5353 = vrot.lane.b32.xlu0 %v5349_v34, %s8212_s23 }
0x232e   :  { %5355 = vrot.lane.b32.xlu1 %v5350_v28, %s8212_s23  ;;  %v5204_v13 = vpop.permute.xlu0 %5203 }
0x232f   :  { %v5209_v44 = vmul.f32 %v7698_v30, %v5204_v13  ;;  %v5206_v52 = vpop.permute.xlu1 %5205 }
0x2330   :  { %v5210_v2 = vmul.f32 %v7700_v42, %v5206_v52 }
0x2331   :  { %5213 = vrot.lane.b32.xlu0 %v5209_v44, %s8212_s23 }
0x2332   :  { %5215 = vrot.lane.b32.xlu1 %v5210_v2, %s8212_s23 }
0x239f   :  { %v5354_v51 = vpop.permute.xlu0 %5353 }
0x23a0   :  { %v9165_v8 = vadd.f32 %v5354_v51, %v5339_v25  ;;  %v5356_v58 = vpop.permute.xlu1 %5355 }
0x23a1   :  { %v9168_v23 = vadd.f32 %v5356_v58, %v5340_v48 }
0x23a2   :  { %7701 = vtanh.f32 %v9165_v8 }
0x23a3   :  { %7703 = vtanh.f32 %v9168_v23  ;;  %v5214_v7 = vpop.permute.xlu0 %5213 }
0x23a4   :  { %v9173_v22 = vadd.f32 %v5214_v7, %v5199_v21  ;;  %v5216_v37 = vpop.permute.xlu1 %5215 }
0x23a5   :  { %v9175_v40 = vadd.f32 %v5216_v37, %v5200_v35 }
0x23a6   :  { %7705 = vtanh.f32 %v9173_v22 }
0x23a7   :  { %7707 = vtanh.f32 %v9175_v40 }
0x23af   :  { %v7702_v36 = vpop.eup %7701 }
0x23b0   :  { %v7704_v38 = vpop.eup %7703  ;;  %5365 = vrot.lane.b32.xlu0 %v7702_v36, %s8202_s24 }
0x23b1   :  { %5367 = vrot.lane.b32.xlu1 %v7704_v38, %s8202_s24 }
0x23b3   :  { %v7706_v31 = vpop.eup %7705 }
0x23b4   :  { %v7708_v4 = vpop.eup %7707  ;;  %5225 = vrot.lane.b32.xlu0 %v7706_v31, %s8202_s24 }
0x23b5   :  { %5227 = vrot.lane.b32.xlu1 %v7708_v4, %s8202_s24 }
0x2422   :  { %v5366_v16 = vpop.permute.xlu0 %5365 }
0x2423   :  { %v9183_v43 = vmul.f32 %v7694_v33, %v5366_v16  ;;  %v5368_v15 = vpop.permute.xlu1 %5367 }
0x2424   :  { %v9185_v47 = vmul.f32 %v7696_v26, %v5368_v15 }
0x2425   :  { %v5515_v54 = vrot.slane %v9183_v43, 4 }
0x2426   :  { %v5516_v56 = vrot.slane %v9185_v47, 3  ;;  %v5226_v60 = vpop.permute.xlu0 %5225 }
0x2427   :  { %v5231_v20 = vmul.f32 %v7698_v30, %v5226_v60  ;;  %v5228_v3 = vpop.permute.xlu1 %5227  ;;  %v5616_v60 = vrot.slane %v9168_v23, 1 }
0x2428   :  { %v5517_v19 = vsel %vm2106_vm4, %v5516_v56, %v5515_v54  ;;  %v5232_v49 = vmul.f32 %v7700_v42, %v5228_v3  ;;  %v5615_v56 = vrot.slane %v9165_v8, 1 }
0x2429   :  { %5518 = vrot.lane.b32.xlu0 %v5517_v19, %s8224_s7  ;;  %v5375_v12 = vrot.slane %v5231_v20, 3 }
0x242a   :  { %v5376_v61 = vrot.slane %v5232_v49, 2  ;;  %v6490_v11 = vrot.slane %v5232_v49, 7 }
0x242c   :  { %v5377_v53 = vsel %vm2106_vm4, %v5376_v61, %v5375_v12  ;;  %v9193_v6 = vsel %vm6491_vm13, %v6490_v11, %v5231_v20  ;;  %v5475_v61 = vrot.slane %v9173_v22, 7 }
0x242d   :  { %5378 = vrot.lane.b32.xlu1 %v5377_v53, %s8224_s7  ;;  %v5476_v53 = vrot.slane %v9175_v40, 7 }
0x249b   :  { %v5519_v46 = vpop.permute.xlu0 %5518 }
0x249c   :  { %7265 = vmatmul.mubr.msk.f32.vlgmr.msra.gmra.mxu1 %vm1849_vm5, %v5519_v46 }
0x249d   :  { %7273 = vmatpush3.msra.mxu1 %v8981_v62  ;;  %7274 = vmatprep.mubr.msk.f32.mxu1 %vm8222_vm3, %v8221_v0 }
0x249e   :  { %7282 = vmatprep.subr.mxu1 %v8221_v0 }
0x249f   :  { %v5379_v45 = vpop.permute.xlu1 %5378 }
0x24a0   :  { %7260 = vmatmul.mubr.msk.f32.vlgmr.msra.gmra.mxu0 %vm1849_vm5, %v5379_v45 }
0x24a1   :  { %7268 = vmatpush3.msra.mxu0 %v8983_v27  ;;  %7269 = vmatprep.mubr.msk.f32.mxu0 %vm8222_vm3, %v8221_v0 }
0x24a2   :  { %7277 = vmatprep.subr.mxu0 %v8221_v0 }
0x255c   :  { %v5588_v39 = vpop.f32.mrf.mxu1 }
0x255d   :  { %v5593_v1 = vrot.slane %v5588_v39, 5  ;;  %v5594_v5 = vrot.slane %v5588_v39, 6 }
0x255e   :  { %v7266_v17 = vpop.f32.mrf.mxu1 }
0x255f   :  { %v5597_v62 = vadd.f32 %v5593_v1, %v9009_v55  ;;  %v5598_v29 = vadd.f32 %v5594_v5, %v9011_v63 }
0x2560   :  { %v5448_v57 = vpop.f32.mrf.mxu0 }
0x2561   :  { %7709 = vtanh.f32 %v5597_v62  ;;  %v5453_v14 = vrot.slane %v5448_v57, 4  ;;  %v5454_v33 = vrot.slane %v5448_v57, 5  ;;  %v6742_v13 = vmul.f32 -1.442695, %v5597_v62 }
0x2562   :  { %7711 = vtanh.f32 %v5598_v29  ;;  %v7261_v18 = vpop.f32.mrf.mxu0  ;;  %v6743_v42 = vmul.f32 -1.442695, %v5598_v29 }
0x2563   :  { %v5457_v27 = vadd.f32 %v5453_v14, %v9014_v10  ;;  %v5458_v26 = vadd.f32 %v5454_v33, %v9017_v50 }
0x2565   :  { %7713 = vtanh.f32 %v5457_v27  ;;  %v6739_v44 = vmul.f32 -1.442695, %v5457_v27  ;;  %v6740_v52 = vmul.f32 -1.442695, %v5458_v26 }
0x2566   :  { %7715 = vtanh.f32 %v5458_v26 }
0x2567   :  { %7717 = vpow2.f32 %v6742_v13 }
0x2568   :  { %7719 = vpow2.f32 %v6743_v42 }
0x2569   :  { %7721 = vpow2.f32 %v6739_v44 }
0x256a   :  { %7723 = vpow2.f32 %v6740_v52  ;;  %v9246_v52 = vld [vmem:[%s9399_s18] sm:$0xff]  ;;  %s8226_s18 = smov [#allocation29]  }
0x256e   :  { %v7710_v34 = vpop.eup %7709 }
0x256f   :  { %v7712_v9 = vpop.eup %7711  ;;  %5623 = vrot.lane.b32.xlu0 %v7710_v34, %s8223_s12 }
0x2570   :  { %5625 = vrot.lane.b32.xlu1 %v7712_v9, %s8223_s12 }
0x2572   :  { %v7714_v28 = vpop.eup %7713 }
0x2573   :  { %v7716_v30 = vpop.eup %7715  ;;  %5483 = vrot.lane.b32.xlu0 %v7714_v28, %s8223_s12 }
0x2574   :  { %5485 = vrot.lane.b32.xlu1 %v7716_v30, %s8223_s12  ;;  %v7718_v2 = vpop.eup %7717 }
0x2575   :  { %v7720_v32 = vpop.eup %7719  ;;  %v5605_v41 = vadd.f32 1.0, %v7718_v2 }
0x2576   :  { %v5606_v25 = vadd.f32 1.0, %v7720_v32  ;;  %v7722_v51 = vpop.eup %7721  ;;  %v9253_v32 = vld [vmem:[#allocation24] sm:$0xff] }
0x2577   :  { %v7724_v48 = vpop.eup %7723  ;;  %7725 = vrcp.f32 %v5605_v41  ;;  %v5465_v58 = vadd.f32 1.0, %v7722_v51 }
0x2578   :  { %7727 = vrcp.f32 %v5606_v25  ;;  %v5466_v59 = vadd.f32 1.0, %v7724_v48 }
0x2579   :  { %7729 = vrcp.f32 %v5465_v58 }
0x257a   :  { %7731 = vrcp.f32 %v5466_v59 }
0x2584   :  { %v7726_v24 = vpop.eup %7725 }
0x2585   :  { %v7728_v7 = vpop.eup %7727  ;;  %v5619_v20 = vmul.f32 %v7726_v24, %v5615_v56 }
0x2586   :  { %v7730_v38 = vpop.eup %7729  ;;  %v5620_v19 = vmul.f32 %v7728_v7, %v5616_v60 }
0x2587   :  { %v7732_v4 = vpop.eup %7731  ;;  %v5479_v46 = vmul.f32 %v7730_v38, %v5475_v61 }
0x2588   :  { %v5480_v45 = vmul.f32 %v7732_v4, %v5476_v53 }
0x25e1   :  { %v5624_v21 = vpop.permute.xlu0 %5623 }
0x25e2   :  { %v5629_v35 = vmul.f32 %v7726_v24, %v5624_v21  ;;  %v5626_v37 = vpop.permute.xlu1 %5625 }
0x25e3   :  { %v5630_v36 = vmul.f32 %v7728_v7, %v5626_v37 }
0x25e4   :  { %5633 = vrot.lane.b32.xlu0 %v5629_v35, %s8212_s23 }
0x25e5   :  { %5635 = vrot.lane.b32.xlu1 %v5630_v36, %s8212_s23  ;;  %v5484_v31 = vpop.permute.xlu0 %5483 }
0x25e6   :  { %v5489_v16 = vmul.f32 %v7730_v38, %v5484_v31  ;;  %v5486_v15 = vpop.permute.xlu1 %5485 }
0x25e7   :  { %v5490_v54 = vmul.f32 %v7732_v4, %v5486_v15 }
0x25e8   :  { %5493 = vrot.lane.b32.xlu0 %v5489_v16, %s8212_s23 }
0x25e9   :  { %5495 = vrot.lane.b32.xlu1 %v5490_v54, %s8212_s23 }
0x2656   :  { %v5634_v3 = vpop.permute.xlu0 %5633 }
0x2657   :  { %v9220_v49 = vadd.f32 %v5634_v3, %v5619_v20  ;;  %v5636_v12 = vpop.permute.xlu1 %5635 }
0x2658   :  { %v9223_v11 = vadd.f32 %v5636_v12, %v5620_v19 }
0x2659   :  { %7733 = vtanh.f32 %v9220_v49 }
0x265a   :  { %7735 = vtanh.f32 %v9223_v11  ;;  %v5494_v8 = vpop.permute.xlu0 %5493 }
0x265b   :  { %v9228_v23 = vadd.f32 %v5494_v8, %v5479_v46  ;;  %v5496_v39 = vpop.permute.xlu1 %5495 }
0x265c   :  { %v9230_v1 = vadd.f32 %v5496_v39, %v5480_v45 }
0x265d   :  { %7737 = vtanh.f32 %v9228_v23 }
0x265e   :  { %7739 = vtanh.f32 %v9230_v1 }
0x2666   :  { %v7734_v22 = vpop.eup %7733 }
0x2667   :  { %v7736_v5 = vpop.eup %7735  ;;  %5645 = vrot.lane.b32.xlu0 %v7734_v22, %s8202_s24 }
0x2668   :  { %5647 = vrot.lane.b32.xlu1 %v7736_v5, %s8202_s24 }
0x266a   :  { %v7738_v40 = vpop.eup %7737 }
0x266b   :  { %v7740_v17 = vpop.eup %7739  ;;  %5505 = vrot.lane.b32.xlu0 %v7738_v40, %s8202_s24 }
0x266c   :  { %5507 = vrot.lane.b32.xlu1 %v7740_v17, %s8202_s24 }
0x26d9   :  { %v5646_v62 = vpop.permute.xlu0 %5645 }
0x26da   :  { %v5651_v29 = vmul.f32 %v7726_v24, %v5646_v62  ;;  %v5648_v57 = vpop.permute.xlu1 %5647 }
0x26db   :  { %v5652_v14 = vmul.f32 %v7728_v7, %v5648_v57 }
0x26dc   :  { %v5795_v33 = vrot.slane %v5651_v29, 3 }
0x26dd   :  { %v5796_v18 = vrot.slane %v5652_v14, 2  ;;  %v5506_v27 = vpop.permute.xlu0 %5505 }
0x26de   :  { %v5511_v26 = vmul.f32 %v7730_v38, %v5506_v27  ;;  %v5508_v34 = vpop.permute.xlu1 %5507  ;;  %v5895_v27 = vrot.slane %v9220_v49, 1 }
0x26df   :  { %v5797_v9 = vsel %vm2106_vm4, %v5796_v18, %v5795_v33  ;;  %v5512_v28 = vmul.f32 %v7732_v4, %v5508_v34 }
0x26e0   :  { %5798 = vrot.lane.b32.xlu0 %v5797_v9, %s8224_s7  ;;  %v5655_v30 = vrot.slane %v5511_v26, 4  ;;  %v5896_v26 = vrot.slane %v9223_v11, 1 }
0x26e1   :  { %v5656_v13 = vrot.slane %v5512_v28, 3 }
0x26e3   :  { %v5657_v42 = vsel %vm2106_vm4, %v5656_v13, %v5655_v30 }
0x26e4   :  { %5658 = vrot.lane.b32.xlu1 %v5657_v42, %s8224_s7  ;;  %v5755_v42 = vrot.slane %v9228_v23, 7 }
0x2752   :  { %v5799_v44 = vpop.permute.xlu0 %5798 }
0x2753   :  { %7275 = vmatmul.mubr.msk.f32.vlgmr.msra.gmra.mxu1 %vm1849_vm5, %v5799_v44 }
0x2754   :  { %7283 = vmatpush3.msra.mxu1 %v9246_v52  ;;  %7284 = vmatprep.mubr.msk.f32.mxu1 %vm8222_vm3, %v8221_v0 }
0x2755   :  { %7292 = vmatprep.subr.mxu1 %v8221_v0 }
0x2756   :  { %v5659_v2 = vpop.permute.xlu1 %5658 }
0x2757   :  { %7270 = vmatmul.mubr.msk.f32.vlgmr.msra.gmra.mxu0 %vm1849_vm5, %v5659_v2  ;;  %v5756_v2 = vrot.slane %v9230_v1, 7 }
0x2758   :  { %7278 = vmatpush3.msra.mxu0 %v9253_v32  ;;  %7279 = vmatprep.mubr.msk.f32.mxu0 %vm8222_vm3, %v8221_v0 }
0x2759   :  { %7287 = vmatprep.subr.mxu0 %v8221_v0 }
0x2813   :  { %v5868_v41 = vpop.f32.mrf.mxu1 }
0x2814   :  { %v5873_v25 = vrot.slane %v5868_v41, 6  ;;  %v5874_v51 = vrot.slane %v5868_v41, 7 }
0x2815   :  { %v7276_v48 = vpop.f32.mrf.mxu1 }
0x2816   :  { %v5877_v58 = vadd.f32 %v5873_v25, %v9009_v55  ;;  %v5878_v59 = vadd.f32 %v5874_v51, %v9011_v63 }
0x2817   :  { %v5728_v24 = vpop.f32.mrf.mxu0 }
0x2818   :  { %7741 = vtanh.f32 %v5877_v58  ;;  %v5733_v21 = vrot.slane %v5728_v24, 3  ;;  %v5734_v7 = vrot.slane %v5728_v24, 4  ;;  %v6748_v15 = vmul.f32 -1.442695, %v5877_v58 }
0x2819   :  { %7743 = vtanh.f32 %v5878_v59  ;;  %v7271_v35 = vpop.f32.mrf.mxu0  ;;  %v6749_v54 = vmul.f32 -1.442695, %v5878_v59 }
0x281a   :  { %v5737_v37 = vadd.f32 %v5733_v21, %v9014_v10  ;;  %v5738_v36 = vadd.f32 %v5734_v7, %v9017_v50 }
0x281c   :  { %7745 = vtanh.f32 %v5737_v37  ;;  %v6745_v56 = vmul.f32 -1.442695, %v5737_v37  ;;  %v6746_v60 = vmul.f32 -1.442695, %v5738_v36 }
0x281d   :  { %7747 = vtanh.f32 %v5738_v36 }
0x281e   :  { %7749 = vpow2.f32 %v6748_v15 }
0x281f   :  { %7751 = vpow2.f32 %v6749_v54 }
0x2820   :  { %7753 = vpow2.f32 %v6745_v56 }
0x2821   :  { %7755 = vpow2.f32 %v6746_v60 }
0x2825   :  { %v7742_v38 = vpop.eup %7741 }
0x2826   :  { %v7744_v31 = vpop.eup %7743  ;;  %5903 = vrot.lane.b32.xlu0 %v7742_v38, %s8223_s12 }
0x2827   :  { %5905 = vrot.lane.b32.xlu1 %v7744_v31, %s8223_s12 }
0x2829   :  { %v7746_v4 = vpop.eup %7745 }
0x282a   :  { %v7748_v16 = vpop.eup %7747  ;;  %5763 = vrot.lane.b32.xlu0 %v7746_v4, %s8223_s12 }
0x282b   :  { %5765 = vrot.lane.b32.xlu1 %v7748_v16, %s8223_s12  ;;  %v7750_v20 = vpop.eup %7749 }
0x282c   :  { %v7752_v3 = vpop.eup %7751  ;;  %v5885_v19 = vadd.f32 1.0, %v7750_v20 }
0x282d   :  { %v5886_v12 = vadd.f32 1.0, %v7752_v3  ;;  %v7754_v61 = vpop.eup %7753 }
0x282e   :  { %v7756_v53 = vpop.eup %7755  ;;  %7757 = vrcp.f32 %v5885_v19  ;;  %v5745_v46 = vadd.f32 1.0, %v7754_v61 }
0x282f   :  { %7759 = vrcp.f32 %v5886_v12  ;;  %v5746_v8 = vadd.f32 1.0, %v7756_v53 }
0x2830   :  { %7761 = vrcp.f32 %v5745_v46 }
0x2831   :  { %7763 = vrcp.f32 %v5746_v8 }
0x283b   :  { %v7758_v45 = vpop.eup %7757 }
0x283c   :  { %v7760_v22 = vpop.eup %7759  ;;  %v5899_v34 = vmul.f32 %v7758_v45, %v5895_v27 }
0x283d   :  { %v7762_v62 = vpop.eup %7761  ;;  %v5900_v28 = vmul.f32 %v7760_v22, %v5896_v26 }
0x283e   :  { %v7764_v57 = vpop.eup %7763  ;;  %v5759_v41 = vmul.f32 %v7762_v62, %v5755_v42 }
0x283f   :  { %v5760_v25 = vmul.f32 %v7764_v57, %v5756_v2 }
0x2898   :  { %v5904_v39 = vpop.permute.xlu0 %5903 }
0x2899   :  { %v5909_v5 = vmul.f32 %v7758_v45, %v5904_v39  ;;  %v5906_v40 = vpop.permute.xlu1 %5905 }
0x289a   :  { %v5910_v17 = vmul.f32 %v7760_v22, %v5906_v40 }
0x289b   :  { %5913 = vrot.lane.b32.xlu0 %v5909_v5, %s8212_s23 }
0x289c   :  { %5915 = vrot.lane.b32.xlu1 %v5910_v17, %s8212_s23  ;;  %v5764_v29 = vpop.permute.xlu0 %5763 }
0x289d   :  { %v5769_v14 = vmul.f32 %v7762_v62, %v5764_v29  ;;  %v5766_v33 = vpop.permute.xlu1 %5765 }
0x289e   :  { %v5770_v18 = vmul.f32 %v7764_v57, %v5766_v33 }
0x289f   :  { %5773 = vrot.lane.b32.xlu0 %v5769_v14, %s8212_s23 }
0x28a0   :  { %5775 = vrot.lane.b32.xlu1 %v5770_v18, %s8212_s23 }
0x290d   :  { %v5914_v9 = vpop.permute.xlu0 %5913 }
0x290e   :  { %v9273_v30 = vadd.f32 %v5914_v9, %v5899_v34  ;;  %v5916_v13 = vpop.permute.xlu1 %5915 }
0x290f   :  { %v9276_v44 = vadd.f32 %v5916_v13, %v5900_v28 }
0x2910   :  { %7765 = vtanh.f32 %v9273_v30 }
0x2911   :  { %7767 = vtanh.f32 %v9276_v44  ;;  %v5774_v49 = vpop.permute.xlu0 %5773 }
0x2912   :  { %v9281_v11 = vadd.f32 %v5774_v49, %v5759_v41  ;;  %v5776_v51 = vpop.permute.xlu1 %5775 }
0x2913   :  { %v9283_v48 = vadd.f32 %v5776_v51, %v5760_v25 }
0x2914   :  { %7769 = vtanh.f32 %v9281_v11 }
0x2915   :  { %7771 = vtanh.f32 %v9283_v48 }
0x291d   :  { %v7766_v23 = vpop.eup %7765 }
0x291e   :  { %v7768_v58 = vpop.eup %7767  ;;  %5925 = vrot.lane.b32.xlu0 %v7766_v23, %s8202_s24 }
0x291f   :  { %5927 = vrot.lane.b32.xlu1 %v7768_v58, %s8202_s24 }
0x2921   :  { %v7770_v1 = vpop.eup %7769 }
0x2922   :  { %v7772_v59 = vpop.eup %7771  ;;  %5785 = vrot.lane.b32.xlu0 %v7770_v1, %s8202_s24 }
0x2923   :  { %5787 = vrot.lane.b32.xlu1 %v7772_v59, %s8202_s24 }
0x2990   :  { %v5926_v24 = vpop.permute.xlu0 %5925 }
0x2991   :  { %v5931_v21 = vmul.f32 %v7758_v45, %v5926_v24  ;;  %v5928_v7 = vpop.permute.xlu1 %5927 }
0x2992   :  { %v5932_v35 = vmul.f32 %v7760_v22, %v5928_v7  ;;  %v6174_v7 = vrot.slane %v9273_v30, 1 }
0x2993   :  { %v6075_v37 = vrot.slane %v5931_v21, 2 }
0x2994   :  { %v6076_v36 = vrot.slane %v5932_v35, 1  ;;  %v5786_v38 = vpop.permute.xlu0 %5785 }
0x2995   :  { %v5791_v31 = vmul.f32 %v7762_v62, %v5786_v38  ;;  %v5788_v4 = vpop.permute.xlu1 %5787 }
0x2996   :  { %v6077_v16 = vsel %vm2106_vm4, %v6076_v36, %v6075_v37  ;;  %v5792_v15 = vmul.f32 %v7764_v57, %v5788_v4  ;;  %v6035_v36 = vrot.slane %v9281_v11, 7 }
0x2997   :  { %6078 = vrot.lane.b32.xlu0 %v6077_v16, %s8224_s7  ;;  %v5935_v54 = vrot.slane %v5791_v31, 5  ;;  %v6036_v31 = vrot.slane %v9283_v48, 7 }
0x2998   :  { %v5936_v56 = vrot.slane %v5792_v15, 4 }
0x299a   :  { %v5937_v60 = vsel %vm2106_vm4, %v5936_v56, %v5935_v54  ;;  %v6175_v54 = vrot.slane %v9276_v44, 1 }
0x299b   :  { %5938 = vrot.lane.b32.xlu1 %v5937_v60, %s8224_s7 }
0x2a09   :  { %v6079_v20 = vpop.permute.xlu0 %6078 }
0x2a0a   :  { %7285 = vmatmul.mubr.msk.f32.vlgmr.msra.gmra.mxu1 %vm1849_vm5, %v6079_v20 }
0x2a0b   :  { %7293 = vmatpush3.msra.mxu1 %v9246_v52  ;;  %7294 = vmatprep.mubr.msk.f32.mxu1 %vm8222_vm3, %v8221_v0 }
0x2a0d   :  { %v5939_v3 = vpop.permute.xlu1 %5938 }
0x2a0e   :  { %7280 = vmatmul.mubr.msk.f32.vlgmr.msra.gmra.mxu0 %vm1849_vm5, %v5939_v3 }
0x2a0f   :  { %7288 = vmatpush3.msra.mxu0 %v9253_v32  ;;  %7289 = vmatprep.mubr.msk.f32.mxu0 %vm8222_vm3, %v8221_v0 }
0x2aca   :  { %v6148_v19 = vpop.f32.mrf.mxu1 }
0x2acb   :  { %v6153_v12 = vrot.slane %v6148_v19, 7  ;;  %v6157_v5 = vadd.f32 %v6148_v19, %v9011_v63 }
0x2acc   :  { %v7286_v61 = vpop.f32.mrf.mxu1 }
0x2acd   :  { %v6156_v53 = vadd.f32 %v6153_v12, %v9009_v55  ;;  %v6755_v14 = vmul.f32 -1.442695, %v6157_v5 }
0x2ace   :  { %v6008_v46 = vpop.f32.mrf.mxu0 }
0x2acf   :  { %7773 = vtanh.f32 %v6156_v53  ;;  %v6013_v8 = vrot.slane %v6008_v46, 2  ;;  %v6014_v52 = vrot.slane %v6008_v46, 3  ;;  %v6754_v62 = vmul.f32 -1.442695, %v6156_v53 }
0x2ad0   :  { %v7281_v45 = vpop.f32.mrf.mxu0 }
0x2ad1   :  { %v6017_v39 = vadd.f32 %v6013_v8, %v9014_v10  ;;  %v6018_v22 = vadd.f32 %v6014_v52, %v9017_v50 }
0x2ad3   :  { %7775 = vtanh.f32 %v6017_v39  ;;  %v6751_v29 = vmul.f32 -1.442695, %v6017_v39  ;;  %v6752_v57 = vmul.f32 -1.442695, %v6018_v22 }
0x2ad4   :  { %7777 = vtanh.f32 %v6018_v22 }
0x2ad5   :  { %7779 = vtanh.f32 %v6157_v5 }
0x2ad6   :  { %7781 = vpow2.f32 %v6754_v62 }
0x2ad7   :  { %7783 = vpow2.f32 %v6751_v29 }
0x2ad8   :  { %7785 = vpow2.f32 %v6752_v57 }
0x2ad9   :  { %7787 = vpow2.f32 %v6755_v14 }
0x2adc   :  { %v7774_v0 = vpop.eup %7773 }
0x2add   :  { %6182 = vrot.lane.b32.xlu0 %v7774_v0, %s8223_s12 }
0x2ae0   :  { %v7776_v32 = vpop.eup %7775 }
0x2ae1   :  { %v7778_v40 = vpop.eup %7777  ;;  %6043 = vrot.lane.b32.xlu1 %v7776_v32, %s8223_s12 }
0x2ae2   :  { %6045 = vrot.lane.b32.xlu0 %v7778_v40, %s8223_s12  ;;  %v7780_v17 = vpop.eup %7779 }
0x2ae3   :  { %v7782_v33 = vpop.eup %7781 }
0x2ae4   :  { %v6164_v18 = vadd.f32 1.0, %v7782_v33  ;;  %v7784_v27 = vpop.eup %7783 }
0x2ae5   :  { %6184 = vrot.lane.b32.xlu1 %v7780_v17, %s8223_s12  ;;  %v7786_v26 = vpop.eup %7785  ;;  %v6025_v34 = vadd.f32 1.0, %v7784_v27 }
0x2ae6   :  { %7789 = vrcp.f32 %v6164_v18  ;;  %v7788_v9 = vpop.eup %7787  ;;  %v6026_v28 = vadd.f32 1.0, %v7786_v26 }
0x2ae7   :  { %v6165_v13 = vadd.f32 1.0, %v7788_v9  ;;  %7791 = vrcp.f32 %v6025_v34 }
0x2ae8   :  { %7793 = vrcp.f32 %v6026_v28 }
0x2ae9   :  { %7795 = vrcp.f32 %v6165_v13 }
0x2af3   :  { %v7790_v42 = vpop.eup %7789 }
0x2af4   :  { %v7792_v49 = vpop.eup %7791  ;;  %v6178_v35 = vmul.f32 %v7790_v42, %v6174_v7 }
0x2af5   :  { %v7794_v51 = vpop.eup %7793  ;;  %v6039_v4 = vmul.f32 %v7792_v49, %v6035_v36 }
0x2af6   :  { %v7796_v59 = vpop.eup %7795  ;;  %v6040_v16 = vmul.f32 %v7794_v51, %v6036_v31 }
0x2af7   :  { %v6179_v30 = vmul.f32 %v7796_v59, %v6175_v54 }
0x2b4f   :  { %v6183_v2 = vpop.permute.xlu0 %6182 }
0x2b50   :  { %v6188_v41 = vmul.f32 %v7790_v42, %v6183_v2 }
0x2b52   :  { %6192 = vrot.lane.b32.xlu0 %v6188_v41, %s8212_s23 }
0x2b53   :  { %v6044_v25 = vpop.permute.xlu1 %6043 }
0x2b54   :  { %v6046_v23 = vpop.permute.xlu0 %6045  ;;  %v6049_v58 = vmul.f32 %v7792_v49, %v6044_v25 }
0x2b55   :  { %v6050_v1 = vmul.f32 %v7794_v51, %v6046_v23 }
0x2b56   :  { %6053 = vrot.lane.b32.xlu1 %v6049_v58, %s8212_s23 }
0x2b57   :  { %6055 = vrot.lane.b32.xlu0 %v6050_v1, %s8212_s23  ;;  %v6185_v24 = vpop.permute.xlu1 %6184 }
0x2b58   :  { %v6189_v21 = vmul.f32 %v7796_v59, %v6185_v24 }
0x2b5a   :  { %6194 = vrot.lane.b32.xlu1 %v6189_v21, %s8212_s23 }
0x2bc4   :  { %v6193_v37 = vpop.permute.xlu0 %6192 }
0x2bc5   :  { %v9317_v38 = vadd.f32 %v6193_v37, %v6178_v35 }
0x2bc7   :  { %7797 = vtanh.f32 %v9317_v38 }
0x2bc8   :  { %v6054_v15 = vpop.permute.xlu1 %6053 }
0x2bc9   :  { %v6056_v56 = vpop.permute.xlu0 %6055  ;;  %v9322_v60 = vadd.f32 %v6054_v15, %v6039_v4 }
0x2bca   :  { %v9324_v20 = vadd.f32 %v6056_v56, %v6040_v16 }
0x2bcb   :  { %7799 = vtanh.f32 %v9322_v60 }
0x2bcc   :  { %7801 = vtanh.f32 %v9324_v20  ;;  %v6195_v11 = vpop.permute.xlu1 %6194 }
0x2bcd   :  { %v9328_v3 = vadd.f32 %v6195_v11, %v6179_v30 }
0x2bcf   :  { %7803 = vtanh.f32 %v9328_v3 }
0x2bd4   :  { %v7798_v48 = vpop.eup %7797 }
0x2bd5   :  { %6204 = vrot.lane.b32.xlu0 %v7798_v48, %s8202_s24 }
0x2bd8   :  { %v7800_v19 = vpop.eup %7799 }
0x2bd9   :  { %v7802_v44 = vpop.eup %7801  ;;  %6065 = vrot.lane.b32.xlu1 %v7800_v19, %s8202_s24  ;;  %v6452_v19 = vrot.slane %v9317_v38, 1 }
0x2bda   :  { %6067 = vrot.lane.b32.xlu0 %v7802_v44, %s8202_s24 }
0x2bdc   :  { %v7804_v12 = vpop.eup %7803 }
0x2bdd   :  { %6206 = vrot.lane.b32.xlu1 %v7804_v12, %s8202_s24 }
0x2c47   :  { %v6205_v61 = vpop.permute.xlu0 %6204 }
0x2c48   :  { %v6210_v46 = vmul.f32 %v7790_v42, %v6205_v61  ;;  %v6314_v61 = vrot.slane %v9322_v60, 7 }
0x2c4a   :  { %v6354_v0 = vrot.slane %v6210_v46, 1 }
0x2c4b   :  { %v6066_v53 = vpop.permute.xlu1 %6065 }
0x2c4c   :  { %v6068_v8 = vpop.permute.xlu0 %6067  ;;  %v6071_v52 = vmul.f32 %v7792_v49, %v6066_v53 }
0x2c4d   :  { %v6072_v45 = vmul.f32 %v7794_v51, %v6068_v8  ;;  %v6453_v8 = vrot.slane %v9328_v3, 1 }
0x2c4e   :  { %v6214_v39 = vrot.slane %v6071_v52, 6 }
0x2c4f   :  { %v6215_v22 = vrot.slane %v6072_v45, 5  ;;  %v6207_v5 = vpop.permute.xlu1 %6206 }
0x2c50   :  { %v6211_v32 = vmul.f32 %v7796_v59, %v6207_v5  ;;  %v6315_v5 = vrot.slane %v9324_v20, 7  ;;  %v6514_v20 = vrot.slane %v9183_v43, 5 }
0x2c51   :  { %v6216_v40 = vsel %vm2106_vm4, %v6215_v22, %v6214_v39 }
0x2c52   :  { %6217 = vrot.lane.b32.xlu1 %v6216_v40, %s8224_s7  ;;  %v6355_v17 = vsel %vm2106_vm4, %v6211_v32, %v6354_v0 }
0x2c53   :  { %6356 = vrot.lane.b32.xlu0 %v6355_v17, %s8224_s7 }
0x2cc4   :  { %v6218_v62 = vpop.permute.xlu1 %6217 }
0x2cc5   :  { %7290 = vmatmul.mubr.msk.f32.vlgmr.msra.gmra.mxu0 %vm1849_vm5, %v6218_v62  ;;  %v6357_v29 = vpop.permute.xlu0 %6356 }
0x2cc6   :  { %7295 = vmatmul.mubr.msk.f32.vlgmr.msra.gmra.mxu1 %vm1849_vm5, %v6357_v29 }
0x2d85   :  { %v6287_v57 = vpop.f32.mrf.mxu0 }
0x2d86   :  { %v6292_v14 = vrot.slane %v6287_v57, 1  ;;  %v6426_v33 = vpop.f32.mrf.mxu1  ;;  %v6293_v28 = vrot.slane %v6287_v57, 2 }
0x2d87   :  { %v7291_v18 = vpop.f32.mrf.mxu0  ;;  %v6434_v27 = vadd.f32 %v6426_v33, %v9009_v55  ;;  %v6431_v26 = vrot.slane %v6426_v33, 1 }
0x2d88   :  { %v7296_v34 = vpop.f32.mrf.mxu1  ;;  %v6296_v9 = vadd.f32 %v6292_v14, %v9014_v10  ;;  %v6297_v42 = vadd.f32 %v6293_v28, %v9017_v50 }
0x2d89   :  { %7805 = vtanh.f32 %v6434_v27  ;;  %v6435_v13 = vadd.f32 %v6431_v26, %v9011_v63  ;;  %v6760_v10 = vmul.f32 -1.442695, %v6434_v27 }
0x2d8a   :  { %7807 = vtanh.f32 %v6296_v9  ;;  %v6757_v25 = vmul.f32 -1.442695, %v6296_v9  ;;  %v6758_v50 = vmul.f32 -1.442695, %v6297_v42 }
0x2d8b   :  { %7809 = vtanh.f32 %v6435_v13  ;;  %v6761_v63 = vmul.f32 -1.442695, %v6435_v13 }
0x2d8c   :  { %7811 = vtanh.f32 %v6297_v42  ;;  %v6515_v42 = vrot.slane %v9185_v47, 4 }
0x2d8d   :  { %7813 = vpow2.f32 %v6760_v10 }
0x2d8e   :  { %7815 = vpow2.f32 %v6757_v25 }
0x2d8f   :  { %7817 = vpow2.f32 %v6761_v63 }
0x2d90   :  { %7819 = vpow2.f32 %v6758_v50 }
0x2d96   :  { %v7806_v2 = vpop.eup %7805 }
0x2d97   :  { %6460 = vrot.lane.b32.xlu0 %v7806_v2, %s8223_s12  ;;  %v7808_v41 = vpop.eup %7807  ;;  %v8225_v2 = vmov 1966171168  }
0x2d98   :  { %v7810_v55 = vpop.eup %7809 }
0x2d99   :  { %6462 = vrot.lane.b32.xlu1 %v7810_v55, %s8223_s12  ;;  %v7812_v49 = vpop.eup %7811  ;;  %v6529_v55 = vlaneseq }
0x2d9a   :  { %v7814_v51 = vpop.eup %7813 }
0x2d9b   :  { %6322 = vrot.lane.b32.xlu0 %v7808_v41, %s8223_s12  ;;  %v6442_v23 = vadd.f32 1.0, %v7814_v51  ;;  %v7816_v58 = vpop.eup %7815  ;;  %v6527_v41 = vunpack.c.l.s4 %v8225_v2  ;;  %v6530_v10 = vshrl.u32 %v6529_v55, 7 }
0x2d9c   :  { %v7818_v1 = vpop.eup %7817  ;;  %v6304_v59 = vadd.f32 1.0, %v7816_v58 }
0x2d9d   :  { %6324 = vrot.lane.b32.xlu1 %v7812_v49, %s8223_s12  ;;  %7821 = vrcp.f32 %v6442_v23  ;;  %v6443_v24 = vadd.f32 1.0, %v7818_v1  ;;  %v7820_v21 = vpop.eup %7819  ;;  %v6528_v49 = vunpack.c.0.s8 %v6527_v41 }
0x2d9e   :  { %7823 = vrcp.f32 %v6304_v59  ;;  %v6305_v7 = vadd.f32 1.0, %v7820_v21 }
0x2d9f   :  { %7825 = vrcp.f32 %v6443_v24  ;;  %v6531_v63 = vsub.s32 %v6528_v49, %v6530_v10 }
0x2da0   :  { %7827 = vrcp.f32 %v6305_v7 }
0x2daa   :  { %v7822_v35 = vpop.eup %7821 }
0x2dab   :  { %v7824_v31 = vpop.eup %7823  ;;  %v6456_v44 = vmul.f32 %v7822_v35, %v6452_v19 }
0x2dac   :  { %v7826_v15 = vpop.eup %7825  ;;  %v6318_v46 = vmul.f32 %v7824_v31, %v6314_v61 }
0x2dad   :  { %v7828_v30 = vpop.eup %7827  ;;  %v6457_v39 = vmul.f32 %v7826_v15, %v6453_v8 }
0x2dae   :  { %v6319_v32 = vmul.f32 %v7828_v30, %v6315_v5 }
0x2e09   :  { %v6461_v37 = vpop.permute.xlu0 %6460 }
0x2e0a   :  { %v6466_v36 = vmul.f32 %v7822_v35, %v6461_v37 }
0x2e0b   :  { %v6463_v54 = vpop.permute.xlu1 %6462 }
0x2e0c   :  { %6470 = vrot.lane.b32.xlu0 %v6466_v36, %s8212_s23  ;;  %v6467_v56 = vmul.f32 %v7826_v15, %v6463_v54 }
0x2e0d   :  { %v6323_v4 = vpop.permute.xlu0 %6322 }
0x2e0e   :  { %v6328_v16 = vmul.f32 %v7824_v31, %v6323_v4  ;;  %6472 = vrot.lane.b32.xlu1 %v6467_v56, %s8212_s23 }
0x2e0f   :  { %v6325_v11 = vpop.permute.xlu1 %6324 }
0x2e10   :  { %6332 = vrot.lane.b32.xlu0 %v6328_v16, %s8212_s23  ;;  %v6329_v48 = vmul.f32 %v7828_v30, %v6325_v11 }
0x2e12   :  { %6334 = vrot.lane.b32.xlu1 %v6329_v48, %s8212_s23 }
0x2e7e   :  { %v6471_v12 = vpop.permute.xlu0 %6470 }
0x2e7f   :  { %v6476_v53 = vadd.f32 %v6471_v12, %v6456_v44 }
0x2e80   :  { %v6473_v22 = vpop.permute.xlu1 %6472 }
0x2e81   :  { %7829 = vtanh.f32 %v6476_v53  ;;  %v6477_v0 = vadd.f32 %v6473_v22, %v6457_v39 }
0x2e82   :  { %v6333_v52 = vpop.permute.xlu0 %6332 }
0x2e83   :  { %v6338_v45 = vadd.f32 %v6333_v52, %v6318_v46 }
0x2e84   :  { %v6335_v38 = vpop.permute.xlu1 %6334 }
0x2e85   :  { %7831 = vtanh.f32 %v6338_v45  ;;  %v6339_v40 = vadd.f32 %v6335_v38, %v6319_v32 }
0x2e86   :  { %7833 = vtanh.f32 %v6477_v0 }
0x2e87   :  { %7835 = vtanh.f32 %v6339_v40 }
0x2e8e   :  { %v7830_v17 = vpop.eup %7829 }
0x2e8f   :  { %6482 = vrot.lane.b32.xlu0 %v7830_v17, %s8202_s24 }
0x2e92   :  { %v7832_v60 = vpop.eup %7831 }
0x2e93   :  { %6344 = vrot.lane.b32.xlu0 %v7832_v60, %s8202_s24  ;;  %v7834_v3 = vpop.eup %7833 }
0x2e94   :  { %6484 = vrot.lane.b32.xlu1 %v7834_v3, %s8202_s24  ;;  %v7836_v62 = vpop.eup %7835 }
0x2e98   :  { %6346 = vrot.lane.b32.xlu1 %v7836_v62, %s8202_s24  ;;  %s6603_s24 = sshll.u32 %s8226_s18, 4  ;;  %s6604_s24 = int_to_ptr.vmem [resolvable:$true] %s6603_s24 }
0x2e99   :  { %s8161_s23 = scalar_lea.vmem %s6604_s24, 64  ;;  %p8166_p11 = scmp.lt.s32.totalorder %s6604_s24, %s6604_s24 }
0x2e9a   :  { %p8162_p10 = scmp.ne.s32.totalorder %s6604_s24, %s8161_s23  ;;  %p8167_p12 = scmp.lt.s32.totalorder %s8161_s23, %s8161_s23 }
0x2e9c   :  { %6516 = vrot.lane.b32.xlu1 %v6514_v20, %s8223_s12  ;;  %p8168_p13 = por %p8167_p12, %p8166_p11 }
0x2e9e   :  { %p8169_p0 = pnand %p8168_p13, %p8162_p10 }
0x2f01   :  { %v6483_v29 = vpop.permute.xlu0 %6482 }
0x2f02   :  { %v6488_v33 = vmul.f32 %v7822_v35, %v6483_v29 }
0x2f04   :  { %v6498_v26 = vrot.slane %v6488_v33, 5 }
0x2f05   :  { %v6345_v57 = vpop.permute.xlu0 %6344 }
0x2f06   :  { %v6350_v14 = vmul.f32 %v7824_v31, %v6345_v57  ;;  %v6485_v18 = vpop.permute.xlu1 %6484 }
0x2f07   :  { %v6489_v27 = vmul.f32 %v7826_v15, %v6485_v18 }
0x2f08   :  { %6508 = vrot.lane.b32.xlu0 %v6350_v14, %s8224_s7 }
0x2f09   :  { %v6499_v34 = vrot.slane %v6489_v27, 4 }
0x2f0a   :  { %v6347_v9 = vpop.permute.xlu1 %6346 }
0x2f0b   :  { %v6351_v28 = vmul.f32 %v7828_v30, %v6347_v9  ;;  %v6500_v13 = vsel %vm6491_vm13, %v6499_v34, %v6498_v26 }
0x2f0c   :  { %6493 = vrot.lane.b32.xlu0 %v9193_v6, %s8224_s7  ;;  %6501 = vrot.lane.b32.xlu1 %v6500_v13, %s8223_s12 }
0x2f0d   :  { %v6507_v43 = vrot.slane %v6351_v28, 7 }
0x2f0e   :  { %v6517_v25 = vpop.permute.xlu1 %6516 }
0x2f10   :  { %6510 = vrot.lane.b32.xlu0 %v6507_v43, %s8224_s7  ;;  %6518 = vrot.lane.b32.xlu1 %v6515_v42, %s8223_s12 }
0x2f7a   :  { %v6509_v6 = vpop.permute.xlu0 %6508 }
0x2f7b   :  { %v6522_v50 = vsel %vm1849_vm5, %v6509_v6, %v6517_v25 }
0x2f7c   :  { %v6563_v51 = vcombine.high %v6522_v50, %v6522_v50 }
0x2f7e   :  { %v6570_v23 = vrot.slane %v6563_v51, %v6531_v63  ;;  %v6494_v58 = vpop.permute.xlu0 %6493  ;;  %v6502_v59 = vpop.permute.xlu1 %6501 }
0x2f7f   :  { %v6504_v47 = vsel %vm1849_vm5, %v6494_v58, %v6502_v59 }
0x2f80   :  { %v6571_v1 = vcombine.high %v6570_v23, %v6570_v23  ;;  %v6525_v21 = vcombine.high %v6504_v47, %v6504_v47  ;;  %v6532_v7 = vrot.slane %v6504_v47, %v6531_v63 }
0x2f82   :  { %v6578_v24 = vrot.slane %v6571_v1, %v6531_v63  ;;  %v6511_v35 = vpop.permute.xlu0 %6510  ;;  %v6539_v36 = vrot.slane %v6525_v21, %v6531_v63  ;;  %v6540_v31 = vcombine.high %v6532_v7, %v6532_v7  ;;  %v6519_v4 = vpop.permute.xlu1 %6518 }
0x2f83   :  { %v6523_v16 = vsel %vm1849_vm5, %v6511_v35, %v6519_v4 }
0x2f84   :  { %v6579_v37 = vcombine.high %v6578_v24, %v6578_v24  ;;  %v6547_v15 = vrot.slane %v6539_v36, %v6531_v63  ;;  %v6554_v54 = vrot.slane %v6540_v31, %v6531_v63  ;;  %v6586_v56 = vrot.slane %v6523_v16, %v6531_v63 }
0x2f86   :  { %6596 = vst.msk [vmem:[#allocation29 + $0x1] sm:$0x1] %vm6558_vm14, %v6579_v37  ;;  %v6555_v30 = vcombine.high %v6554_v54, %v6554_v54  ;;  %6560 = vst.msk [vmem:[#allocation29 + $0x2] sm:$0x1] %vm6558_vm14, %v6547_v15  ;;  %v6593_v11 = vrot.slane %v6586_v56, %v6531_v63 }
0x2f88   :  { %6559 = vst.msk [vmem:[#allocation29] sm:$0x1] %vm6558_vm14, %v6555_v30  ;;  %6597 = vst.msk [vmem:[#allocation29 + $0x3] sm:$0x1] %vm6558_vm14, %v6593_v11 }
0x2f89   :  { %8172 = shalt.err (!%p8169_p0)
}
0x2f8a   :  { %s8227_s5 = smov 32   ;;  %s8228_s29 = smov 2  }
0x2f8b   :  { %6609 = dma.vmem_to_hbm [thread:$0]  %s6604_s24, 64, %s9401_s20, [#allocation5], %s8227_s5, %s8227_s5, %s8228_s29  }
0x2f8c   :  { %8199 = dma.done.wait [#allocation5], 64  }
0x2f8d   :  { %8200 = vsyncadd [#allocation5], 4294967232 }
0x2f8e   :  { %6613 = vsyncpa [#allocation4], 1 }
0x2f8f   :  { %6614 = vsyncpa [#allocation7], 1 }
0x2f90   :  { %6615 = vsyncpa [#allocation10], 1 }
0x2f91   :  { %6616 = vsyncpa [#allocation13], 1 }
0x2f92   :  { %6617 = vsyncpa [#allocation16], 1 }
0x2f93   :  { %6618 = vsyncpa [#allocation19], 1 }
0x2f94   :  { %6619 = vsyncpa [#allocation22], 1 }
0x2f95   :  { %6620 = vsyncpa [#allocation25], 1 }
0x2f96   :  { %6621 = vsyncpa [#allocation28], 1 }
0x2f97   :  { %6622 = vsyncpa [#allocation5], 1 }

</bundles_post_ra>
